<compile_context>
chip_gen: v6e
topology: v6e:2x2x1
jax: 0.10.0
libtpu: 0.0.40
codegen_flags: <defaults>
</compile_context>

<pallas_src>
import functools

import jax
import jax.numpy as jnp
from jax import lax
from jax.experimental import pallas as pl
from jax.experimental.pallas import tpu as pltpu


# ---------------------------------------------------------------------------
# Fused kernel: mean-pool -> L x fused-direction BiLSTM -> Linear -> CRF
# ---------------------------------------------------------------------------
def _fused_kernel(*refs, num_layers, seq_len, hidden, num_tags, use_ext):
    S, H, O = seq_len, hidden, num_tags

    it = iter(refs)
    tok_ref = next(it)          # (S*T, E) token embeddings, flattened
    mask_ref = next(it)         # (S, S*T) block-diagonal token mask
    ext_ref = next(it) if use_ext else None
    layer_refs = [(next(it), next(it), next(it)) for _ in range(num_layers)]
    wproj_ref = next(it)        # (2H, O)
    bproj_ref = next(it)        # (1, O)
    start_ref = next(it)        # (1, O)
    end_ref = next(it)          # (1, O)
    trans_ref = next(it)        # (O, O)
    logits_ref = next(it)       # out: (S, O) VMEM
    pred_ref = next(it)         # out: (S,)  SMEM

    # ---- 1) masked mean pooling as a single MXU matmul --------------------
    mask_bd = mask_ref[...]
    pooled = jnp.dot(mask_bd, tok_ref[...],
                     preferred_element_type=jnp.float32)           # (S, E)
    counts = jnp.sum(mask_bd, axis=1, keepdims=True)               # (S, 1)
    x = pooled / jnp.maximum(counts, 1e-9)
    if use_ext:
        x = jnp.concatenate([x, ext_ref[...]], axis=1)

    # reversal permutation (built once; reused for every layer)
    r_i = lax.broadcasted_iota(jnp.int32, (S, S), 0)
    c_i = lax.broadcasted_iota(jnp.int32, (S, S), 1)
    rev = (r_i + c_i == S - 1).astype(jnp.float32)                 # (S, S)

    # ---- 2) bidirectional LSTM stack (fwd + bwd fused per step) -----------
    # Gate column layout (8 blocks of width H):
    #   [i_f, i_b, f_f, f_b, o_f, o_b, g_f, g_b]
    # State layout: h/c = [dir_fwd (H) | dir_bwd (H)].
    for wih_ref, whh_ref, b_ref in layer_refs:
        x_rev = jnp.dot(rev, x, preferred_element_type=jnp.float32)
        x2 = jnp.concatenate([x, x_rev], axis=1)                   # (S, 2*Din)
        # row t holds fwd gates of x[t] and bwd gates of x[S-1-t]
        gx = (jnp.dot(x2, wih_ref[...], preferred_element_type=jnp.float32)
              + b_ref[...])                                        # (S, 8H)
        whh = whh_ref[...]                                         # (2H, 8H)

        h = jnp.zeros((1, 2 * H), jnp.float32)
        c = jnp.zeros((1, 2 * H), jnp.float32)
        h_steps = []
        for t in range(S):                       # fully unrolled recurrence
            gates = gx[t:t + 1, :] + jnp.dot(h, whh,
                                             preferred_element_type=jnp.float32)
            sig = jax.nn.sigmoid(gates[:, 0:6 * H])   # i|f|o : one EUP pass
            g = jnp.tanh(gates[:, 6 * H:8 * H])       # g     : one EUP pass
            c = sig[:, 2 * H:4 * H] * c + sig[:, 0:2 * H] * g
            h = sig[:, 4 * H:6 * H] * jnp.tanh(c)
            h_steps.append(h)

        h_all = jnp.concatenate(h_steps, axis=0)                   # (S, 2H)
        out_f = h_all[:, 0:H]                                      # position order
        out_b = jnp.dot(rev, h_all[:, H:2 * H],
                        preferred_element_type=jnp.float32)        # un-reverse bwd
        x = jnp.concatenate([out_f, out_b], axis=1)                # (S, 2H)
        # inter-layer LSTM dropout: identity in eval mode

    # ---- 3) projection + CRF Viterbi decode --------------------------------
    logits = (jnp.dot(x, wproj_ref[...], preferred_element_type=jnp.float32)
              + bproj_ref[...])                                    # (S, O)
    logits_ref[...] = logits

    eye = (lax.broadcasted_iota(jnp.int32, (O, O), 0) ==
           lax.broadcasted_iota(jnp.int32, (O, O), 1)).astype(jnp.float32)
    row_idx = lax.broadcasted_iota(jnp.int32, (O, O), 0)
    lane_idx = lax.broadcasted_iota(jnp.int32, (1, O), 1)
    trans = trans_ref[...]

    score = start_ref[...] + logits[0:1, :]                        # (1, O)
    history = []
    for t in range(1, S):                        # unrolled Viterbi forward
        col = jnp.sum(eye * score, axis=1, keepdims=True)          # (O, 1)
        cand = col + trans                                         # (O, O)
        best = jnp.max(cand, axis=0, keepdims=True)                # (1, O)
        bp = jnp.min(jnp.where(cand >= best, row_idx, O),
                     axis=0, keepdims=True).astype(jnp.int32)      # (1, O)
        score = best + logits[t:t + 1, :]
        history.append(bp)

    final = score + end_ref[...]
    fmax = jnp.max(final)
    tag = jnp.min(jnp.where(final >= fmax, lane_idx, O)).astype(jnp.int32)
    pred_ref[S - 1] = tag
    for p in range(S - 2, -1, -1):               # unrolled backtrack
        bp = history[p]
        tag = jnp.sum(jnp.where(lane_idx == tag, bp, 0)).astype(jnp.int32)
        pred_ref[p] = tag


# ---------------------------------------------------------------------------
# Jitted forward wrapper: gather + mask prep + one pallas_call
# ---------------------------------------------------------------------------
def _forward(params, ids, attn, extras, *, use_ext):
    emb_table, layer_params, wproj_t, bproj, crf_start, crf_end, crf_trans = params
    S, T = ids.shape
    E = emb_table.shape[1]
    H = layer_params[0][1].shape[0] // 2
    O = wproj_t.shape[1]

    tok = jnp.take(emb_table, ids, axis=0).reshape(S * T, E).astype(jnp.float32)
    mask = attn.astype(jnp.float32)
    mask_bd = (jnp.eye(S, dtype=jnp.float32)[:, :, None]
               * mask[None, :, :]).reshape(S, S * T)

    inputs = [tok, mask_bd]
    if use_ext:
        inputs.append(extras.astype(jnp.float32))
    for wih2, whh_bd, b2 in layer_params:
        inputs.extend([wih2, whh_bd, b2])
    inputs.extend([wproj_t, bproj, crf_start, crf_end, crf_trans])

    kernel = functools.partial(_fused_kernel, num_layers=len(layer_params),
                               seq_len=S, hidden=H, num_tags=O, use_ext=use_ext)
    logits, pred = pl.pallas_call(
        kernel,
        out_shape=(jax.ShapeDtypeStruct((S, O), jnp.float32),
                   jax.ShapeDtypeStruct((S,), jnp.int32)),
        in_specs=[pl.BlockSpec(memory_space=pltpu.MemorySpace.VMEM)] * len(inputs),
        out_specs=(pl.BlockSpec(memory_space=pltpu.MemorySpace.VMEM),
                   pl.BlockSpec(memory_space=pltpu.MemorySpace.SMEM)),
        compiler_params=pltpu.CompilerParams(vmem_limit_bytes=4 * 1024 * 1024),
    )(*inputs)
    return logits, pred


# ---------------------------------------------------------------------------
# One-time weight fusion (done in __init__, NOT per call)
# ---------------------------------------------------------------------------
def _fuse_bilstm_layer(fwd, bwd, H):
    """Build fused/interleaved weights for one bidirectional LSTM layer."""
    w_ih_f, w_hh_f, b_ih_f, b_hh_f = fwd
    w_ih_b, w_hh_b, b_ih_b, b_hh_b = bwd

    def gate_cols(w_t):   # (Din, 4H), PyTorch gate order [i, f, g, o]
        return (w_t[:, 0:H], w_t[:, H:2 * H], w_t[:, 2 * H:3 * H], w_t[:, 3 * H:4 * H])

    # Input weights: rows [x | reversed x], columns [i_f,i_b,f_f,f_b,o_f,o_b,g_f,g_b]
    wf_t, wb_t = w_ih_f.T, w_ih_b.T
    i_f, f_f, g_f, o_f = gate_cols(wf_t)
    i_b, f_b, g_b, o_b = gate_cols(wb_t)
    din = wf_t.shape[0]
    z = jnp.zeros((din, H), jnp.float32)
    wih2 = jnp.concatenate([
        jnp.concatenate([i_f, z, f_f, z, o_f, z, g_f, z], axis=1),
        jnp.concatenate([z, i_b, z, f_b, z, o_b, z, g_b], axis=1)], axis=0)

    # Recurrent weights: block-diagonal over [h_fwd | h_bwd], same column layout
    hf_t, hb_t = w_hh_f.T, w_hh_b.T
    hi_f, hf_f, hg_f, ho_f = gate_cols(hf_t)
    hi_b, hf_b, hg_b, ho_b = gate_cols(hb_t)
    zh = jnp.zeros((H, H), jnp.float32)
    whh_bd = jnp.concatenate([
        jnp.concatenate([hi_f, zh, hf_f, zh, ho_f, zh, hg_f, zh], axis=1),
        jnp.concatenate([zh, hi_b, zh, hf_b, zh, ho_b, zh, hg_b], axis=1)], axis=0)

    bf = b_ih_f + b_hh_f
    bb = b_ih_b + b_hh_b
    b2 = jnp.concatenate([bf[0:H], bb[0:H], bf[H:2 * H], bb[H:2 * H],
                          bf[3 * H:4 * H], bb[3 * H:4 * H],
                          bf[2 * H:3 * H], bb[2 * H:3 * H]]).reshape(1, 8 * H)

    return (wih2.astype(jnp.float32), whh_bd.astype(jnp.float32),
            b2.astype(jnp.float32))


# ---------------------------------------------------------------------------
# Model wrapper
# ---------------------------------------------------------------------------
class ContextualSentenceClassifierPallas:
    """Pallas/TPU port of ContextualSentenceClassifier.forward (eval mode)."""

    # TODO(synk): the pretrained transformer inside SentenceEmbedder has no
    # clean in-script equivalent; a deterministic token-embedding table +
    # masked mean pooling ("mean" pooling_mode) stands in, with identical
    # downstream shapes (S, embedding_dim).

    def __init__(self, vocab_size, embedding_dim, hidden_dim, output_dim,
                 num_lstms, use_extended_features=False, seed=0):
        self.embedding_dim = embedding_dim
        self.hidden_dim = hidden_dim
        self.output_dim = output_dim
        self.use_extended_features = use_extended_features

        keys = iter(jax.random.split(jax.random.PRNGKey(seed), 128))
        emb_table = 0.1 * jax.random.normal(
            next(keys), (vocab_size, embedding_dim), jnp.float32)

        bound = 1.0 / (hidden_dim ** 0.5)
        input_dim = embedding_dim + (5 if use_extended_features else 0)
        layers = []
        for layer in range(num_lstms):
            layer_in = input_dim if layer == 0 else 2 * hidden_dim
            dirs = []
            for _ in range(2):  # forward, backward
                w_ih = jax.random.uniform(next(keys), (4 * hidden_dim, layer_in),
                                          jnp.float32, -bound, bound)
                w_hh = jax.random.uniform(next(keys), (4 * hidden_dim, hidden_dim),
                                          jnp.float32, -bound, bound)
                b_ih = jax.random.uniform(next(keys), (4 * hidden_dim,),
                                          jnp.float32, -bound, bound)
                b_hh = jax.random.uniform(next(keys), (4 * hidden_dim,),
                                          jnp.float32, -bound, bound)
                dirs.append((w_ih, w_hh, b_ih, b_hh))
            layers.append(_fuse_bilstm_layer(dirs[0], dirs[1], hidden_dim))

        pbound = 1.0 / ((2 * hidden_dim) ** 0.5)
        w_proj = jax.random.uniform(next(keys), (output_dim, 2 * hidden_dim),
                                    jnp.float32, -pbound, pbound)
        b_proj = jax.random.uniform(next(keys), (output_dim,),
                                    jnp.float32, -pbound, pbound)
        # pytorch-crf init: uniform(-0.1, 0.1)
        crf_start = jax.random.uniform(next(keys), (output_dim,), jnp.float32, -0.1, 0.1)
        crf_end = jax.random.uniform(next(keys), (output_dim,), jnp.float32, -0.1, 0.1)
        crf_trans = jax.random.uniform(next(keys), (output_dim, output_dim),
                                       jnp.float32, -0.1, 0.1)

        # Everything pre-transposed / pre-summed / pre-cast once.
        self.params = (emb_table, tuple(layers),
                       jnp.asarray(w_proj.T, jnp.float32),
                       b_proj.reshape(1, output_dim).astype(jnp.float32),
                       crf_start.reshape(1, output_dim).astype(jnp.float32),
                       crf_end.reshape(1, output_dim).astype(jnp.float32),
                       crf_trans.astype(jnp.float32))
        self._forward = jax.jit(
            functools.partial(_forward, use_ext=use_extended_features))

    def __call__(self, inputs):
        ids = inputs['encoded_inputs']['input_ids']           # (S, T) int32
        attn = inputs['encoded_inputs']['attention_mask']     # (S, T)
        extras = None
        if self.use_extended_features:
            extras = jnp.stack([inputs['xmin'], inputs['xmax'], inputs['ymin'],
                                inputs['ymax'], inputs['position']],
                               axis=1).astype(jnp.float32)
        logits, pred = self._forward(self.params, ids, attn, extras)
        # corresponds to {'logit': logits[0], 'prediction': predictions[0]}
        return {'logit': logits, 'prediction': pred}


if __name__ == "__main__":
    S, T, V = 8, 16, 100          # sentences per document, tokens, vocab
    E, H, O, L = 32, 32, 4, 2     # embedding_dim, hidden_dim, output_dim, lstms

    model = ContextualSentenceClassifierPallas(
        vocab_size=V, embedding_dim=E, hidden_dim=H, output_dim=O,
        num_lstms=L, use_extended_features=False, seed=0)

    key = jax.random.PRNGKey(0)
    k_ids, k_len = jax.random.split(key)
    input_ids = jax.random.randint(k_ids, (S, T), 0, V, dtype=jnp.int32)
    lengths = jax.random.randint(k_len, (S, 1), 4, T + 1, dtype=jnp.int32)
    attention_mask = (jnp.arange(T)[None, :] < lengths).astype(jnp.float32)

    out = model({'encoded_inputs': {'input_ids': input_ids,
                                    'attention_mask': attention_mask}})
    jax.block_until_ready(out['logit'])
    jax.block_until_ready(out['prediction'])

    assert out['logit'].shape == (S, O)
    assert out['prediction'].shape == (S,)
    print("KERNEL_OK")
</pallas_src>

<mosaic_0001>
module attributes {stable_mosaic.version = 11 : i64} {
  func.func @_fused_kernel(%arg0: memref<128x32xf32, #tpu.memory_space<vmem>>, %arg1: memref<8x128xf32, #tpu.memory_space<vmem>>, %arg2: memref<64x256xf32, #tpu.memory_space<vmem>>, %arg3: memref<64x256xf32, #tpu.memory_space<vmem>>, %arg4: memref<1x256xf32, #tpu.memory_space<vmem>>, %arg5: memref<128x256xf32, #tpu.memory_space<vmem>>, %arg6: memref<64x256xf32, #tpu.memory_space<vmem>>, %arg7: memref<1x256xf32, #tpu.memory_space<vmem>>, %arg8: memref<64x4xf32, #tpu.memory_space<vmem>>, %arg9: memref<1x4xf32, #tpu.memory_space<vmem>>, %arg10: memref<1x4xf32, #tpu.memory_space<vmem>>, %arg11: memref<1x4xf32, #tpu.memory_space<vmem>>, %arg12: memref<4x4xf32, #tpu.memory_space<vmem>>, %arg13: memref<8x4xf32, #tpu.memory_space<vmem>>, %arg14: memref<8xi32, #tpu.memory_space<smem>>) attributes {dimension_semantics = [], scalar_prefetch = 0 : i64, scratch_operands = 0 : i64, tpu.core_type = #tpu.core_type<tc>} {
    %c0 = arith.constant 0 : index
    %c0_0 = arith.constant 0 : index
    %0 = vector.load %arg1[%c0, %c0_0] : memref<8x128xf32, #tpu.memory_space<vmem>>, vector<8x128xf32>
    %c0_1 = arith.constant 0 : index
    %c0_2 = arith.constant 0 : index
    %1 = vector.load %arg0[%c0_1, %c0_2] : memref<128x32xf32, #tpu.memory_space<vmem>>, vector<128x32xf32>
    %cst = arith.constant dense<0.000000e+00> : vector<8x32xf32>
    %2 = tpu.matmul %0, %1, %cst {dimension_numbers = #tpu.dot_dimension_numbers<[1], [0], [0], [1], [0, 0, 1, 1], [], []>} : vector<8x128xf32>, vector<128x32xf32>, vector<8x32xf32> -> vector<8x32xf32>
    %cst_3 = arith.constant dense<0.000000e+00> : vector<8xf32>
    %3 = vector.multi_reduction <add>, %0, %cst_3 [1] : vector<8x128xf32> to vector<8xf32>
    %4 = vector.shape_cast %3 : vector<8xf32> to vector<8x1xf32>
    %cst_4 = arith.constant 9.99999971E-10 : f32
    %5 = vector.broadcast %cst_4 : f32 to vector<8x1xf32>
    %6 = arith.maximumf %4, %5 : vector<8x1xf32>
    %7 = vector.broadcast %6 : vector<8x1xf32> to vector<8x32xf32>
    %8 = arith.divf %2, %7 : vector<8x32xf32>
    %9 = tpu.iota {dimensions = array<i32: 0>} : vector<8x8xi32>
    %10 = tpu.iota {dimensions = array<i32: 1>} : vector<8x8xi32>
    %11 = arith.addi %9, %10 : vector<8x8xi32>
    %c7_i32 = arith.constant 7 : i32
    %12 = vector.broadcast %c7_i32 : i32 to vector<8x8xi32>
    %13 = arith.cmpi eq, %11, %12 : vector<8x8xi32>
    %14 = arith.extui %13 : vector<8x8xi1> to vector<8x8xi32>
    %15 = arith.sitofp %14 : vector<8x8xi32> to vector<8x8xf32>
    %cst_5 = arith.constant dense<0.000000e+00> : vector<8x32xf32>
    %16 = tpu.matmul %15, %8, %cst_5 {dimension_numbers = #tpu.dot_dimension_numbers<[1], [0], [0], [1], [0, 0, 1, 1], [], []>} : vector<8x8xf32>, vector<8x32xf32>, vector<8x32xf32> -> vector<8x32xf32>
    %17 = tpu.concatenate %8, %16 in 1 : vector<8x32xf32>, vector<8x32xf32> -> vector<8x64xf32>
    %c0_6 = arith.constant 0 : index
    %c0_7 = arith.constant 0 : index
    %18 = vector.load %arg2[%c0_6, %c0_7] : memref<64x256xf32, #tpu.memory_space<vmem>>, vector<64x256xf32>
    %cst_8 = arith.constant dense<0.000000e+00> : vector<8x256xf32>
    %19 = tpu.matmul %17, %18, %cst_8 {dimension_numbers = #tpu.dot_dimension_numbers<[1], [0], [0], [1], [0, 0, 1, 1], [], []>} : vector<8x64xf32>, vector<64x256xf32>, vector<8x256xf32> -> vector<8x256xf32>
    %c0_9 = arith.constant 0 : index
    %c0_10 = arith.constant 0 : index
    %20 = vector.load %arg4[%c0_9, %c0_10] : memref<1x256xf32, #tpu.memory_space<vmem>>, vector<1x256xf32>
    %21 = vector.broadcast %20 : vector<1x256xf32> to vector<8x256xf32>
    %22 = arith.addf %19, %21 : vector<8x256xf32>
    %c0_11 = arith.constant 0 : index
    %c0_12 = arith.constant 0 : index
    %23 = vector.load %arg3[%c0_11, %c0_12] : memref<64x256xf32, #tpu.memory_space<vmem>>, vector<64x256xf32>
    %cst_13 = arith.constant 0.000000e+00 : f32
    %24 = vector.broadcast %cst_13 : f32 to vector<1x64xf32>
    %cst_14 = arith.constant 0.000000e+00 : f32
    %25 = vector.broadcast %cst_14 : f32 to vector<1x64xf32>
    %26 = vector.extract_strided_slice %22 {offsets = [0, 0], sizes = [1, 256], strides = [1, 1]} : vector<8x256xf32> to vector<1x256xf32>
    %cst_15 = arith.constant dense<0.000000e+00> : vector<1x256xf32>
    %27 = tpu.matmul %24, %23, %cst_15 {dimension_numbers = #tpu.dot_dimension_numbers<[1], [0], [0], [1], [0, 0, 1, 1], [], []>} : vector<1x64xf32>, vector<64x256xf32>, vector<1x256xf32> -> vector<1x256xf32>
    %28 = arith.addf %26, %27 : vector<1x256xf32>
    %29 = vector.extract_strided_slice %28 {offsets = [0, 0], sizes = [1, 192], strides = [1, 1]} : vector<1x256xf32> to vector<1x192xf32>
    %30 = arith.negf %29 : vector<1x192xf32>
    %31 = math.exp %30 : vector<1x192xf32>
    %cst_16 = arith.constant 1.000000e+00 : f32
    %32 = vector.broadcast %cst_16 : f32 to vector<1x192xf32>
    %33 = arith.addf %32, %31 : vector<1x192xf32>
    %34 = arith.divf %32, %33 : vector<1x192xf32>
    %35 = vector.extract_strided_slice %28 {offsets = [0, 192], sizes = [1, 64], strides = [1, 1]} : vector<1x256xf32> to vector<1x64xf32>
    %36 = math.tanh %35 : vector<1x64xf32>
    %37 = vector.extract_strided_slice %34 {offsets = [0, 64], sizes = [1, 64], strides = [1, 1]} : vector<1x192xf32> to vector<1x64xf32>
    %38 = arith.mulf %37, %25 : vector<1x64xf32>
    %39 = vector.extract_strided_slice %34 {offsets = [0, 0], sizes = [1, 64], strides = [1, 1]} : vector<1x192xf32> to vector<1x64xf32>
    %40 = arith.mulf %39, %36 : vector<1x64xf32>
    %41 = arith.addf %38, %40 : vector<1x64xf32>
    %42 = vector.extract_strided_slice %34 {offsets = [0, 128], sizes = [1, 64], strides = [1, 1]} : vector<1x192xf32> to vector<1x64xf32>
    %43 = math.tanh %41 : vector<1x64xf32>
    %44 = arith.mulf %42, %43 : vector<1x64xf32>
    %45 = vector.extract_strided_slice %22 {offsets = [1, 0], sizes = [1, 256], strides = [1, 1]} : vector<8x256xf32> to vector<1x256xf32>
    %cst_17 = arith.constant dense<0.000000e+00> : vector<1x256xf32>
    %46 = tpu.matmul %44, %23, %cst_17 {dimension_numbers = #tpu.dot_dimension_numbers<[1], [0], [0], [1], [0, 0, 1, 1], [], []>} : vector<1x64xf32>, vector<64x256xf32>, vector<1x256xf32> -> vector<1x256xf32>
    %47 = arith.addf %45, %46 : vector<1x256xf32>
    %48 = vector.extract_strided_slice %47 {offsets = [0, 0], sizes = [1, 192], strides = [1, 1]} : vector<1x256xf32> to vector<1x192xf32>
    %49 = arith.negf %48 : vector<1x192xf32>
    %50 = math.exp %49 : vector<1x192xf32>
    %cst_18 = arith.constant 1.000000e+00 : f32
    %51 = vector.broadcast %cst_18 : f32 to vector<1x192xf32>
    %52 = arith.addf %51, %50 : vector<1x192xf32>
    %53 = arith.divf %51, %52 : vector<1x192xf32>
    %54 = vector.extract_strided_slice %47 {offsets = [0, 192], sizes = [1, 64], strides = [1, 1]} : vector<1x256xf32> to vector<1x64xf32>
    %55 = math.tanh %54 : vector<1x64xf32>
    %56 = vector.extract_strided_slice %53 {offsets = [0, 64], sizes = [1, 64], strides = [1, 1]} : vector<1x192xf32> to vector<1x64xf32>
    %57 = arith.mulf %56, %41 : vector<1x64xf32>
    %58 = vector.extract_strided_slice %53 {offsets = [0, 0], sizes = [1, 64], strides = [1, 1]} : vector<1x192xf32> to vector<1x64xf32>
    %59 = arith.mulf %58, %55 : vector<1x64xf32>
    %60 = arith.addf %57, %59 : vector<1x64xf32>
    %61 = vector.extract_strided_slice %53 {offsets = [0, 128], sizes = [1, 64], strides = [1, 1]} : vector<1x192xf32> to vector<1x64xf32>
    %62 = math.tanh %60 : vector<1x64xf32>
    %63 = arith.mulf %61, %62 : vector<1x64xf32>
    %64 = vector.extract_strided_slice %22 {offsets = [2, 0], sizes = [1, 256], strides = [1, 1]} : vector<8x256xf32> to vector<1x256xf32>
    %cst_19 = arith.constant dense<0.000000e+00> : vector<1x256xf32>
    %65 = tpu.matmul %63, %23, %cst_19 {dimension_numbers = #tpu.dot_dimension_numbers<[1], [0], [0], [1], [0, 0, 1, 1], [], []>} : vector<1x64xf32>, vector<64x256xf32>, vector<1x256xf32> -> vector<1x256xf32>
    %66 = arith.addf %64, %65 : vector<1x256xf32>
    %67 = vector.extract_strided_slice %66 {offsets = [0, 0], sizes = [1, 192], strides = [1, 1]} : vector<1x256xf32> to vector<1x192xf32>
    %68 = arith.negf %67 : vector<1x192xf32>
    %69 = math.exp %68 : vector<1x192xf32>
    %cst_20 = arith.constant 1.000000e+00 : f32
    %70 = vector.broadcast %cst_20 : f32 to vector<1x192xf32>
    %71 = arith.addf %70, %69 : vector<1x192xf32>
    %72 = arith.divf %70, %71 : vector<1x192xf32>
    %73 = vector.extract_strided_slice %66 {offsets = [0, 192], sizes = [1, 64], strides = [1, 1]} : vector<1x256xf32> to vector<1x64xf32>
    %74 = math.tanh %73 : vector<1x64xf32>
    %75 = vector.extract_strided_slice %72 {offsets = [0, 64], sizes = [1, 64], strides = [1, 1]} : vector<1x192xf32> to vector<1x64xf32>
    %76 = arith.mulf %75, %60 : vector<1x64xf32>
    %77 = vector.extract_strided_slice %72 {offsets = [0, 0], sizes = [1, 64], strides = [1, 1]} : vector<1x192xf32> to vector<1x64xf32>
    %78 = arith.mulf %77, %74 : vector<1x64xf32>
    %79 = arith.addf %76, %78 : vector<1x64xf32>
    %80 = vector.extract_strided_slice %72 {offsets = [0, 128], sizes = [1, 64], strides = [1, 1]} : vector<1x192xf32> to vector<1x64xf32>
    %81 = math.tanh %79 : vector<1x64xf32>
    %82 = arith.mulf %80, %81 : vector<1x64xf32>
    %83 = vector.extract_strided_slice %22 {offsets = [3, 0], sizes = [1, 256], strides = [1, 1]} : vector<8x256xf32> to vector<1x256xf32>
    %cst_21 = arith.constant dense<0.000000e+00> : vector<1x256xf32>
    %84 = tpu.matmul %82, %23, %cst_21 {dimension_numbers = #tpu.dot_dimension_numbers<[1], [0], [0], [1], [0, 0, 1, 1], [], []>} : vector<1x64xf32>, vector<64x256xf32>, vector<1x256xf32> -> vector<1x256xf32>
    %85 = arith.addf %83, %84 : vector<1x256xf32>
    %86 = vector.extract_strided_slice %85 {offsets = [0, 0], sizes = [1, 192], strides = [1, 1]} : vector<1x256xf32> to vector<1x192xf32>
    %87 = arith.negf %86 : vector<1x192xf32>
    %88 = math.exp %87 : vector<1x192xf32>
    %cst_22 = arith.constant 1.000000e+00 : f32
    %89 = vector.broadcast %cst_22 : f32 to vector<1x192xf32>
    %90 = arith.addf %89, %88 : vector<1x192xf32>
    %91 = arith.divf %89, %90 : vector<1x192xf32>
    %92 = vector.extract_strided_slice %85 {offsets = [0, 192], sizes = [1, 64], strides = [1, 1]} : vector<1x256xf32> to vector<1x64xf32>
    %93 = math.tanh %92 : vector<1x64xf32>
    %94 = vector.extract_strided_slice %91 {offsets = [0, 64], sizes = [1, 64], strides = [1, 1]} : vector<1x192xf32> to vector<1x64xf32>
    %95 = arith.mulf %94, %79 : vector<1x64xf32>
    %96 = vector.extract_strided_slice %91 {offsets = [0, 0], sizes = [1, 64], strides = [1, 1]} : vector<1x192xf32> to vector<1x64xf32>
    %97 = arith.mulf %96, %93 : vector<1x64xf32>
    %98 = arith.addf %95, %97 : vector<1x64xf32>
    %99 = vector.extract_strided_slice %91 {offsets = [0, 128], sizes = [1, 64], strides = [1, 1]} : vector<1x192xf32> to vector<1x64xf32>
    %100 = math.tanh %98 : vector<1x64xf32>
    %101 = arith.mulf %99, %100 : vector<1x64xf32>
    %102 = vector.extract_strided_slice %22 {offsets = [4, 0], sizes = [1, 256], strides = [1, 1]} : vector<8x256xf32> to vector<1x256xf32>
    %cst_23 = arith.constant dense<0.000000e+00> : vector<1x256xf32>
    %103 = tpu.matmul %101, %23, %cst_23 {dimension_numbers = #tpu.dot_dimension_numbers<[1], [0], [0], [1], [0, 0, 1, 1], [], []>} : vector<1x64xf32>, vector<64x256xf32>, vector<1x256xf32> -> vector<1x256xf32>
    %104 = arith.addf %102, %103 : vector<1x256xf32>
    %105 = vector.extract_strided_slice %104 {offsets = [0, 0], sizes = [1, 192], strides = [1, 1]} : vector<1x256xf32> to vector<1x192xf32>
    %106 = arith.negf %105 : vector<1x192xf32>
    %107 = math.exp %106 : vector<1x192xf32>
    %cst_24 = arith.constant 1.000000e+00 : f32
    %108 = vector.broadcast %cst_24 : f32 to vector<1x192xf32>
    %109 = arith.addf %108, %107 : vector<1x192xf32>
    %110 = arith.divf %108, %109 : vector<1x192xf32>
    %111 = vector.extract_strided_slice %104 {offsets = [0, 192], sizes = [1, 64], strides = [1, 1]} : vector<1x256xf32> to vector<1x64xf32>
    %112 = math.tanh %111 : vector<1x64xf32>
    %113 = vector.extract_strided_slice %110 {offsets = [0, 64], sizes = [1, 64], strides = [1, 1]} : vector<1x192xf32> to vector<1x64xf32>
    %114 = arith.mulf %113, %98 : vector<1x64xf32>
    %115 = vector.extract_strided_slice %110 {offsets = [0, 0], sizes = [1, 64], strides = [1, 1]} : vector<1x192xf32> to vector<1x64xf32>
    %116 = arith.mulf %115, %112 : vector<1x64xf32>
    %117 = arith.addf %114, %116 : vector<1x64xf32>
    %118 = vector.extract_strided_slice %110 {offsets = [0, 128], sizes = [1, 64], strides = [1, 1]} : vector<1x192xf32> to vector<1x64xf32>
    %119 = math.tanh %117 : vector<1x64xf32>
    %120 = arith.mulf %118, %119 : vector<1x64xf32>
    %121 = vector.extract_strided_slice %22 {offsets = [5, 0], sizes = [1, 256], strides = [1, 1]} : vector<8x256xf32> to vector<1x256xf32>
    %cst_25 = arith.constant dense<0.000000e+00> : vector<1x256xf32>
    %122 = tpu.matmul %120, %23, %cst_25 {dimension_numbers = #tpu.dot_dimension_numbers<[1], [0], [0], [1], [0, 0, 1, 1], [], []>} : vector<1x64xf32>, vector<64x256xf32>, vector<1x256xf32> -> vector<1x256xf32>
    %123 = arith.addf %121, %122 : vector<1x256xf32>
    %124 = vector.extract_strided_slice %123 {offsets = [0, 0], sizes = [1, 192], strides = [1, 1]} : vector<1x256xf32> to vector<1x192xf32>
    %125 = arith.negf %124 : vector<1x192xf32>
    %126 = math.exp %125 : vector<1x192xf32>
    %cst_26 = arith.constant 1.000000e+00 : f32
    %127 = vector.broadcast %cst_26 : f32 to vector<1x192xf32>
    %128 = arith.addf %127, %126 : vector<1x192xf32>
    %129 = arith.divf %127, %128 : vector<1x192xf32>
    %130 = vector.extract_strided_slice %123 {offsets = [0, 192], sizes = [1, 64], strides = [1, 1]} : vector<1x256xf32> to vector<1x64xf32>
    %131 = math.tanh %130 : vector<1x64xf32>
    %132 = vector.extract_strided_slice %129 {offsets = [0, 64], sizes = [1, 64], strides = [1, 1]} : vector<1x192xf32> to vector<1x64xf32>
    %133 = arith.mulf %132, %117 : vector<1x64xf32>
    %134 = vector.extract_strided_slice %129 {offsets = [0, 0], sizes = [1, 64], strides = [1, 1]} : vector<1x192xf32> to vector<1x64xf32>
    %135 = arith.mulf %134, %131 : vector<1x64xf32>
    %136 = arith.addf %133, %135 : vector<1x64xf32>
    %137 = vector.extract_strided_slice %129 {offsets = [0, 128], sizes = [1, 64], strides = [1, 1]} : vector<1x192xf32> to vector<1x64xf32>
    %138 = math.tanh %136 : vector<1x64xf32>
    %139 = arith.mulf %137, %138 : vector<1x64xf32>
    %140 = vector.extract_strided_slice %22 {offsets = [6, 0], sizes = [1, 256], strides = [1, 1]} : vector<8x256xf32> to vector<1x256xf32>
    %cst_27 = arith.constant dense<0.000000e+00> : vector<1x256xf32>
    %141 = tpu.matmul %139, %23, %cst_27 {dimension_numbers = #tpu.dot_dimension_numbers<[1], [0], [0], [1], [0, 0, 1, 1], [], []>} : vector<1x64xf32>, vector<64x256xf32>, vector<1x256xf32> -> vector<1x256xf32>
    %142 = arith.addf %140, %141 : vector<1x256xf32>
    %143 = vector.extract_strided_slice %142 {offsets = [0, 0], sizes = [1, 192], strides = [1, 1]} : vector<1x256xf32> to vector<1x192xf32>
    %144 = arith.negf %143 : vector<1x192xf32>
    %145 = math.exp %144 : vector<1x192xf32>
    %cst_28 = arith.constant 1.000000e+00 : f32
    %146 = vector.broadcast %cst_28 : f32 to vector<1x192xf32>
    %147 = arith.addf %146, %145 : vector<1x192xf32>
    %148 = arith.divf %146, %147 : vector<1x192xf32>
    %149 = vector.extract_strided_slice %142 {offsets = [0, 192], sizes = [1, 64], strides = [1, 1]} : vector<1x256xf32> to vector<1x64xf32>
    %150 = math.tanh %149 : vector<1x64xf32>
    %151 = vector.extract_strided_slice %148 {offsets = [0, 64], sizes = [1, 64], strides = [1, 1]} : vector<1x192xf32> to vector<1x64xf32>
    %152 = arith.mulf %151, %136 : vector<1x64xf32>
    %153 = vector.extract_strided_slice %148 {offsets = [0, 0], sizes = [1, 64], strides = [1, 1]} : vector<1x192xf32> to vector<1x64xf32>
    %154 = arith.mulf %153, %150 : vector<1x64xf32>
    %155 = arith.addf %152, %154 : vector<1x64xf32>
    %156 = vector.extract_strided_slice %148 {offsets = [0, 128], sizes = [1, 64], strides = [1, 1]} : vector<1x192xf32> to vector<1x64xf32>
    %157 = math.tanh %155 : vector<1x64xf32>
    %158 = arith.mulf %156, %157 : vector<1x64xf32>
    %159 = vector.extract_strided_slice %22 {offsets = [7, 0], sizes = [1, 256], strides = [1, 1]} : vector<8x256xf32> to vector<1x256xf32>
    %cst_29 = arith.constant dense<0.000000e+00> : vector<1x256xf32>
    %160 = tpu.matmul %158, %23, %cst_29 {dimension_numbers = #tpu.dot_dimension_numbers<[1], [0], [0], [1], [0, 0, 1, 1], [], []>} : vector<1x64xf32>, vector<64x256xf32>, vector<1x256xf32> -> vector<1x256xf32>
    %161 = arith.addf %159, %160 : vector<1x256xf32>
    %162 = vector.extract_strided_slice %161 {offsets = [0, 0], sizes = [1, 192], strides = [1, 1]} : vector<1x256xf32> to vector<1x192xf32>
    %163 = arith.negf %162 : vector<1x192xf32>
    %164 = math.exp %163 : vector<1x192xf32>
    %cst_30 = arith.constant 1.000000e+00 : f32
    %165 = vector.broadcast %cst_30 : f32 to vector<1x192xf32>
    %166 = arith.addf %165, %164 : vector<1x192xf32>
    %167 = arith.divf %165, %166 : vector<1x192xf32>
    %168 = vector.extract_strided_slice %161 {offsets = [0, 192], sizes = [1, 64], strides = [1, 1]} : vector<1x256xf32> to vector<1x64xf32>
    %169 = math.tanh %168 : vector<1x64xf32>
    %170 = vector.extract_strided_slice %167 {offsets = [0, 64], sizes = [1, 64], strides = [1, 1]} : vector<1x192xf32> to vector<1x64xf32>
    %171 = arith.mulf %170, %155 : vector<1x64xf32>
    %172 = vector.extract_strided_slice %167 {offsets = [0, 0], sizes = [1, 64], strides = [1, 1]} : vector<1x192xf32> to vector<1x64xf32>
    %173 = arith.mulf %172, %169 : vector<1x64xf32>
    %174 = arith.addf %171, %173 : vector<1x64xf32>
    %175 = vector.extract_strided_slice %167 {offsets = [0, 128], sizes = [1, 64], strides = [1, 1]} : vector<1x192xf32> to vector<1x64xf32>
    %176 = math.tanh %174 : vector<1x64xf32>
    %177 = arith.mulf %175, %176 : vector<1x64xf32>
    %178 = tpu.concatenate %44, %63, %82, %101, %120, %139, %158, %177 in 0 : vector<1x64xf32>, vector<1x64xf32>, vector<1x64xf32>, vector<1x64xf32>, vector<1x64xf32>, vector<1x64xf32>, vector<1x64xf32>, vector<1x64xf32> -> vector<8x64xf32>
    %179 = vector.extract_strided_slice %178 {offsets = [0, 0], sizes = [8, 32], strides = [1, 1]} : vector<8x64xf32> to vector<8x32xf32>
    %180 = vector.extract_strided_slice %178 {offsets = [0, 32], sizes = [8, 32], strides = [1, 1]} : vector<8x64xf32> to vector<8x32xf32>
    %cst_31 = arith.constant dense<0.000000e+00> : vector<8x32xf32>
    %181 = tpu.matmul %15, %180, %cst_31 {dimension_numbers = #tpu.dot_dimension_numbers<[1], [0], [0], [1], [0, 0, 1, 1], [], []>} : vector<8x8xf32>, vector<8x32xf32>, vector<8x32xf32> -> vector<8x32xf32>
    %182 = tpu.concatenate %179, %181 in 1 : vector<8x32xf32>, vector<8x32xf32> -> vector<8x64xf32>
    %cst_32 = arith.constant dense<0.000000e+00> : vector<8x64xf32>
    %183 = tpu.matmul %15, %182, %cst_32 {dimension_numbers = #tpu.dot_dimension_numbers<[1], [0], [0], [1], [0, 0, 1, 1], [], []>} : vector<8x8xf32>, vector<8x64xf32>, vector<8x64xf32> -> vector<8x64xf32>
    %184 = tpu.concatenate %182, %183 in 1 : vector<8x64xf32>, vector<8x64xf32> -> vector<8x128xf32>
    %c0_33 = arith.constant 0 : index
    %c0_34 = arith.constant 0 : index
    %185 = vector.load %arg5[%c0_33, %c0_34] : memref<128x256xf32, #tpu.memory_space<vmem>>, vector<128x256xf32>
    %cst_35 = arith.constant dense<0.000000e+00> : vector<8x256xf32>
    %186 = tpu.matmul %184, %185, %cst_35 {dimension_numbers = #tpu.dot_dimension_numbers<[1], [0], [0], [1], [0, 0, 1, 1], [], []>} : vector<8x128xf32>, vector<128x256xf32>, vector<8x256xf32> -> vector<8x256xf32>
    %c0_36 = arith.constant 0 : index
    %c0_37 = arith.constant 0 : index
    %187 = vector.load %arg7[%c0_36, %c0_37] : memref<1x256xf32, #tpu.memory_space<vmem>>, vector<1x256xf32>
    %188 = vector.broadcast %187 : vector<1x256xf32> to vector<8x256xf32>
    %189 = arith.addf %186, %188 : vector<8x256xf32>
    %c0_38 = arith.constant 0 : index
    %c0_39 = arith.constant 0 : index
    %190 = vector.load %arg6[%c0_38, %c0_39] : memref<64x256xf32, #tpu.memory_space<vmem>>, vector<64x256xf32>
    %cst_40 = arith.constant 0.000000e+00 : f32
    %191 = vector.broadcast %cst_40 : f32 to vector<1x64xf32>
    %cst_41 = arith.constant 0.000000e+00 : f32
    %192 = vector.broadcast %cst_41 : f32 to vector<1x64xf32>
    %193 = vector.extract_strided_slice %189 {offsets = [0, 0], sizes = [1, 256], strides = [1, 1]} : vector<8x256xf32> to vector<1x256xf32>
    %cst_42 = arith.constant dense<0.000000e+00> : vector<1x256xf32>
    %194 = tpu.matmul %191, %190, %cst_42 {dimension_numbers = #tpu.dot_dimension_numbers<[1], [0], [0], [1], [0, 0, 1, 1], [], []>} : vector<1x64xf32>, vector<64x256xf32>, vector<1x256xf32> -> vector<1x256xf32>
    %195 = arith.addf %193, %194 : vector<1x256xf32>
    %196 = vector.extract_strided_slice %195 {offsets = [0, 0], sizes = [1, 192], strides = [1, 1]} : vector<1x256xf32> to vector<1x192xf32>
    %197 = arith.negf %196 : vector<1x192xf32>
    %198 = math.exp %197 : vector<1x192xf32>
    %cst_43 = arith.constant 1.000000e+00 : f32
    %199 = vector.broadcast %cst_43 : f32 to vector<1x192xf32>
    %200 = arith.addf %199, %198 : vector<1x192xf32>
    %201 = arith.divf %199, %200 : vector<1x192xf32>
    %202 = vector.extract_strided_slice %195 {offsets = [0, 192], sizes = [1, 64], strides = [1, 1]} : vector<1x256xf32> to vector<1x64xf32>
    %203 = math.tanh %202 : vector<1x64xf32>
    %204 = vector.extract_strided_slice %201 {offsets = [0, 64], sizes = [1, 64], strides = [1, 1]} : vector<1x192xf32> to vector<1x64xf32>
    %205 = arith.mulf %204, %192 : vector<1x64xf32>
    %206 = vector.extract_strided_slice %201 {offsets = [0, 0], sizes = [1, 64], strides = [1, 1]} : vector<1x192xf32> to vector<1x64xf32>
    %207 = arith.mulf %206, %203 : vector<1x64xf32>
    %208 = arith.addf %205, %207 : vector<1x64xf32>
    %209 = vector.extract_strided_slice %201 {offsets = [0, 128], sizes = [1, 64], strides = [1, 1]} : vector<1x192xf32> to vector<1x64xf32>
    %210 = math.tanh %208 : vector<1x64xf32>
    %211 = arith.mulf %209, %210 : vector<1x64xf32>
    %212 = vector.extract_strided_slice %189 {offsets = [1, 0], sizes = [1, 256], strides = [1, 1]} : vector<8x256xf32> to vector<1x256xf32>
    %cst_44 = arith.constant dense<0.000000e+00> : vector<1x256xf32>
    %213 = tpu.matmul %211, %190, %cst_44 {dimension_numbers = #tpu.dot_dimension_numbers<[1], [0], [0], [1], [0, 0, 1, 1], [], []>} : vector<1x64xf32>, vector<64x256xf32>, vector<1x256xf32> -> vector<1x256xf32>
    %214 = arith.addf %212, %213 : vector<1x256xf32>
    %215 = vector.extract_strided_slice %214 {offsets = [0, 0], sizes = [1, 192], strides = [1, 1]} : vector<1x256xf32> to vector<1x192xf32>
    %216 = arith.negf %215 : vector<1x192xf32>
    %217 = math.exp %216 : vector<1x192xf32>
    %cst_45 = arith.constant 1.000000e+00 : f32
    %218 = vector.broadcast %cst_45 : f32 to vector<1x192xf32>
    %219 = arith.addf %218, %217 : vector<1x192xf32>
    %220 = arith.divf %218, %219 : vector<1x192xf32>
    %221 = vector.extract_strided_slice %214 {offsets = [0, 192], sizes = [1, 64], strides = [1, 1]} : vector<1x256xf32> to vector<1x64xf32>
    %222 = math.tanh %221 : vector<1x64xf32>
    %223 = vector.extract_strided_slice %220 {offsets = [0, 64], sizes = [1, 64], strides = [1, 1]} : vector<1x192xf32> to vector<1x64xf32>
    %224 = arith.mulf %223, %208 : vector<1x64xf32>
    %225 = vector.extract_strided_slice %220 {offsets = [0, 0], sizes = [1, 64], strides = [1, 1]} : vector<1x192xf32> to vector<1x64xf32>
    %226 = arith.mulf %225, %222 : vector<1x64xf32>
    %227 = arith.addf %224, %226 : vector<1x64xf32>
    %228 = vector.extract_strided_slice %220 {offsets = [0, 128], sizes = [1, 64], strides = [1, 1]} : vector<1x192xf32> to vector<1x64xf32>
    %229 = math.tanh %227 : vector<1x64xf32>
    %230 = arith.mulf %228, %229 : vector<1x64xf32>
    %231 = vector.extract_strided_slice %189 {offsets = [2, 0], sizes = [1, 256], strides = [1, 1]} : vector<8x256xf32> to vector<1x256xf32>
    %cst_46 = arith.constant dense<0.000000e+00> : vector<1x256xf32>
    %232 = tpu.matmul %230, %190, %cst_46 {dimension_numbers = #tpu.dot_dimension_numbers<[1], [0], [0], [1], [0, 0, 1, 1], [], []>} : vector<1x64xf32>, vector<64x256xf32>, vector<1x256xf32> -> vector<1x256xf32>
    %233 = arith.addf %231, %232 : vector<1x256xf32>
    %234 = vector.extract_strided_slice %233 {offsets = [0, 0], sizes = [1, 192], strides = [1, 1]} : vector<1x256xf32> to vector<1x192xf32>
    %235 = arith.negf %234 : vector<1x192xf32>
    %236 = math.exp %235 : vector<1x192xf32>
    %cst_47 = arith.constant 1.000000e+00 : f32
    %237 = vector.broadcast %cst_47 : f32 to vector<1x192xf32>
    %238 = arith.addf %237, %236 : vector<1x192xf32>
    %239 = arith.divf %237, %238 : vector<1x192xf32>
    %240 = vector.extract_strided_slice %233 {offsets = [0, 192], sizes = [1, 64], strides = [1, 1]} : vector<1x256xf32> to vector<1x64xf32>
    %241 = math.tanh %240 : vector<1x64xf32>
    %242 = vector.extract_strided_slice %239 {offsets = [0, 64], sizes = [1, 64], strides = [1, 1]} : vector<1x192xf32> to vector<1x64xf32>
    %243 = arith.mulf %242, %227 : vector<1x64xf32>
    %244 = vector.extract_strided_slice %239 {offsets = [0, 0], sizes = [1, 64], strides = [1, 1]} : vector<1x192xf32> to vector<1x64xf32>
    %245 = arith.mulf %244, %241 : vector<1x64xf32>
    %246 = arith.addf %243, %245 : vector<1x64xf32>
    %247 = vector.extract_strided_slice %239 {offsets = [0, 128], sizes = [1, 64], strides = [1, 1]} : vector<1x192xf32> to vector<1x64xf32>
    %248 = math.tanh %246 : vector<1x64xf32>
    %249 = arith.mulf %247, %248 : vector<1x64xf32>
    %250 = vector.extract_strided_slice %189 {offsets = [3, 0], sizes = [1, 256], strides = [1, 1]} : vector<8x256xf32> to vector<1x256xf32>
    %cst_48 = arith.constant dense<0.000000e+00> : vector<1x256xf32>
    %251 = tpu.matmul %249, %190, %cst_48 {dimension_numbers = #tpu.dot_dimension_numbers<[1], [0], [0], [1], [0, 0, 1, 1], [], []>} : vector<1x64xf32>, vector<64x256xf32>, vector<1x256xf32> -> vector<1x256xf32>
    %252 = arith.addf %250, %251 : vector<1x256xf32>
    %253 = vector.extract_strided_slice %252 {offsets = [0, 0], sizes = [1, 192], strides = [1, 1]} : vector<1x256xf32> to vector<1x192xf32>
    %254 = arith.negf %253 : vector<1x192xf32>
    %255 = math.exp %254 : vector<1x192xf32>
    %cst_49 = arith.constant 1.000000e+00 : f32
    %256 = vector.broadcast %cst_49 : f32 to vector<1x192xf32>
    %257 = arith.addf %256, %255 : vector<1x192xf32>
    %258 = arith.divf %256, %257 : vector<1x192xf32>
    %259 = vector.extract_strided_slice %252 {offsets = [0, 192], sizes = [1, 64], strides = [1, 1]} : vector<1x256xf32> to vector<1x64xf32>
    %260 = math.tanh %259 : vector<1x64xf32>
    %261 = vector.extract_strided_slice %258 {offsets = [0, 64], sizes = [1, 64], strides = [1, 1]} : vector<1x192xf32> to vector<1x64xf32>
    %262 = arith.mulf %261, %246 : vector<1x64xf32>
    %263 = vector.extract_strided_slice %258 {offsets = [0, 0], sizes = [1, 64], strides = [1, 1]} : vector<1x192xf32> to vector<1x64xf32>
    %264 = arith.mulf %263, %260 : vector<1x64xf32>
    %265 = arith.addf %262, %264 : vector<1x64xf32>
    %266 = vector.extract_strided_slice %258 {offsets = [0, 128], sizes = [1, 64], strides = [1, 1]} : vector<1x192xf32> to vector<1x64xf32>
    %267 = math.tanh %265 : vector<1x64xf32>
    %268 = arith.mulf %266, %267 : vector<1x64xf32>
    %269 = vector.extract_strided_slice %189 {offsets = [4, 0], sizes = [1, 256], strides = [1, 1]} : vector<8x256xf32> to vector<1x256xf32>
    %cst_50 = arith.constant dense<0.000000e+00> : vector<1x256xf32>
    %270 = tpu.matmul %268, %190, %cst_50 {dimension_numbers = #tpu.dot_dimension_numbers<[1], [0], [0], [1], [0, 0, 1, 1], [], []>} : vector<1x64xf32>, vector<64x256xf32>, vector<1x256xf32> -> vector<1x256xf32>
    %271 = arith.addf %269, %270 : vector<1x256xf32>
    %272 = vector.extract_strided_slice %271 {offsets = [0, 0], sizes = [1, 192], strides = [1, 1]} : vector<1x256xf32> to vector<1x192xf32>
    %273 = arith.negf %272 : vector<1x192xf32>
    %274 = math.exp %273 : vector<1x192xf32>
    %cst_51 = arith.constant 1.000000e+00 : f32
    %275 = vector.broadcast %cst_51 : f32 to vector<1x192xf32>
    %276 = arith.addf %275, %274 : vector<1x192xf32>
    %277 = arith.divf %275, %276 : vector<1x192xf32>
    %278 = vector.extract_strided_slice %271 {offsets = [0, 192], sizes = [1, 64], strides = [1, 1]} : vector<1x256xf32> to vector<1x64xf32>
    %279 = math.tanh %278 : vector<1x64xf32>
    %280 = vector.extract_strided_slice %277 {offsets = [0, 64], sizes = [1, 64], strides = [1, 1]} : vector<1x192xf32> to vector<1x64xf32>
    %281 = arith.mulf %280, %265 : vector<1x64xf32>
    %282 = vector.extract_strided_slice %277 {offsets = [0, 0], sizes = [1, 64], strides = [1, 1]} : vector<1x192xf32> to vector<1x64xf32>
    %283 = arith.mulf %282, %279 : vector<1x64xf32>
    %284 = arith.addf %281, %283 : vector<1x64xf32>
    %285 = vector.extract_strided_slice %277 {offsets = [0, 128], sizes = [1, 64], strides = [1, 1]} : vector<1x192xf32> to vector<1x64xf32>
    %286 = math.tanh %284 : vector<1x64xf32>
    %287 = arith.mulf %285, %286 : vector<1x64xf32>
    %288 = vector.extract_strided_slice %189 {offsets = [5, 0], sizes = [1, 256], strides = [1, 1]} : vector<8x256xf32> to vector<1x256xf32>
    %cst_52 = arith.constant dense<0.000000e+00> : vector<1x256xf32>
    %289 = tpu.matmul %287, %190, %cst_52 {dimension_numbers = #tpu.dot_dimension_numbers<[1], [0], [0], [1], [0, 0, 1, 1], [], []>} : vector<1x64xf32>, vector<64x256xf32>, vector<1x256xf32> -> vector<1x256xf32>
    %290 = arith.addf %288, %289 : vector<1x256xf32>
    %291 = vector.extract_strided_slice %290 {offsets = [0, 0], sizes = [1, 192], strides = [1, 1]} : vector<1x256xf32> to vector<1x192xf32>
    %292 = arith.negf %291 : vector<1x192xf32>
    %293 = math.exp %292 : vector<1x192xf32>
    %cst_53 = arith.constant 1.000000e+00 : f32
    %294 = vector.broadcast %cst_53 : f32 to vector<1x192xf32>
    %295 = arith.addf %294, %293 : vector<1x192xf32>
    %296 = arith.divf %294, %295 : vector<1x192xf32>
    %297 = vector.extract_strided_slice %290 {offsets = [0, 192], sizes = [1, 64], strides = [1, 1]} : vector<1x256xf32> to vector<1x64xf32>
    %298 = math.tanh %297 : vector<1x64xf32>
    %299 = vector.extract_strided_slice %296 {offsets = [0, 64], sizes = [1, 64], strides = [1, 1]} : vector<1x192xf32> to vector<1x64xf32>
    %300 = arith.mulf %299, %284 : vector<1x64xf32>
    %301 = vector.extract_strided_slice %296 {offsets = [0, 0], sizes = [1, 64], strides = [1, 1]} : vector<1x192xf32> to vector<1x64xf32>
    %302 = arith.mulf %301, %298 : vector<1x64xf32>
    %303 = arith.addf %300, %302 : vector<1x64xf32>
    %304 = vector.extract_strided_slice %296 {offsets = [0, 128], sizes = [1, 64], strides = [1, 1]} : vector<1x192xf32> to vector<1x64xf32>
    %305 = math.tanh %303 : vector<1x64xf32>
    %306 = arith.mulf %304, %305 : vector<1x64xf32>
    %307 = vector.extract_strided_slice %189 {offsets = [6, 0], sizes = [1, 256], strides = [1, 1]} : vector<8x256xf32> to vector<1x256xf32>
    %cst_54 = arith.constant dense<0.000000e+00> : vector<1x256xf32>
    %308 = tpu.matmul %306, %190, %cst_54 {dimension_numbers = #tpu.dot_dimension_numbers<[1], [0], [0], [1], [0, 0, 1, 1], [], []>} : vector<1x64xf32>, vector<64x256xf32>, vector<1x256xf32> -> vector<1x256xf32>
    %309 = arith.addf %307, %308 : vector<1x256xf32>
    %310 = vector.extract_strided_slice %309 {offsets = [0, 0], sizes = [1, 192], strides = [1, 1]} : vector<1x256xf32> to vector<1x192xf32>
    %311 = arith.negf %310 : vector<1x192xf32>
    %312 = math.exp %311 : vector<1x192xf32>
    %cst_55 = arith.constant 1.000000e+00 : f32
    %313 = vector.broadcast %cst_55 : f32 to vector<1x192xf32>
    %314 = arith.addf %313, %312 : vector<1x192xf32>
    %315 = arith.divf %313, %314 : vector<1x192xf32>
    %316 = vector.extract_strided_slice %309 {offsets = [0, 192], sizes = [1, 64], strides = [1, 1]} : vector<1x256xf32> to vector<1x64xf32>
    %317 = math.tanh %316 : vector<1x64xf32>
    %318 = vector.extract_strided_slice %315 {offsets = [0, 64], sizes = [1, 64], strides = [1, 1]} : vector<1x192xf32> to vector<1x64xf32>
    %319 = arith.mulf %318, %303 : vector<1x64xf32>
    %320 = vector.extract_strided_slice %315 {offsets = [0, 0], sizes = [1, 64], strides = [1, 1]} : vector<1x192xf32> to vector<1x64xf32>
    %321 = arith.mulf %320, %317 : vector<1x64xf32>
    %322 = arith.addf %319, %321 : vector<1x64xf32>
    %323 = vector.extract_strided_slice %315 {offsets = [0, 128], sizes = [1, 64], strides = [1, 1]} : vector<1x192xf32> to vector<1x64xf32>
    %324 = math.tanh %322 : vector<1x64xf32>
    %325 = arith.mulf %323, %324 : vector<1x64xf32>
    %326 = vector.extract_strided_slice %189 {offsets = [7, 0], sizes = [1, 256], strides = [1, 1]} : vector<8x256xf32> to vector<1x256xf32>
    %cst_56 = arith.constant dense<0.000000e+00> : vector<1x256xf32>
    %327 = tpu.matmul %325, %190, %cst_56 {dimension_numbers = #tpu.dot_dimension_numbers<[1], [0], [0], [1], [0, 0, 1, 1], [], []>} : vector<1x64xf32>, vector<64x256xf32>, vector<1x256xf32> -> vector<1x256xf32>
    %328 = arith.addf %326, %327 : vector<1x256xf32>
    %329 = vector.extract_strided_slice %328 {offsets = [0, 0], sizes = [1, 192], strides = [1, 1]} : vector<1x256xf32> to vector<1x192xf32>
    %330 = arith.negf %329 : vector<1x192xf32>
    %331 = math.exp %330 : vector<1x192xf32>
    %cst_57 = arith.constant 1.000000e+00 : f32
    %332 = vector.broadcast %cst_57 : f32 to vector<1x192xf32>
    %333 = arith.addf %332, %331 : vector<1x192xf32>
    %334 = arith.divf %332, %333 : vector<1x192xf32>
    %335 = vector.extract_strided_slice %328 {offsets = [0, 192], sizes = [1, 64], strides = [1, 1]} : vector<1x256xf32> to vector<1x64xf32>
    %336 = math.tanh %335 : vector<1x64xf32>
    %337 = vector.extract_strided_slice %334 {offsets = [0, 64], sizes = [1, 64], strides = [1, 1]} : vector<1x192xf32> to vector<1x64xf32>
    %338 = arith.mulf %337, %322 : vector<1x64xf32>
    %339 = vector.extract_strided_slice %334 {offsets = [0, 0], sizes = [1, 64], strides = [1, 1]} : vector<1x192xf32> to vector<1x64xf32>
    %340 = arith.mulf %339, %336 : vector<1x64xf32>
    %341 = arith.addf %338, %340 : vector<1x64xf32>
    %342 = vector.extract_strided_slice %334 {offsets = [0, 128], sizes = [1, 64], strides = [1, 1]} : vector<1x192xf32> to vector<1x64xf32>
    %343 = math.tanh %341 : vector<1x64xf32>
    %344 = arith.mulf %342, %343 : vector<1x64xf32>
    %345 = tpu.concatenate %211, %230, %249, %268, %287, %306, %325, %344 in 0 : vector<1x64xf32>, vector<1x64xf32>, vector<1x64xf32>, vector<1x64xf32>, vector<1x64xf32>, vector<1x64xf32>, vector<1x64xf32>, vector<1x64xf32> -> vector<8x64xf32>
    %346 = vector.extract_strided_slice %345 {offsets = [0, 0], sizes = [8, 32], strides = [1, 1]} : vector<8x64xf32> to vector<8x32xf32>
    %347 = vector.extract_strided_slice %345 {offsets = [0, 32], sizes = [8, 32], strides = [1, 1]} : vector<8x64xf32> to vector<8x32xf32>
    %cst_58 = arith.constant dense<0.000000e+00> : vector<8x32xf32>
    %348 = tpu.matmul %15, %347, %cst_58 {dimension_numbers = #tpu.dot_dimension_numbers<[1], [0], [0], [1], [0, 0, 1, 1], [], []>} : vector<8x8xf32>, vector<8x32xf32>, vector<8x32xf32> -> vector<8x32xf32>
    %349 = tpu.concatenate %346, %348 in 1 : vector<8x32xf32>, vector<8x32xf32> -> vector<8x64xf32>
    %c0_59 = arith.constant 0 : index
    %c0_60 = arith.constant 0 : index
    %350 = vector.load %arg8[%c0_59, %c0_60] : memref<64x4xf32, #tpu.memory_space<vmem>>, vector<64x4xf32>
    %cst_61 = arith.constant dense<0.000000e+00> : vector<8x4xf32>
    %351 = tpu.matmul %349, %350, %cst_61 {dimension_numbers = #tpu.dot_dimension_numbers<[1], [0], [0], [1], [0, 0, 1, 1], [], []>} : vector<8x64xf32>, vector<64x4xf32>, vector<8x4xf32> -> vector<8x4xf32>
    %c0_62 = arith.constant 0 : index
    %c0_63 = arith.constant 0 : index
    %352 = vector.load %arg9[%c0_62, %c0_63] : memref<1x4xf32, #tpu.memory_space<vmem>>, vector<1x4xf32>
    %353 = vector.broadcast %352 : vector<1x4xf32> to vector<8x4xf32>
    %354 = arith.addf %351, %353 : vector<8x4xf32>
    %c0_64 = arith.constant 0 : index
    %c0_65 = arith.constant 0 : index
    %355 = vector.load %arg13[%c0_64, %c0_65] : memref<8x4xf32, #tpu.memory_space<vmem>>, vector<8x4xf32>
    tpu.vector_store %arg13[%c0_64, %c0_65], %354 {strides = array<i32>} : memref<8x4xf32, #tpu.memory_space<vmem>>, vector<8x4xf32>,
    %356 = tpu.iota {dimensions = array<i32: 0>} : vector<4x4xi32>
    %357 = tpu.iota {dimensions = array<i32: 1>} : vector<4x4xi32>
    %358 = arith.cmpi eq, %356, %357 : vector<4x4xi32>
    %359 = arith.extui %358 : vector<4x4xi1> to vector<4x4xi32>
    %360 = arith.sitofp %359 : vector<4x4xi32> to vector<4x4xf32>
    %361 = tpu.iota {dimensions = array<i32: 0>} : vector<4x4xi32>
    %362 = tpu.iota {dimensions = array<i32: 1>} : vector<1x4xi32>
    %c0_66 = arith.constant 0 : index
    %c0_67 = arith.constant 0 : index
    %363 = vector.load %arg12[%c0_66, %c0_67] : memref<4x4xf32, #tpu.memory_space<vmem>>, vector<4x4xf32>
    %c0_68 = arith.constant 0 : index
    %c0_69 = arith.constant 0 : index
    %364 = vector.load %arg10[%c0_68, %c0_69] : memref<1x4xf32, #tpu.memory_space<vmem>>, vector<1x4xf32>
    %365 = vector.extract_strided_slice %354 {offsets = [0, 0], sizes = [1, 4], strides = [1, 1]} : vector<8x4xf32> to vector<1x4xf32>
    %366 = arith.addf %364, %365 : vector<1x4xf32>
    %367 = vector.broadcast %366 : vector<1x4xf32> to vector<4x4xf32>
    %368 = arith.mulf %360, %367 : vector<4x4xf32>
    %cst_70 = arith.constant dense<0.000000e+00> : vector<4xf32>
    %369 = vector.multi_reduction <add>, %368, %cst_70 [1] : vector<4x4xf32> to vector<4xf32>
    %370 = vector.shape_cast %369 : vector<4xf32> to vector<4x1xf32>
    %371 = vector.broadcast %370 : vector<4x1xf32> to vector<4x4xf32>
    %372 = arith.addf %371, %363 : vector<4x4xf32>
    %cst_71 = arith.constant dense<0xFF800000> : vector<4xf32>
    %373 = vector.multi_reduction <maximumf>, %372, %cst_71 [0] : vector<4x4xf32> to vector<4xf32>
    %374 = vector.shape_cast %373 : vector<4xf32> to vector<1x4xf32>
    %375 = vector.broadcast %374 : vector<1x4xf32> to vector<4x4xf32>
    %376 = arith.cmpf oge, %372, %375 : vector<4x4xf32>
    %c4_i32 = arith.constant 4 : i32
    %377 = vector.broadcast %c4_i32 : i32 to vector<4x4xi32>
    %378 = arith.select %376, %361, %377 : vector<4x4xi1>, vector<4x4xi32>
    %cst_72 = arith.constant dense<2147483647> : vector<4xi32>
    %379 = vector.multi_reduction <minsi>, %378, %cst_72 [0] : vector<4x4xi32> to vector<4xi32>
    %380 = vector.shape_cast %379 : vector<4xi32> to vector<1x4xi32>
    %381 = vector.extract_strided_slice %354 {offsets = [1, 0], sizes = [1, 4], strides = [1, 1]} : vector<8x4xf32> to vector<1x4xf32>
    %382 = arith.addf %374, %381 : vector<1x4xf32>
    %383 = vector.broadcast %382 : vector<1x4xf32> to vector<4x4xf32>
    %384 = arith.mulf %360, %383 : vector<4x4xf32>
    %cst_73 = arith.constant dense<0.000000e+00> : vector<4xf32>
    %385 = vector.multi_reduction <add>, %384, %cst_73 [1] : vector<4x4xf32> to vector<4xf32>
    %386 = vector.shape_cast %385 : vector<4xf32> to vector<4x1xf32>
    %387 = vector.broadcast %386 : vector<4x1xf32> to vector<4x4xf32>
    %388 = arith.addf %387, %363 : vector<4x4xf32>
    %cst_74 = arith.constant dense<0xFF800000> : vector<4xf32>
    %389 = vector.multi_reduction <maximumf>, %388, %cst_74 [0] : vector<4x4xf32> to vector<4xf32>
    %390 = vector.shape_cast %389 : vector<4xf32> to vector<1x4xf32>
    %391 = vector.broadcast %390 : vector<1x4xf32> to vector<4x4xf32>
    %392 = arith.cmpf oge, %388, %391 : vector<4x4xf32>
    %c4_i32_75 = arith.constant 4 : i32
    %393 = vector.broadcast %c4_i32_75 : i32 to vector<4x4xi32>
    %394 = arith.select %392, %361, %393 : vector<4x4xi1>, vector<4x4xi32>
    %cst_76 = arith.constant dense<2147483647> : vector<4xi32>
    %395 = vector.multi_reduction <minsi>, %394, %cst_76 [0] : vector<4x4xi32> to vector<4xi32>
    %396 = vector.shape_cast %395 : vector<4xi32> to vector<1x4xi32>
    %397 = vector.extract_strided_slice %354 {offsets = [2, 0], sizes = [1, 4], strides = [1, 1]} : vector<8x4xf32> to vector<1x4xf32>
    %398 = arith.addf %390, %397 : vector<1x4xf32>
    %399 = vector.broadcast %398 : vector<1x4xf32> to vector<4x4xf32>
    %400 = arith.mulf %360, %399 : vector<4x4xf32>
    %cst_77 = arith.constant dense<0.000000e+00> : vector<4xf32>
    %401 = vector.multi_reduction <add>, %400, %cst_77 [1] : vector<4x4xf32> to vector<4xf32>
    %402 = vector.shape_cast %401 : vector<4xf32> to vector<4x1xf32>
    %403 = vector.broadcast %402 : vector<4x1xf32> to vector<4x4xf32>
    %404 = arith.addf %403, %363 : vector<4x4xf32>
    %cst_78 = arith.constant dense<0xFF800000> : vector<4xf32>
    %405 = vector.multi_reduction <maximumf>, %404, %cst_78 [0] : vector<4x4xf32> to vector<4xf32>
    %406 = vector.shape_cast %405 : vector<4xf32> to vector<1x4xf32>
    %407 = vector.broadcast %406 : vector<1x4xf32> to vector<4x4xf32>
    %408 = arith.cmpf oge, %404, %407 : vector<4x4xf32>
    %c4_i32_79 = arith.constant 4 : i32
    %409 = vector.broadcast %c4_i32_79 : i32 to vector<4x4xi32>
    %410 = arith.select %408, %361, %409 : vector<4x4xi1>, vector<4x4xi32>
    %cst_80 = arith.constant dense<2147483647> : vector<4xi32>
    %411 = vector.multi_reduction <minsi>, %410, %cst_80 [0] : vector<4x4xi32> to vector<4xi32>
    %412 = vector.shape_cast %411 : vector<4xi32> to vector<1x4xi32>
    %413 = vector.extract_strided_slice %354 {offsets = [3, 0], sizes = [1, 4], strides = [1, 1]} : vector<8x4xf32> to vector<1x4xf32>
    %414 = arith.addf %406, %413 : vector<1x4xf32>
    %415 = vector.broadcast %414 : vector<1x4xf32> to vector<4x4xf32>
    %416 = arith.mulf %360, %415 : vector<4x4xf32>
    %cst_81 = arith.constant dense<0.000000e+00> : vector<4xf32>
    %417 = vector.multi_reduction <add>, %416, %cst_81 [1] : vector<4x4xf32> to vector<4xf32>
    %418 = vector.shape_cast %417 : vector<4xf32> to vector<4x1xf32>
    %419 = vector.broadcast %418 : vector<4x1xf32> to vector<4x4xf32>
    %420 = arith.addf %419, %363 : vector<4x4xf32>
    %cst_82 = arith.constant dense<0xFF800000> : vector<4xf32>
    %421 = vector.multi_reduction <maximumf>, %420, %cst_82 [0] : vector<4x4xf32> to vector<4xf32>
    %422 = vector.shape_cast %421 : vector<4xf32> to vector<1x4xf32>
    %423 = vector.broadcast %422 : vector<1x4xf32> to vector<4x4xf32>
    %424 = arith.cmpf oge, %420, %423 : vector<4x4xf32>
    %c4_i32_83 = arith.constant 4 : i32
    %425 = vector.broadcast %c4_i32_83 : i32 to vector<4x4xi32>
    %426 = arith.select %424, %361, %425 : vector<4x4xi1>, vector<4x4xi32>
    %cst_84 = arith.constant dense<2147483647> : vector<4xi32>
    %427 = vector.multi_reduction <minsi>, %426, %cst_84 [0] : vector<4x4xi32> to vector<4xi32>
    %428 = vector.shape_cast %427 : vector<4xi32> to vector<1x4xi32>
    %429 = vector.extract_strided_slice %354 {offsets = [4, 0], sizes = [1, 4], strides = [1, 1]} : vector<8x4xf32> to vector<1x4xf32>
    %430 = arith.addf %422, %429 : vector<1x4xf32>
    %431 = vector.broadcast %430 : vector<1x4xf32> to vector<4x4xf32>
    %432 = arith.mulf %360, %431 : vector<4x4xf32>
    %cst_85 = arith.constant dense<0.000000e+00> : vector<4xf32>
    %433 = vector.multi_reduction <add>, %432, %cst_85 [1] : vector<4x4xf32> to vector<4xf32>
    %434 = vector.shape_cast %433 : vector<4xf32> to vector<4x1xf32>
    %435 = vector.broadcast %434 : vector<4x1xf32> to vector<4x4xf32>
    %436 = arith.addf %435, %363 : vector<4x4xf32>
    %cst_86 = arith.constant dense<0xFF800000> : vector<4xf32>
    %437 = vector.multi_reduction <maximumf>, %436, %cst_86 [0] : vector<4x4xf32> to vector<4xf32>
    %438 = vector.shape_cast %437 : vector<4xf32> to vector<1x4xf32>
    %439 = vector.broadcast %438 : vector<1x4xf32> to vector<4x4xf32>
    %440 = arith.cmpf oge, %436, %439 : vector<4x4xf32>
    %c4_i32_87 = arith.constant 4 : i32
    %441 = vector.broadcast %c4_i32_87 : i32 to vector<4x4xi32>
    %442 = arith.select %440, %361, %441 : vector<4x4xi1>, vector<4x4xi32>
    %cst_88 = arith.constant dense<2147483647> : vector<4xi32>
    %443 = vector.multi_reduction <minsi>, %442, %cst_88 [0] : vector<4x4xi32> to vector<4xi32>
    %444 = vector.shape_cast %443 : vector<4xi32> to vector<1x4xi32>
    %445 = vector.extract_strided_slice %354 {offsets = [5, 0], sizes = [1, 4], strides = [1, 1]} : vector<8x4xf32> to vector<1x4xf32>
    %446 = arith.addf %438, %445 : vector<1x4xf32>
    %447 = vector.broadcast %446 : vector<1x4xf32> to vector<4x4xf32>
    %448 = arith.mulf %360, %447 : vector<4x4xf32>
    %cst_89 = arith.constant dense<0.000000e+00> : vector<4xf32>
    %449 = vector.multi_reduction <add>, %448, %cst_89 [1] : vector<4x4xf32> to vector<4xf32>
    %450 = vector.shape_cast %449 : vector<4xf32> to vector<4x1xf32>
    %451 = vector.broadcast %450 : vector<4x1xf32> to vector<4x4xf32>
    %452 = arith.addf %451, %363 : vector<4x4xf32>
    %cst_90 = arith.constant dense<0xFF800000> : vector<4xf32>
    %453 = vector.multi_reduction <maximumf>, %452, %cst_90 [0] : vector<4x4xf32> to vector<4xf32>
    %454 = vector.shape_cast %453 : vector<4xf32> to vector<1x4xf32>
    %455 = vector.broadcast %454 : vector<1x4xf32> to vector<4x4xf32>
    %456 = arith.cmpf oge, %452, %455 : vector<4x4xf32>
    %c4_i32_91 = arith.constant 4 : i32
    %457 = vector.broadcast %c4_i32_91 : i32 to vector<4x4xi32>
    %458 = arith.select %456, %361, %457 : vector<4x4xi1>, vector<4x4xi32>
    %cst_92 = arith.constant dense<2147483647> : vector<4xi32>
    %459 = vector.multi_reduction <minsi>, %458, %cst_92 [0] : vector<4x4xi32> to vector<4xi32>
    %460 = vector.shape_cast %459 : vector<4xi32> to vector<1x4xi32>
    %461 = vector.extract_strided_slice %354 {offsets = [6, 0], sizes = [1, 4], strides = [1, 1]} : vector<8x4xf32> to vector<1x4xf32>
    %462 = arith.addf %454, %461 : vector<1x4xf32>
    %463 = vector.broadcast %462 : vector<1x4xf32> to vector<4x4xf32>
    %464 = arith.mulf %360, %463 : vector<4x4xf32>
    %cst_93 = arith.constant dense<0.000000e+00> : vector<4xf32>
    %465 = vector.multi_reduction <add>, %464, %cst_93 [1] : vector<4x4xf32> to vector<4xf32>
    %466 = vector.shape_cast %465 : vector<4xf32> to vector<4x1xf32>
    %467 = vector.broadcast %466 : vector<4x1xf32> to vector<4x4xf32>
    %468 = arith.addf %467, %363 : vector<4x4xf32>
    %cst_94 = arith.constant dense<0xFF800000> : vector<4xf32>
    %469 = vector.multi_reduction <maximumf>, %468, %cst_94 [0] : vector<4x4xf32> to vector<4xf32>
    %470 = vector.shape_cast %469 : vector<4xf32> to vector<1x4xf32>
    %471 = vector.broadcast %470 : vector<1x4xf32> to vector<4x4xf32>
    %472 = arith.cmpf oge, %468, %471 : vector<4x4xf32>
    %c4_i32_95 = arith.constant 4 : i32
    %473 = vector.broadcast %c4_i32_95 : i32 to vector<4x4xi32>
    %474 = arith.select %472, %361, %473 : vector<4x4xi1>, vector<4x4xi32>
    %cst_96 = arith.constant dense<2147483647> : vector<4xi32>
    %475 = vector.multi_reduction <minsi>, %474, %cst_96 [0] : vector<4x4xi32> to vector<4xi32>
    %476 = vector.shape_cast %475 : vector<4xi32> to vector<1x4xi32>
    %477 = vector.extract_strided_slice %354 {offsets = [7, 0], sizes = [1, 4], strides = [1, 1]} : vector<8x4xf32> to vector<1x4xf32>
    %478 = arith.addf %470, %477 : vector<1x4xf32>
    %c0_97 = arith.constant 0 : index
    %c0_98 = arith.constant 0 : index
    %479 = vector.load %arg11[%c0_97, %c0_98] : memref<1x4xf32, #tpu.memory_space<vmem>>, vector<1x4xf32>
    %480 = arith.addf %478, %479 : vector<1x4xf32>
    %481 = vector.shape_cast %480 : vector<1x4xf32> to vector<1x1x4xf32>
    %cst_99 = arith.constant dense<0xFF800000> : vector<1xf32>
    %482 = vector.multi_reduction <maximumf>, %481, %cst_99 [1, 2] : vector<1x1x4xf32> to vector<1xf32>
    %483 = vector.shape_cast %482 : vector<1xf32> to vector<1x1x1xf32>
    %484 = vector.extract %483[0, 0, 0] : f32 from vector<1x1x1xf32>
    %485 = vector.broadcast %484 : f32 to vector<1x4xf32>
    %486 = arith.cmpf oge, %480, %485 : vector<1x4xf32>
    %c4_i32_100 = arith.constant 4 : i32
    %487 = vector.broadcast %c4_i32_100 : i32 to vector<1x4xi32>
    %488 = arith.select %486, %362, %487 : vector<1x4xi1>, vector<1x4xi32>
    %489 = vector.shape_cast %488 : vector<1x4xi32> to vector<1x1x4xi32>
    %cst_101 = arith.constant dense<2147483647> : vector<1xi32>
    %490 = vector.multi_reduction <minsi>, %489, %cst_101 [1, 2] : vector<1x1x4xi32> to vector<1xi32>
    %491 = vector.shape_cast %490 : vector<1xi32> to vector<1x1x1xi32>
    %492 = vector.extract %491[0, 0, 0] : i32 from vector<1x1x1xi32>
    %c7 = arith.constant 7 : index
    %493 = memref.load %arg14[%c7] : memref<8xi32, #tpu.memory_space<smem>>
    memref.store %492, %arg14[%c7] : memref<8xi32, #tpu.memory_space<smem>>
    %494 = vector.broadcast %492 : i32 to vector<1x4xi32>
    %495 = arith.cmpi eq, %362, %494 : vector<1x4xi32>
    %c0_i32 = arith.constant 0 : i32
    %496 = vector.broadcast %c0_i32 : i32 to vector<1x4xi32>
    %497 = arith.select %495, %476, %496 : vector<1x4xi1>, vector<1x4xi32>
    %498 = vector.shape_cast %497 : vector<1x4xi32> to vector<1x1x4xi32>
    %cst_102 = arith.constant dense<0> : vector<1xi32>
    %499 = vector.multi_reduction <add>, %498, %cst_102 [1, 2] : vector<1x1x4xi32> to vector<1xi32>
    %500 = vector.shape_cast %499 : vector<1xi32> to vector<1x1x1xi32>
    %501 = vector.extract %500[0, 0, 0] : i32 from vector<1x1x1xi32>
    %c6 = arith.constant 6 : index
    %502 = memref.load %arg14[%c6] : memref<8xi32, #tpu.memory_space<smem>>
    memref.store %501, %arg14[%c6] : memref<8xi32, #tpu.memory_space<smem>>
    %503 = vector.broadcast %501 : i32 to vector<1x4xi32>
    %504 = arith.cmpi eq, %362, %503 : vector<1x4xi32>
    %c0_i32_103 = arith.constant 0 : i32
    %505 = vector.broadcast %c0_i32_103 : i32 to vector<1x4xi32>
    %506 = arith.select %504, %460, %505 : vector<1x4xi1>, vector<1x4xi32>
    %507 = vector.shape_cast %506 : vector<1x4xi32> to vector<1x1x4xi32>
    %cst_104 = arith.constant dense<0> : vector<1xi32>
    %508 = vector.multi_reduction <add>, %507, %cst_104 [1, 2] : vector<1x1x4xi32> to vector<1xi32>
    %509 = vector.shape_cast %508 : vector<1xi32> to vector<1x1x1xi32>
    %510 = vector.extract %509[0, 0, 0] : i32 from vector<1x1x1xi32>
    %c5 = arith.constant 5 : index
    %511 = memref.load %arg14[%c5] : memref<8xi32, #tpu.memory_space<smem>>
    memref.store %510, %arg14[%c5] : memref<8xi32, #tpu.memory_space<smem>>
    %512 = vector.broadcast %510 : i32 to vector<1x4xi32>
    %513 = arith.cmpi eq, %362, %512 : vector<1x4xi32>
    %c0_i32_105 = arith.constant 0 : i32
    %514 = vector.broadcast %c0_i32_105 : i32 to vector<1x4xi32>
    %515 = arith.select %513, %444, %514 : vector<1x4xi1>, vector<1x4xi32>
    %516 = vector.shape_cast %515 : vector<1x4xi32> to vector<1x1x4xi32>
    %cst_106 = arith.constant dense<0> : vector<1xi32>
    %517 = vector.multi_reduction <add>, %516, %cst_106 [1, 2] : vector<1x1x4xi32> to vector<1xi32>
    %518 = vector.shape_cast %517 : vector<1xi32> to vector<1x1x1xi32>
    %519 = vector.extract %518[0, 0, 0] : i32 from vector<1x1x1xi32>
    %c4 = arith.constant 4 : index
    %520 = memref.load %arg14[%c4] : memref<8xi32, #tpu.memory_space<smem>>
    memref.store %519, %arg14[%c4] : memref<8xi32, #tpu.memory_space<smem>>
    %521 = vector.broadcast %519 : i32 to vector<1x4xi32>
    %522 = arith.cmpi eq, %362, %521 : vector<1x4xi32>
    %c0_i32_107 = arith.constant 0 : i32
    %523 = vector.broadcast %c0_i32_107 : i32 to vector<1x4xi32>
    %524 = arith.select %522, %428, %523 : vector<1x4xi1>, vector<1x4xi32>
    %525 = vector.shape_cast %524 : vector<1x4xi32> to vector<1x1x4xi32>
    %cst_108 = arith.constant dense<0> : vector<1xi32>
    %526 = vector.multi_reduction <add>, %525, %cst_108 [1, 2] : vector<1x1x4xi32> to vector<1xi32>
    %527 = vector.shape_cast %526 : vector<1xi32> to vector<1x1x1xi32>
    %528 = vector.extract %527[0, 0, 0] : i32 from vector<1x1x1xi32>
    %c3 = arith.constant 3 : index
    %529 = memref.load %arg14[%c3] : memref<8xi32, #tpu.memory_space<smem>>
    memref.store %528, %arg14[%c3] : memref<8xi32, #tpu.memory_space<smem>>
    %530 = vector.broadcast %528 : i32 to vector<1x4xi32>
    %531 = arith.cmpi eq, %362, %530 : vector<1x4xi32>
    %c0_i32_109 = arith.constant 0 : i32
    %532 = vector.broadcast %c0_i32_109 : i32 to vector<1x4xi32>
    %533 = arith.select %531, %412, %532 : vector<1x4xi1>, vector<1x4xi32>
    %534 = vector.shape_cast %533 : vector<1x4xi32> to vector<1x1x4xi32>
    %cst_110 = arith.constant dense<0> : vector<1xi32>
    %535 = vector.multi_reduction <add>, %534, %cst_110 [1, 2] : vector<1x1x4xi32> to vector<1xi32>
    %536 = vector.shape_cast %535 : vector<1xi32> to vector<1x1x1xi32>
    %537 = vector.extract %536[0, 0, 0] : i32 from vector<1x1x1xi32>
    %c2 = arith.constant 2 : index
    %538 = memref.load %arg14[%c2] : memref<8xi32, #tpu.memory_space<smem>>
    memref.store %537, %arg14[%c2] : memref<8xi32, #tpu.memory_space<smem>>
    %539 = vector.broadcast %537 : i32 to vector<1x4xi32>
    %540 = arith.cmpi eq, %362, %539 : vector<1x4xi32>
    %c0_i32_111 = arith.constant 0 : i32
    %541 = vector.broadcast %c0_i32_111 : i32 to vector<1x4xi32>
    %542 = arith.select %540, %396, %541 : vector<1x4xi1>, vector<1x4xi32>
    %543 = vector.shape_cast %542 : vector<1x4xi32> to vector<1x1x4xi32>
    %cst_112 = arith.constant dense<0> : vector<1xi32>
    %544 = vector.multi_reduction <add>, %543, %cst_112 [1, 2] : vector<1x1x4xi32> to vector<1xi32>
    %545 = vector.shape_cast %544 : vector<1xi32> to vector<1x1x1xi32>
    %546 = vector.extract %545[0, 0, 0] : i32 from vector<1x1x1xi32>
    %c1 = arith.constant 1 : index
    %547 = memref.load %arg14[%c1] : memref<8xi32, #tpu.memory_space<smem>>
    memref.store %546, %arg14[%c1] : memref<8xi32, #tpu.memory_space<smem>>
    %548 = vector.broadcast %546 : i32 to vector<1x4xi32>
    %549 = arith.cmpi eq, %362, %548 : vector<1x4xi32>
    %c0_i32_113 = arith.constant 0 : i32
    %550 = vector.broadcast %c0_i32_113 : i32 to vector<1x4xi32>
    %551 = arith.select %549, %380, %550 : vector<1x4xi1>, vector<1x4xi32>
    %552 = vector.shape_cast %551 : vector<1x4xi32> to vector<1x1x4xi32>
    %cst_114 = arith.constant dense<0> : vector<1xi32>
    %553 = vector.multi_reduction <add>, %552, %cst_114 [1, 2] : vector<1x1x4xi32> to vector<1xi32>
    %554 = vector.shape_cast %553 : vector<1xi32> to vector<1x1x1xi32>
    %555 = vector.extract %554[0, 0, 0] : i32 from vector<1x1x1xi32>
    %c0_115 = arith.constant 0 : index
    %556 = memref.load %arg14[%c0_115] : memref<8xi32, #tpu.memory_space<smem>>
    memref.store %555, %arg14[%c0_115] : memref<8xi32, #tpu.memory_space<smem>>
    return
  }
}

</mosaic_0001>

<bundles_post_ra>
// kernel: _forward.1
= control target key start
LH: loop header
LB: loop body
LE: loop exit
PB: predicated region body
PF: predicated region fallthrough
CT: control target
= control target key end

     0   :  { %v3455_v1 = vmov 0.0   ;;  %vm3456_vm0 = vmmov 0   ;;  %s4578_s0 = inlined_call_operand.vmem [shape: f32[128,32], index: 0, kind: input, shape index: {}]   ;;  %s4579_s1 = inlined_call_operand.vmem [shape: f32[8,128], index: 1, kind: input, shape index: {}]   ;;  %s4580_s2 = inlined_call_operand.vmem [shape: f32[64,256], index: 2, kind: input, shape index: {}]   ;;  %s4581_s3 = inlined_call_operand.vmem [shape: f32[64,256], index: 3, kind: input, shape index: {}]   ;;  %s4582_s4 = inlined_call_operand.vmem [shape: f32[1,256], index: 4, kind: input, shape index: {}]   ;;  %s4583_s5 = inlined_call_operand.vmem [shape: f32[128,256], index: 5, kind: input, shape index: {}]   ;;  %s4584_s6 = inlined_call_operand.vmem [shape: f32[64,256], index: 6, kind: input, shape index: {}]   ;;  %s4585_s7 = inlined_call_operand.vmem [shape: f32[1,256], index: 7, kind: input, shape index: {}]   ;;  %s4586_s8 = inlined_call_operand.vmem [shape: f32[64,4], index: 8, kind: input, shape index: {}]   ;;  %s4587_s9 = inlined_call_operand.vmem [shape: f32[1,4], index: 9, kind: input, shape index: {}]   ;;  %s4588_s10 = inlined_call_operand.vmem [shape: f32[1,4], index: 10, kind: input, shape index: {}]   ;;  %s4589_s11 = inlined_call_operand.vmem [shape: f32[1,4], index: 11, kind: input, shape index: {}]   ;;  %s4590_s12 = inlined_call_operand.vmem [shape: f32[4,4], index: 12, kind: input, shape index: {}]   ;;  %s4591_s13 = inlined_call_operand.vmem [shape: f32[8,4], index: 13, kind: output, shape index: {0}]   ;;  %s4592_s14 = inlined_call_operand.hbm [shape: s32[8], index: 14, kind: output, shape index: {1}]  }
   0x1   :  { %v63_v0 = vld [vmem:[%s4578_s0 + $0x78] sm:$0xff]  ;;  %3153 = vmatprep.subr.mxu0 %v3455_v1  ;;  %v62_v2 = vld [vmem:[%s4578_s0 + $0x70] sm:$0xff]  ;;  %3185 = vmatprep.mubr.msk.f32.mxu0 %vm3456_vm0, %v3455_v1  ;;  %v61_v3 = vld [vmem:[%s4578_s0 + $0x68] sm:$0xff] }
   0x2   :  { %3154 = vmatpush3.msra.mxu0 %v63_v0  ;;  %323 = vmatprep.mubr.f32.mxu1 %v3455_v1  ;;  %v60_v4 = vld [vmem:[%s4578_s0 + $0x60] sm:$0xff] }
   0x3   :  { %3155 = vmatprep.subr.mxu0 %v3455_v1  ;;  %v47_v5 = vld [vmem:[%s4579_s1] sm:$0xff] }
   0x4   :  { %3156 = vmatpush3.msra.mxu0 %v62_v2 }
   0x5   :  { %3157 = vmatprep.subr.mxu0 %v3455_v1 }
   0x6   :  { %20 = vsyncpa [#allocation3], 0  ;;  %3158 = vmatpush3.msra.mxu0 %v61_v3  ;;  %134 = vadd.xlane.f32.xlu0 %v47_v5  ;;  %v59_v6 = vld [vmem:[%s4578_s0 + $0x58] sm:$0xff]  ;;  %v58_v7 = vld [vmem:[%s4578_s0 + $0x50] sm:$0xff]  ;;  %v139_v20 = vlaneseq  ;;  %vm147_vm2 = vcmask 64512   ;;  %s3457_s30 = smov 32  }
   0x7   :  { %3159 = vmatprep.subr.mxu0 %v3455_v1  ;;  %v57_v8 = vld [vmem:[%s4578_s0 + $0x48] sm:$0xff]  ;;  %v56_v9 = vld [vmem:[%s4578_s0 + $0x40] sm:$0xff]  ;;  %v55_v10 = vld [vmem:[%s4578_s0 + $0x38] sm:$0xff]  ;;  %vm225_vm3 = vcmask 261120   ;;  %vm255_vm4 = vcmask 523264   ;;  %s3458_s22 = smov 64  }
   0x8   :  { %3160 = vmatpush3.msra.mxu0 %v60_v4  ;;  %v54_v11 = vld [vmem:[%s4578_s0 + $0x30] sm:$0xff]  ;;  %v53_v12 = vld [vmem:[%s4578_s0 + $0x28] sm:$0xff]  ;;  %v52_v13 = vld [vmem:[%s4578_s0 + $0x20] sm:$0xff]  ;;  %v3609_v21 = vshrl.u32 %v139_v20, 7  ;;  %v3611_v22 = vand.u32 127, %v139_v20  ;;  %vm1263_vm5 = vcmask 1040384  }
   0x9   :  { %3161 = vmatprep.subr.mxu0 %v3455_v1  ;;  %v51_v14 = vld [vmem:[%s4578_s0 + $0x18] sm:$0xff]  ;;  %v50_v15 = vld [vmem:[%s4578_s0 + $0x10] sm:$0xff]  ;;  %v49_v16 = vld [vmem:[%s4578_s0 + $0x8] sm:$0xff]  ;;  %vm1265_vm6 = vcmask 1041408   ;;  %vm1267_vm7 = vcmask 1042432   ;;  %vm1269_vm8 = vcmask 1043456  }
   0xa   :  { %3162 = vmatpush3.msra.mxu0 %v59_v6  ;;  %v48_v17 = vld [vmem:[%s4578_s0] sm:$0xff]  ;;  %v143_v23 = vadd.s32 %v3611_v22, %v3609_v21  ;;  %v242_v29 = vld [vmem:[%s4580_s2 + $0x78] sm:$0xff]  ;;  %v241_v30 = vld [vmem:[%s4580_s2 + $0x70] sm:$0xff]  ;;  %v3810_v2 = vsub.s32 1, %v3609_v21  ;;  %vm1271_vm9 = vcmask 1044480   ;;  %vm1273_vm10 = vcmask 1045504  }
   0xb   :  { %3163 = vmatprep.subr.mxu0 %v3455_v1  ;;  %v240_v31 = vld [vmem:[%s4580_s2 + $0x68] sm:$0xff]  ;;  %275 = vmatprep.subr.mxu1 %v242_v29  ;;  %v239_v32 = vld [vmem:[%s4580_s2 + $0x60] sm:$0xff]  ;;  %v238_v33 = vld [vmem:[%s4580_s2 + $0x58] sm:$0xff]  ;;  %vm1275_vm11 = vcmask 1046528   ;;  %vm2650_vm12 = vcmask 31744   ;;  %vm2652_vm13 = vcmp.eq.s32.totalorder %v3609_v21, %v3611_v22  ;;  %vm2665_vm14 = vcmask 27648  }
   0xc   :  { %3164 = vmatpush3.msra.mxu0 %v58_v7  ;;  %vm144_vm1 = vcmp.eq.s32.totalorder %v143_v23, 7  ;;  %276 = vmatpush1.msra.mxu1 %v241_v30  ;;  %v237_v34 = vld [vmem:[%s4580_s2 + $0x50] sm:$0xff]  ;;  %v236_v35 = vld [vmem:[%s4580_s2 + $0x48] sm:$0xff]  ;;  %v235_v36 = vld [vmem:[%s4580_s2 + $0x40] sm:$0xff]  ;;  %s3460_s0 = smov [#allocation2]  }
   0xd   :  { %3165 = vmatprep.subr.mxu0 %v3455_v1  ;;  %v3618_v27 = vsel %vm144_vm1, 1.0, %v3455_v1  ;;  %277 = vmatprep.subr.mxu1 %v240_v31  ;;  %v234_v37 = vld [vmem:[%s4580_s2 + $0x38] sm:$0xff]  ;;  %v233_v38 = vld [vmem:[%s4580_s2 + $0x30] sm:$0xff]  ;;  %v232_v39 = vld [vmem:[%s4580_s2 + $0x28] sm:$0xff] }
   0xe   :  { %3166 = vmatpush3.msra.mxu0 %v57_v8  ;;  %278 = vmatpush1.msra.mxu1 %v239_v32  ;;  %v231_v40 = vld [vmem:[%s4580_s2 + $0x20] sm:$0xff]  ;;  %v230_v41 = vld [vmem:[%s4580_s2 + $0x18] sm:$0xff]  ;;  %v229_v42 = vld [vmem:[%s4580_s2 + $0x10] sm:$0xff] }
   0xf   :  { %3167 = vmatprep.subr.mxu0 %v3455_v1  ;;  %279 = vmatprep.subr.mxu1 %v238_v33  ;;  %v228_v43 = vld [vmem:[%s4580_s2 + $0x8] sm:$0xff]  ;;  %v227_v44 = vld [vmem:[%s4580_s2] sm:$0xff]  ;;  %v3675_v45 = vld [vmem:[%s4581_s3 + $0x78] sm:$0xff] }
  0x10   :  { %3168 = vmatpush3.msra.mxu0 %v56_v9  ;;  %280 = vmatpush1.msra.mxu1 %v237_v34  ;;  %v3681_v46 = vld [vmem:[%s4581_s3 + $0x70] sm:$0xff]  ;;  %v3688_v47 = vld [vmem:[%s4581_s3 + $0x68] sm:$0xff]  ;;  %v3693_v48 = vld [vmem:[%s4581_s3 + $0x60] sm:$0xff] }
  0x11   :  { %3169 = vmatprep.subr.mxu0 %v3455_v1  ;;  %281 = vmatprep.subr.mxu1 %v236_v35  ;;  %v3699_v49 = vld [vmem:[%s4581_s3 + $0x58] sm:$0xff]  ;;  %v3705_v50 = vld [vmem:[%s4581_s3 + $0x50] sm:$0xff]  ;;  %v3711_v51 = vld [vmem:[%s4581_s3 + $0x48] sm:$0xff] }
  0x12   :  { %3170 = vmatpush3.msra.mxu0 %v55_v10  ;;  %282 = vmatpush1.msra.mxu1 %v235_v36  ;;  %v3717_v52 = vld [vmem:[%s4581_s3 + $0x40] sm:$0xff]  ;;  %v3723_v53 = vld [vmem:[%s4581_s3 + $0x38] sm:$0xff]  ;;  %v3729_v54 = vld [vmem:[%s4581_s3 + $0x30] sm:$0xff] }
  0x13   :  { %3171 = vmatprep.subr.mxu0 %v3455_v1  ;;  %283 = vmatprep.subr.mxu1 %v234_v37  ;;  %v3735_v55 = vld [vmem:[%s4581_s3 + $0x28] sm:$0xff]  ;;  %v3741_v56 = vld [vmem:[%s4581_s3 + $0x20] sm:$0xff]  ;;  %v3747_v58 = vld [vmem:[%s4581_s3 + $0x18] sm:$0xff] }
  0x14   :  { %3172 = vmatpush3.msra.mxu0 %v54_v11  ;;  %284 = vmatpush1.msra.mxu1 %v233_v38  ;;  %v3754_v59 = vld [vmem:[%s4581_s3 + $0x10] sm:$0xff]  ;;  %v3760_v61 = vld [vmem:[%s4581_s3 + $0x8] sm:$0xff]  ;;  %v3766_v62 = vld [vmem:[%s4581_s3] sm:$0xff] }
  0x15   :  { %3173 = vmatprep.subr.mxu0 %v3455_v1  ;;  %285 = vmatprep.subr.mxu1 %v232_v39  ;;  %v243_v4 = vld [vmem:[%s4582_s4] sm:$0x3]  ;;  %s3459_s4 = smov 96  }
  0x16   :  { %3174 = vmatpush3.msra.mxu0 %v53_v12  ;;  %286 = vmatpush1.msra.mxu1 %v231_v40  ;;  %v3821_v12 = vsub.s32 0, %v3609_v21 }
  0x17   :  { %3175 = vmatprep.subr.mxu0 %v3455_v1  ;;  %287 = vmatprep.subr.mxu1 %v230_v41 }
  0x18   :  { %3176 = vmatpush3.msra.mxu0 %v52_v13  ;;  %288 = vmatpush1.msra.mxu1 %v229_v42  ;;  %v248_v13 = vrot.slane %v243_v4, %v3821_v12 }
  0x19   :  { %3177 = vmatprep.subr.mxu0 %v3455_v1  ;;  %289 = vmatprep.subr.mxu1 %v228_v43 }
  0x1a   :  { %3178 = vmatpush3.msra.mxu0 %v51_v14  ;;  %290 = vmatpush1.msra.mxu1 %v227_v44 }
  0x1b   :  { %3179 = vmatprep.subr.mxu0 %v3455_v1  ;;  %365 = vmatprep.subr.mxu1 %v3675_v45 }
  0x1c   :  { %3180 = vmatpush3.msra.mxu0 %v50_v15 }
  0x1d   :  { %3181 = vmatprep.subr.mxu0 %v3455_v1 }
  0x1e   :  { %3182 = vmatpush3.msra.mxu0 %v49_v16 }
  0x1f   :  { %3183 = vmatprep.subr.mxu0 %v3455_v1 }
  0x20   :  { %3184 = vmatpush3.msra.mxu0 %v48_v17 }
  0x21   :  { %3186 = vmatmul.mubr.f32.vlgmr.msra.gmra.mxu0 %v47_v5  ;;  %3188 = vmatprep.subr.mxu0 %v3455_v1  ;;  %v252_v5 = vrot.slane %v243_v4, %v3810_v2 }
  0x22   :  { %3190 = vmatprep.mubr.msk.f32.mxu0 %vm3456_vm0, %v3455_v1 }
  0x8f   :  { %v135_v18 = vpop.xlane.xlu0 %134 }
  0x90   :  { %v136_v19 = vmax.f32 %v135_v18, 1e-09 }
  0x92   :  { %3251 = vrcp.f32 %v136_v19 }
  0x9f   :  { %v3252_v24 = vpop.eup %3251 }
  0xe1   :  { %v130_v25 = vpop.f32.mrf.mxu0 }
  0xe2   :  { %v3615_v26 = vmul.f32 %v3252_v24, %v130_v25 }
  0xe3   :  { %v3187_v28 = vpop.f32.mrf.mxu0 }
  0xe4   :  { %3189 = vmatpush3.msra.mxu0 %v3615_v26 }
  0xe5   :  { %3191 = vmatmul.mubr.msk.f32.vlgmr.msra.gmra.mxu0 %vm147_vm2, %v3618_v27  ;;  %471 = vmatprep.subr.mxu0 %v3675_v45 }
  0xe6   :  { %519 = vmatprep.mubr.f32.mxu0 %v3455_v1  ;;  %472 = vmatpush1.msra.mxu0 %v3681_v46 }
  0xe7   :  { %473 = vmatprep.subr.mxu0 %v3688_v47 }
  0xe8   :  { %474 = vmatpush1.msra.mxu0 %v3693_v48 }
  0xe9   :  { %475 = vmatprep.subr.mxu0 %v3699_v49 }
  0xea   :  { %476 = vmatpush1.msra.mxu0 %v3705_v50 }
  0xeb   :  { %477 = vmatprep.subr.mxu0 %v3711_v51 }
  0xec   :  { %478 = vmatpush1.msra.mxu0 %v3717_v52 }
  0xed   :  { %479 = vmatprep.subr.mxu0 %v3723_v53 }
  0xee   :  { %480 = vmatpush1.msra.mxu0 %v3729_v54 }
  0xef   :  { %481 = vmatprep.subr.mxu0 %v3735_v55 }
  0xf0   :  { %482 = vmatpush1.msra.mxu0 %v3741_v56 }
  0xf1   :  { %483 = vmatprep.subr.mxu0 %v3747_v58 }
  0xf2   :  { %484 = vmatpush1.msra.mxu0 %v3754_v59 }
  0xf3   :  { %485 = vmatprep.subr.mxu0 %v3760_v61 }
  0xf4   :  { %486 = vmatpush1.msra.mxu0 %v3766_v62 }
  0xf5   :  { %703 = vmatprep.subr.mxu0 %v3675_v45 }
 0x1a5   :  { %v217_v57 = vpop.f32.mrf.mxu0 }
 0x1a6   :  { %222 = vrot.lane.b32.xlu0 %v217_v57, %s3457_s30 }
 0x1a7   :  { %v3192_v60 = vpop.f32.mrf.mxu0 }
 0x218   :  { %v223_v63 = vpop.permute.xlu0 %222 }
 0x219   :  { %v226_v0 = vsel %vm225_vm3, %v3615_v26, %v223_v63 }
 0x21a   :  { %3065 = vmatmul.mubr.msk.f32.vlgmr.msra.gmra.mxu1 %vm255_vm4, %v226_v0 }
 0x21b   :  { %366 = vmatpush1.msra.mxu1 %v3681_v46  ;;  %413 = vmatprep.mubr.f32.mxu1 %v3455_v1 }
 0x21c   :  { %367 = vmatprep.subr.mxu1 %v3688_v47 }
 0x21d   :  { %368 = vmatpush1.msra.mxu1 %v3693_v48 }
 0x21e   :  { %369 = vmatprep.subr.mxu1 %v3699_v49 }
 0x21f   :  { %370 = vmatpush1.msra.mxu1 %v3705_v50 }
 0x220   :  { %371 = vmatprep.subr.mxu1 %v3711_v51 }
 0x221   :  { %372 = vmatpush1.msra.mxu1 %v3717_v52 }
 0x222   :  { %373 = vmatprep.subr.mxu1 %v3723_v53 }
 0x223   :  { %374 = vmatpush1.msra.mxu1 %v3729_v54 }
 0x224   :  { %375 = vmatprep.subr.mxu1 %v3735_v55 }
 0x225   :  { %376 = vmatpush1.msra.mxu1 %v3741_v56 }
 0x226   :  { %377 = vmatprep.subr.mxu1 %v3747_v58 }
 0x227   :  { %378 = vmatpush1.msra.mxu1 %v3754_v59 }
 0x228   :  { %379 = vmatprep.subr.mxu1 %v3760_v61 }
 0x229   :  { %380 = vmatpush1.msra.mxu1 %v3766_v62 }
 0x22a   :  { %414 = vmatmul.mubr.f32.vlgmr.msra.gmra.mxu1 %v3455_v1  ;;  %587 = vmatprep.subr.mxu1 %v3675_v45 }
 0x22b   :  { %588 = vmatpush1.msra.mxu1 %v3681_v46  ;;  %635 = vmatprep.mubr.f32.mxu1 %v3455_v1 }
 0x22c   :  { %589 = vmatprep.subr.mxu1 %v3688_v47 }
 0x22d   :  { %590 = vmatpush1.msra.mxu1 %v3693_v48 }
 0x22e   :  { %591 = vmatprep.subr.mxu1 %v3699_v49 }
 0x22f   :  { %592 = vmatpush1.msra.mxu1 %v3705_v50 }
 0x230   :  { %593 = vmatprep.subr.mxu1 %v3711_v51 }
 0x231   :  { %594 = vmatpush1.msra.mxu1 %v3717_v52 }
 0x232   :  { %595 = vmatprep.subr.mxu1 %v3723_v53 }
 0x233   :  { %596 = vmatpush1.msra.mxu1 %v3729_v54 }
 0x234   :  { %597 = vmatprep.subr.mxu1 %v3735_v55 }
 0x235   :  { %598 = vmatpush1.msra.mxu1 %v3741_v56 }
 0x236   :  { %599 = vmatprep.subr.mxu1 %v3747_v58 }
 0x237   :  { %600 = vmatpush1.msra.mxu1 %v3754_v59 }
 0x238   :  { %601 = vmatprep.subr.mxu1 %v3760_v61 }
 0x239   :  { %602 = vmatpush1.msra.mxu1 %v3766_v62 }
 0x23a   :  { %819 = vmatprep.subr.mxu1 %v3675_v45 }
 0x2da   :  { %v325_v3 = vpop.f32.mrf.mxu1 }
 0x2db   :  { %v3824_v14 = vadd.f32 %v325_v3, %v248_v13 }
 0x2dc   :  { %v327_v6 = vpop.f32.mrf.mxu1 }
 0x2dd   :  { %v3816_v8 = vadd.f32 %v327_v6, %v252_v5 }
 0x2ea   :  { %v415_v7 = vpop.f32.mrf.mxu1 }
 0x2eb   :  { %v420_v15 = vadd.f32 %v415_v7, %v3824_v14 }
 0x2ec   :  { %v417_v9 = vpop.f32.mrf.mxu1 }
 0x2ed   :  { %v421_v10 = vadd.f32 %v417_v9, %v3816_v8  ;;  %v3066_v16 = vmul.f32 -1.442695, %v420_v15 }
 0x2ef   :  { %3253 = vtanh.f32 %v421_v10  ;;  %v3067_v29 = vmul.f32 -1.442695, %v421_v10 }
 0x2f0   :  { %3255 = vpow2.f32 %v3066_v16 }
 0x2fc   :  { %v3254_v11 = vpop.eup %3253 }
 0x2fd   :  { %437 = vrot.lane.b32.xlu1 %v3254_v11, %s3458_s22  ;;  %v3256_v17 = vpop.eup %3255 }
 0x2fe   :  { %v428_v18 = vadd.f32 1.0, %v3256_v17 }
 0x300   :  { %3257 = vrcp.f32 %v428_v18 }
 0x30d   :  { %v3258_v19 = vpop.eup %3257 }
 0x30e   :  { %v435_v24 = vmul.f32 0.0, %v3258_v19 }
 0x36f   :  { %v438_v20 = vpop.permute.xlu1 %437 }
 0x370   :  { %v440_v23 = vmul.f32 %v3258_v19, %v438_v20 }
 0x372   :  { %442 = vrot.lane.b32.xlu1 %v440_v23, %s3458_s22 }
 0x3e4   :  { %v443_v25 = vpop.permute.xlu1 %442 }
 0x3e5   :  { %v445_v26 = vadd.f32 %v443_v25, %v435_v24 }
 0x3e7   :  { %3259 = vtanh.f32 %v445_v26  ;;  %v548_v0 = vrot.slane %v445_v26, 7 }
 0x3e8   :  { %3261 = vpow2.f32 %v3067_v29 }
 0x3f4   :  { %v3260_v28 = vpop.eup %3259 }
 0x3f5   :  { %448 = vrot.lane.b32.xlu1 %v3260_v28, %s3458_s22  ;;  %v3262_v30 = vpop.eup %3261 }
 0x3f6   :  { %v429_v31 = vadd.f32 1.0, %v3262_v30 }
 0x3f8   :  { %3263 = vrcp.f32 %v429_v31 }
 0x405   :  { %v3264_v32 = vpop.eup %3263 }
 0x467   :  { %v449_v33 = vpop.permute.xlu1 %448 }
 0x468   :  { %v3829_v34 = vmul.f32 %v3264_v32, %v449_v33 }
 0x46a   :  { %3068 = vmatmul.mubr.msk.f32.vlgmr.msra.gmra.mxu0 %vm255_vm4, %v3829_v34 }
 0x46b   :  { %704 = vmatpush1.msra.mxu0 %v3681_v46  ;;  %751 = vmatprep.mubr.f32.mxu0 %v3455_v1 }
 0x46c   :  { %705 = vmatprep.subr.mxu0 %v3688_v47 }
 0x46d   :  { %706 = vmatpush1.msra.mxu0 %v3693_v48 }
 0x46e   :  { %707 = vmatprep.subr.mxu0 %v3699_v49 }
 0x46f   :  { %708 = vmatpush1.msra.mxu0 %v3705_v50 }
 0x470   :  { %709 = vmatprep.subr.mxu0 %v3711_v51 }
 0x471   :  { %710 = vmatpush1.msra.mxu0 %v3717_v52 }
 0x472   :  { %711 = vmatprep.subr.mxu0 %v3723_v53 }
 0x473   :  { %712 = vmatpush1.msra.mxu0 %v3729_v54 }
 0x474   :  { %713 = vmatprep.subr.mxu0 %v3735_v55 }
 0x475   :  { %714 = vmatpush1.msra.mxu0 %v3741_v56 }
 0x476   :  { %715 = vmatprep.subr.mxu0 %v3747_v58 }
 0x477   :  { %716 = vmatpush1.msra.mxu0 %v3754_v59 }
 0x478   :  { %717 = vmatprep.subr.mxu0 %v3760_v61 }
 0x479   :  { %718 = vmatpush1.msra.mxu0 %v3766_v62 }
 0x47a   :  { %935 = vmatprep.subr.mxu0 %v3675_v45 }
 0x52a   :  { %v521_v35 = vpop.f32.mrf.mxu0 }
 0x52b   :  { %v528_v40 = vrot.slane %v521_v35, 7 }
 0x52c   :  { %v523_v36 = vpop.f32.mrf.mxu0 }
 0x52d   :  { %v529_v37 = vrot.slane %v523_v36, 7  ;;  %v532_v41 = vadd.f32 %v528_v40, %v3824_v14 }
 0x52f   :  { %v533_v38 = vadd.f32 %v529_v37, %v3816_v8  ;;  %v3069_v42 = vmul.f32 -1.442695, %v532_v41 }
 0x531   :  { %3265 = vtanh.f32 %v533_v38  ;;  %v3070_v7 = vmul.f32 -1.442695, %v533_v38 }
 0x532   :  { %3267 = vpow2.f32 %v3069_v42 }
 0x53e   :  { %v3266_v39 = vpop.eup %3265 }
 0x53f   :  { %552 = vrot.lane.b32.xlu1 %v3266_v39, %s3458_s22  ;;  %v3268_v43 = vpop.eup %3267 }
 0x540   :  { %v540_v44 = vadd.f32 1.0, %v3268_v43 }
 0x542   :  { %3269 = vrcp.f32 %v540_v44 }
 0x54f   :  { %v3270_v57 = vpop.eup %3269 }
 0x550   :  { %v550_v3 = vmul.f32 %v3270_v57, %v548_v0 }
 0x5b1   :  { %v553_v60 = vpop.permute.xlu1 %552 }
 0x5b2   :  { %v555_v63 = vmul.f32 %v3270_v57, %v553_v60 }
 0x5b4   :  { %557 = vrot.lane.b32.xlu1 %v555_v63, %s3458_s22 }
 0x626   :  { %v558_v4 = vpop.permute.xlu1 %557 }
 0x627   :  { %v560_v5 = vadd.f32 %v558_v4, %v550_v3 }
 0x629   :  { %3271 = vtanh.f32 %v560_v5  ;;  %v664_v33 = vrot.slane %v560_v5, 7 }
 0x62a   :  { %3273 = vpow2.f32 %v3070_v7 }
 0x636   :  { %v3272_v6 = vpop.eup %3271 }
 0x637   :  { %563 = vrot.lane.b32.xlu1 %v3272_v6, %s3458_s22  ;;  %v3274_v9 = vpop.eup %3273 }
 0x638   :  { %v541_v10 = vadd.f32 1.0, %v3274_v9 }
 0x63a   :  { %3275 = vrcp.f32 %v541_v10 }
 0x647   :  { %v3276_v11 = vpop.eup %3275 }
 0x6a9   :  { %v564_v13 = vpop.permute.xlu1 %563 }
 0x6aa   :  { %v566_v15 = vmul.f32 %v3276_v11, %v564_v13 }
 0x6ac   :  { %v568_v16 = vrot.slane %v566_v15, 1  ;;  %v1264_v57 = vsel %vm1263_vm5, %v3829_v34, %v566_v15 }
 0x6ae   :  { %3071 = vmatmul.mubr.msk.f32.vlgmr.msra.gmra.mxu1 %vm255_vm4, %v568_v16 }
 0x6af   :  { %820 = vmatpush1.msra.mxu1 %v3681_v46  ;;  %867 = vmatprep.mubr.f32.mxu1 %v3455_v1 }
 0x6b0   :  { %821 = vmatprep.subr.mxu1 %v3688_v47 }
 0x6b1   :  { %822 = vmatpush1.msra.mxu1 %v3693_v48 }
 0x6b2   :  { %823 = vmatprep.subr.mxu1 %v3699_v49 }
 0x6b3   :  { %824 = vmatpush1.msra.mxu1 %v3705_v50 }
 0x6b4   :  { %825 = vmatprep.subr.mxu1 %v3711_v51 }
 0x6b5   :  { %826 = vmatpush1.msra.mxu1 %v3717_v52 }
 0x6b6   :  { %827 = vmatprep.subr.mxu1 %v3723_v53 }
 0x6b7   :  { %828 = vmatpush1.msra.mxu1 %v3729_v54 }
 0x6b8   :  { %829 = vmatprep.subr.mxu1 %v3735_v55 }
 0x6b9   :  { %830 = vmatpush1.msra.mxu1 %v3741_v56 }
 0x6ba   :  { %831 = vmatprep.subr.mxu1 %v3747_v58 }
 0x6bb   :  { %832 = vmatpush1.msra.mxu1 %v3754_v59 }
 0x6bc   :  { %833 = vmatprep.subr.mxu1 %v3760_v61 }
 0x6bd   :  { %834 = vmatpush1.msra.mxu1 %v3766_v62 }
 0x6be   :  { %1051 = vmatprep.subr.mxu1 %v3675_v45 }
 0x76e   :  { %v637_v17 = vpop.f32.mrf.mxu1 }
 0x76f   :  { %v644_v24 = vrot.slane %v637_v17, 6 }
 0x770   :  { %v639_v18 = vpop.f32.mrf.mxu1 }
 0x771   :  { %v645_v19 = vrot.slane %v639_v18, 6  ;;  %v648_v25 = vadd.f32 %v644_v24, %v3824_v14 }
 0x773   :  { %v649_v20 = vadd.f32 %v645_v19, %v3816_v8  ;;  %v3072_v26 = vmul.f32 -1.442695, %v648_v25 }
 0x775   :  { %3277 = vtanh.f32 %v649_v20  ;;  %v3073_v39 = vmul.f32 -1.442695, %v649_v20 }
 0x776   :  { %3279 = vpow2.f32 %v3072_v26 }
 0x782   :  { %v3278_v23 = vpop.eup %3277 }
 0x783   :  { %668 = vrot.lane.b32.xlu1 %v3278_v23, %s3458_s22  ;;  %v3280_v28 = vpop.eup %3279 }
 0x784   :  { %v656_v29 = vadd.f32 1.0, %v3280_v28 }
 0x786   :  { %3281 = vrcp.f32 %v656_v29 }
 0x793   :  { %v3282_v30 = vpop.eup %3281 }
 0x794   :  { %v666_v35 = vmul.f32 %v3282_v30, %v664_v33 }
 0x7f5   :  { %v669_v31 = vpop.permute.xlu1 %668 }
 0x7f6   :  { %v671_v32 = vmul.f32 %v3282_v30, %v669_v31 }
 0x7f8   :  { %673 = vrot.lane.b32.xlu0 %v671_v32, %s3458_s22 }
 0x86a   :  { %v674_v36 = vpop.permute.xlu0 %673 }
 0x86b   :  { %v676_v37 = vadd.f32 %v674_v36, %v666_v35 }
 0x86d   :  { %3283 = vtanh.f32 %v676_v37  ;;  %v780_v16 = vrot.slane %v676_v37, 7 }
 0x86e   :  { %3285 = vpow2.f32 %v3073_v39 }
 0x87a   :  { %v3284_v38 = vpop.eup %3283 }
 0x87b   :  { %679 = vrot.lane.b32.xlu1 %v3284_v38, %s3458_s22  ;;  %v3286_v40 = vpop.eup %3285 }
 0x87c   :  { %v657_v41 = vadd.f32 1.0, %v3286_v40 }
 0x87e   :  { %3287 = vrcp.f32 %v657_v41 }
 0x88b   :  { %v3288_v42 = vpop.eup %3287 }
 0x8ed   :  { %v680_v43 = vpop.permute.xlu1 %679 }
 0x8ee   :  { %v682_v44 = vmul.f32 %v3288_v42, %v680_v43 }
 0x8f0   :  { %v684_v60 = vrot.slane %v682_v44, 2  ;;  %v1266_v63 = vsel %vm1265_vm6, %v1264_v57, %v682_v44 }
 0x8f2   :  { %3074 = vmatmul.mubr.msk.f32.vlgmr.msra.gmra.mxu0 %vm255_vm4, %v684_v60 }
 0x8f3   :  { %936 = vmatpush1.msra.mxu0 %v3681_v46  ;;  %983 = vmatprep.mubr.f32.mxu0 %v3455_v1 }
 0x8f4   :  { %937 = vmatprep.subr.mxu0 %v3688_v47 }
 0x8f5   :  { %938 = vmatpush1.msra.mxu0 %v3693_v48 }
 0x8f6   :  { %939 = vmatprep.subr.mxu0 %v3699_v49 }
 0x8f7   :  { %940 = vmatpush1.msra.mxu0 %v3705_v50 }
 0x8f8   :  { %941 = vmatprep.subr.mxu0 %v3711_v51 }
 0x8f9   :  { %942 = vmatpush1.msra.mxu0 %v3717_v52 }
 0x8fa   :  { %943 = vmatprep.subr.mxu0 %v3723_v53 }
 0x8fb   :  { %944 = vmatpush1.msra.mxu0 %v3729_v54 }
 0x8fc   :  { %945 = vmatprep.subr.mxu0 %v3735_v55 }
 0x8fd   :  { %946 = vmatpush1.msra.mxu0 %v3741_v56 }
 0x8fe   :  { %947 = vmatprep.subr.mxu0 %v3747_v58 }
 0x8ff   :  { %948 = vmatpush1.msra.mxu0 %v3754_v59 }
 0x900   :  { %949 = vmatprep.subr.mxu0 %v3760_v61 }
 0x901   :  { %950 = vmatpush1.msra.mxu0 %v3766_v62 }
 0x902   :  { %1167 = vmatprep.subr.mxu0 %v3675_v45 }
 0x9b2   :  { %v753_v34 = vpop.f32.mrf.mxu0 }
 0x9b3   :  { %v760_v6 = vrot.slane %v753_v34, 5 }
 0x9b4   :  { %v755_v0 = vpop.f32.mrf.mxu0 }
 0x9b5   :  { %v761_v3 = vrot.slane %v755_v0, 5  ;;  %v764_v7 = vadd.f32 %v760_v6, %v3824_v14 }
 0x9b7   :  { %v765_v4 = vadd.f32 %v761_v3, %v3816_v8  ;;  %v3075_v9 = vmul.f32 -1.442695, %v764_v7 }
 0x9b9   :  { %3289 = vtanh.f32 %v765_v4  ;;  %v3076_v23 = vmul.f32 -1.442695, %v765_v4 }
 0x9ba   :  { %3291 = vpow2.f32 %v3075_v9 }
 0x9c6   :  { %v3290_v5 = vpop.eup %3289 }
 0x9c7   :  { %784 = vrot.lane.b32.xlu0 %v3290_v5, %s3458_s22  ;;  %v3292_v10 = vpop.eup %3291 }
 0x9c8   :  { %v772_v11 = vadd.f32 1.0, %v3292_v10 }
 0x9ca   :  { %3293 = vrcp.f32 %v772_v11 }
 0x9d7   :  { %v3294_v13 = vpop.eup %3293 }
 0x9d8   :  { %v782_v17 = vmul.f32 %v3294_v13, %v780_v16 }
 0xa39   :  { %v785_v15 = vpop.permute.xlu0 %784 }
 0xa3a   :  { %v787_v45 = vmul.f32 %v3294_v13, %v785_v15 }
 0xa3c   :  { %789 = vrot.lane.b32.xlu1 %v787_v45, %s3458_s22 }
 0xaae   :  { %v790_v18 = vpop.permute.xlu1 %789 }
 0xaaf   :  { %v792_v19 = vadd.f32 %v790_v18, %v782_v17 }
 0xab1   :  { %3295 = vtanh.f32 %v792_v19  ;;  %v896_v60 = vrot.slane %v792_v19, 7 }
 0xab2   :  { %3297 = vpow2.f32 %v3076_v23 }
 0xabe   :  { %v3296_v20 = vpop.eup %3295 }
 0xabf   :  { %795 = vrot.lane.b32.xlu0 %v3296_v20, %s3458_s22  ;;  %v3298_v24 = vpop.eup %3297 }
 0xac0   :  { %v773_v25 = vadd.f32 1.0, %v3298_v24 }
 0xac2   :  { %3299 = vrcp.f32 %v773_v25 }
 0xacf   :  { %v3300_v26 = vpop.eup %3299 }
 0xb31   :  { %v796_v28 = vpop.permute.xlu0 %795 }
 0xb32   :  { %v798_v29 = vmul.f32 %v3300_v26, %v796_v28 }
 0xb34   :  { %v800_v30 = vrot.slane %v798_v29, 3  ;;  %v1268_v31 = vsel %vm1267_vm7, %v1266_v63, %v798_v29 }
 0xb36   :  { %3077 = vmatmul.mubr.msk.f32.vlgmr.msra.gmra.mxu1 %vm255_vm4, %v800_v30 }
 0xb37   :  { %1052 = vmatpush1.msra.mxu1 %v3681_v46  ;;  %1099 = vmatprep.mubr.f32.mxu1 %v3455_v1 }
 0xb38   :  { %1053 = vmatprep.subr.mxu1 %v3688_v47 }
 0xb39   :  { %1054 = vmatpush1.msra.mxu1 %v3693_v48 }
 0xb3a   :  { %1055 = vmatprep.subr.mxu1 %v3699_v49 }
 0xb3b   :  { %1056 = vmatpush1.msra.mxu1 %v3705_v50 }
 0xb3c   :  { %1057 = vmatprep.subr.mxu1 %v3711_v51 }
 0xb3d   :  { %1058 = vmatpush1.msra.mxu1 %v3717_v52 }
 0xb3e   :  { %1059 = vmatprep.subr.mxu1 %v3723_v53 }
 0xb3f   :  { %1060 = vmatpush1.msra.mxu1 %v3729_v54 }
 0xb40   :  { %1061 = vmatprep.subr.mxu1 %v3735_v55 }
 0xb41   :  { %1062 = vmatpush1.msra.mxu1 %v3741_v56 }
 0xb42   :  { %1063 = vmatprep.subr.mxu1 %v3747_v58 }
 0xb43   :  { %1064 = vmatpush1.msra.mxu1 %v3754_v59 }
 0xb44   :  { %1065 = vmatprep.subr.mxu1 %v3760_v61 }
 0xb45   :  { %1066 = vmatpush1.msra.mxu1 %v3766_v62 }
 0xb46   :  { %3198 = vmatprep.subr.mxu1 %v3455_v1 }
 0xbf6   :  { %v869_v32 = vpop.f32.mrf.mxu1 }
 0xbf7   :  { %v876_v38 = vrot.slane %v869_v32, 4 }
 0xbf8   :  { %v871_v33 = vpop.f32.mrf.mxu1 }
 0xbf9   :  { %v877_v35 = vrot.slane %v871_v33, 4  ;;  %v880_v39 = vadd.f32 %v876_v38, %v3824_v14 }
 0xbfb   :  { %v881_v36 = vadd.f32 %v877_v35, %v3816_v8  ;;  %v3078_v40 = vmul.f32 -1.442695, %v880_v39 }
 0xbfd   :  { %3301 = vtanh.f32 %v881_v36  ;;  %v3079_v4 = vmul.f32 -1.442695, %v881_v36 }
 0xbfe   :  { %3303 = vpow2.f32 %v3078_v40 }
 0xc0a   :  { %v3302_v37 = vpop.eup %3301 }
 0xc0b   :  { %900 = vrot.lane.b32.xlu1 %v3302_v37, %s3458_s22  ;;  %v3304_v41 = vpop.eup %3303 }
 0xc0c   :  { %v888_v42 = vadd.f32 1.0, %v3304_v41 }
 0xc0e   :  { %3305 = vrcp.f32 %v888_v42 }
 0xc1b   :  { %v3306_v43 = vpop.eup %3305 }
 0xc1c   :  { %v898_v63 = vmul.f32 %v3306_v43, %v896_v60 }
 0xc7d   :  { %v901_v44 = vpop.permute.xlu1 %900 }
 0xc7e   :  { %v903_v57 = vmul.f32 %v3306_v43, %v901_v44 }
 0xc80   :  { %905 = vrot.lane.b32.xlu0 %v903_v57, %s3458_s22 }
 0xcf2   :  { %v906_v34 = vpop.permute.xlu0 %905 }
 0xcf3   :  { %v908_v0 = vadd.f32 %v906_v34, %v898_v63 }
 0xcf5   :  { %3307 = vtanh.f32 %v908_v0 }
 0xcf6   :  { %3309 = vpow2.f32 %v3079_v4 }
 0xd02   :  { %v3308_v3 = vpop.eup %3307 }
 0xd03   :  { %911 = vrot.lane.b32.xlu1 %v3308_v3, %s3458_s22  ;;  %v3310_v5 = vpop.eup %3309 }
 0xd04   :  { %v889_v6 = vadd.f32 1.0, %v3310_v5 }
 0xd06   :  { %3311 = vrcp.f32 %v889_v6 }
 0xd13   :  { %v3312_v7 = vpop.eup %3311 }
 0xd75   :  { %v912_v9 = vpop.permute.xlu1 %911 }
 0xd76   :  { %v914_v10 = vmul.f32 %v3312_v7, %v912_v9 }
 0xd78   :  { %v916_v11 = vrot.slane %v914_v10, 4  ;;  %v1270_v13 = vsel %vm1269_vm8, %v1268_v31, %v914_v10 }
 0xd7a   :  { %3080 = vmatmul.mubr.msk.f32.vlgmr.msra.gmra.mxu0 %vm255_vm4, %v916_v11 }
 0xd7b   :  { %1168 = vmatpush1.msra.mxu0 %v3681_v46  ;;  %1215 = vmatprep.mubr.f32.mxu0 %v3455_v1 }
 0xd7c   :  { %1169 = vmatprep.subr.mxu0 %v3688_v47 }
 0xd7d   :  { %1170 = vmatpush1.msra.mxu0 %v3693_v48 }
 0xd7e   :  { %1171 = vmatprep.subr.mxu0 %v3699_v49 }
 0xd7f   :  { %1172 = vmatpush1.msra.mxu0 %v3705_v50 }
 0xd80   :  { %1173 = vmatprep.subr.mxu0 %v3711_v51 }
 0xd81   :  { %1174 = vmatpush1.msra.mxu0 %v3717_v52 }
 0xd82   :  { %1175 = vmatprep.subr.mxu0 %v3723_v53 }
 0xd83   :  { %1176 = vmatpush1.msra.mxu0 %v3729_v54 }
 0xd84   :  { %1177 = vmatprep.subr.mxu0 %v3735_v55 }
 0xd85   :  { %1178 = vmatpush1.msra.mxu0 %v3741_v56 }
 0xd86   :  { %1179 = vmatprep.subr.mxu0 %v3747_v58 }
 0xd87   :  { %1180 = vmatpush1.msra.mxu0 %v3754_v59 }
 0xd88   :  { %1181 = vmatprep.subr.mxu0 %v3760_v61  ;;  %v1012_v61 = vrot.slane %v908_v0, 7 }
 0xd89   :  { %1182 = vmatpush1.msra.mxu0 %v3766_v62 }
 0xd8a   :  { %3193 = vmatprep.subr.mxu0 %v3455_v1 }
 0xe3a   :  { %v985_v46 = vpop.f32.mrf.mxu0 }
 0xe3b   :  { %v992_v51 = vrot.slane %v985_v46, 3 }
 0xe3c   :  { %v987_v47 = vpop.f32.mrf.mxu0 }
 0xe3d   :  { %v993_v48 = vrot.slane %v987_v47, 3  ;;  %v996_v52 = vadd.f32 %v992_v51, %v3824_v14 }
 0xe3f   :  { %v997_v49 = vadd.f32 %v993_v48, %v3816_v8  ;;  %v3081_v53 = vmul.f32 -1.442695, %v996_v52 }
 0xe41   :  { %3313 = vtanh.f32 %v997_v49  ;;  %v3082_v17 = vmul.f32 -1.442695, %v997_v49 }
 0xe42   :  { %3315 = vpow2.f32 %v3081_v53 }
 0xe4e   :  { %v3314_v50 = vpop.eup %3313 }
 0xe4f   :  { %1016 = vrot.lane.b32.xlu0 %v3314_v50, %s3458_s22  ;;  %v3316_v54 = vpop.eup %3315 }
 0xe50   :  { %v1004_v55 = vadd.f32 1.0, %v3316_v54 }
 0xe52   :  { %3317 = vrcp.f32 %v1004_v55 }
 0xe5f   :  { %v3318_v56 = vpop.eup %3317 }
 0xe60   :  { %v1014_v62 = vmul.f32 %v3318_v56, %v1012_v61 }
 0xec1   :  { %v1017_v58 = vpop.permute.xlu0 %1016 }
 0xec2   :  { %v1019_v59 = vmul.f32 %v3318_v56, %v1017_v58 }
 0xec4   :  { %1021 = vrot.lane.b32.xlu1 %v1019_v59, %s3458_s22 }
 0xf36   :  { %v1022_v15 = vpop.permute.xlu1 %1021 }
 0xf37   :  { %v1024_v45 = vadd.f32 %v1022_v15, %v1014_v62 }
 0xf39   :  { %3319 = vtanh.f32 %v1024_v45  ;;  %v1128_v42 = vrot.slane %v1024_v45, 7 }
 0xf3a   :  { %3321 = vpow2.f32 %v3082_v17 }
 0xf46   :  { %v3320_v16 = vpop.eup %3319 }
 0xf47   :  { %1027 = vrot.lane.b32.xlu0 %v3320_v16, %s3458_s22  ;;  %v3322_v18 = vpop.eup %3321 }
 0xf48   :  { %v1005_v19 = vadd.f32 1.0, %v3322_v18 }
 0xf4a   :  { %3323 = vrcp.f32 %v1005_v19 }
 0xf57   :  { %v3324_v20 = vpop.eup %3323 }
 0xfb9   :  { %v1028_v23 = vpop.permute.xlu0 %1027 }
 0xfba   :  { %v1030_v24 = vmul.f32 %v3324_v20, %v1028_v23 }
 0xfbc   :  { %v1032_v25 = vrot.slane %v1030_v24, 5  ;;  %v1272_v26 = vsel %vm1271_vm9, %v1270_v13, %v1030_v24 }
 0xfbe   :  { %3083 = vmatmul.mubr.msk.f32.vlgmr.msra.gmra.mxu1 %vm255_vm4, %v1032_v25  ;;  %v1462_v25 = vld [vmem:[%s4583_s5 + $0xf8] sm:$0xff] }
 0xfbf   :  { %3200 = vmatprep.mubr.msk.f32.mxu1 %vm3456_vm0, %v3455_v1 }
0x107e   :  { %v1101_v28 = vpop.f32.mrf.mxu1 }
0x107f   :  { %v1108_v33 = vrot.slane %v1101_v28, 2  ;;  %v1460_v28 = vld [vmem:[%s4583_s5 + $0xe8] sm:$0xff] }
0x1080   :  { %v1103_v29 = vpop.f32.mrf.mxu1 }
0x1081   :  { %v1109_v30 = vrot.slane %v1103_v29, 2  ;;  %v1112_v35 = vadd.f32 %v1108_v33, %v3824_v14  ;;  %v1459_v29 = vld [vmem:[%s4583_s5 + $0xe0] sm:$0xff] }
0x1082   :  { %v1455_v33 = vld [vmem:[%s4583_s5 + $0xc0] sm:$0xff] }
0x1083   :  { %v1113_v31 = vadd.f32 %v1109_v30, %v3816_v8  ;;  %v3084_v36 = vmul.f32 -1.442695, %v1112_v35  ;;  %v1458_v30 = vld [vmem:[%s4583_s5 + $0xd8] sm:$0xff] }
0x1084   :  { %v4010_v35 = vld [vmem:[%s4584_s6 + $0x78] sm:$0xff] }
0x1085   :  { %3325 = vtanh.f32 %v1113_v31  ;;  %v3085_v63 = vmul.f32 -1.442695, %v1113_v31  ;;  %v1457_v31 = vld [vmem:[%s4583_s5 + $0xd0] sm:$0xff] }
0x1086   :  { %3327 = vpow2.f32 %v3084_v36  ;;  %v1454_v36 = vld [vmem:[%s4583_s5 + $0xb8] sm:$0xff] }
0x1092   :  { %v3326_v32 = vpop.eup %3325 }
0x1093   :  { %1132 = vrot.lane.b32.xlu1 %v3326_v32, %s3458_s22  ;;  %v3328_v37 = vpop.eup %3327  ;;  %v1456_v32 = vld [vmem:[%s4583_s5 + $0xc8] sm:$0xff] }
0x1094   :  { %v1120_v38 = vadd.f32 1.0, %v3328_v37  ;;  %v4019_v37 = vld [vmem:[%s4584_s6 + $0x70] sm:$0xff] }
0x1096   :  { %3329 = vrcp.f32 %v1120_v38  ;;  %v1453_v38 = vld [vmem:[%s4583_s5 + $0xb0] sm:$0xff] }
0x10a3   :  { %v3330_v39 = vpop.eup %3329 }
0x10a4   :  { %v1130_v43 = vmul.f32 %v3330_v39, %v1128_v42  ;;  %v4042_v42 = vld [vmem:[%s4584_s6 + $0x58] sm:$0xff] }
0x1105   :  { %v1133_v40 = vpop.permute.xlu1 %1132 }
0x1106   :  { %v1135_v41 = vmul.f32 %v3330_v39, %v1133_v40  ;;  %v4028_v39 = vld [vmem:[%s4584_s6 + $0x68] sm:$0xff]  ;;  %v4033_v40 = vld [vmem:[%s4584_s6 + $0x60] sm:$0xff] }
0x1108   :  { %1137 = vrot.lane.b32.xlu0 %v1135_v41, %s3458_s22  ;;  %v1452_v41 = vld [vmem:[%s4583_s5 + $0xa8] sm:$0xff] }
0x117a   :  { %v1138_v44 = vpop.permute.xlu0 %1137 }
0x117b   :  { %v1140_v57 = vadd.f32 %v1138_v44, %v1130_v43  ;;  %v1451_v43 = vld [vmem:[%s4583_s5 + $0xa0] sm:$0xff]  ;;  %v4051_v44 = vld [vmem:[%s4584_s6 + $0x50] sm:$0xff] }
0x117d   :  { %3331 = vtanh.f32 %v1140_v57  ;;  %v1244_v55 = vrot.slane %v1140_v57, 7  ;;  %v4056_v57 = vld [vmem:[%s4584_s6 + $0x48] sm:$0xff] }
0x117e   :  { %3333 = vpow2.f32 %v3085_v63  ;;  %v4065_v63 = vld [vmem:[%s4584_s6 + $0x40] sm:$0xff] }
0x118a   :  { %v3332_v60 = vpop.eup %3331 }
0x118b   :  { %1143 = vrot.lane.b32.xlu1 %v3332_v60, %s3458_s22  ;;  %v3334_v34 = vpop.eup %3333  ;;  %v1450_v60 = vld [vmem:[%s4583_s5 + $0x98] sm:$0xff] }
0x118c   :  { %v1121_v0 = vadd.f32 1.0, %v3334_v34  ;;  %v1449_v34 = vld [vmem:[%s4583_s5 + $0x90] sm:$0xff] }
0x118e   :  { %3335 = vrcp.f32 %v1121_v0  ;;  %v4074_v0 = vld [vmem:[%s4584_s6 + $0x38] sm:$0xff] }
0x119b   :  { %v3336_v3 = vpop.eup %3335 }
0x11fd   :  { %v1144_v4 = vpop.permute.xlu1 %1143 }
0x11fe   :  { %v1146_v5 = vmul.f32 %v3336_v3, %v1144_v4  ;;  %v1448_v3 = vld [vmem:[%s4583_s5 + $0x88] sm:$0xff]  ;;  %v4083_v4 = vld [vmem:[%s4584_s6 + $0x30] sm:$0xff] }
0x1200   :  { %v1148_v6 = vrot.slane %v1146_v5, 6  ;;  %v1274_v7 = vsel %vm1273_vm10, %v1272_v26, %v1146_v5  ;;  %v1461_v26 = vld [vmem:[%s4583_s5 + $0xf0] sm:$0xff]  ;;  %v1447_v5 = vld [vmem:[%s4583_s5 + $0x80] sm:$0xff] }
0x1202   :  { %3086 = vmatmul.mubr.msk.f32.vlgmr.msra.gmra.mxu0 %vm255_vm4, %v1148_v6  ;;  %v4092_v6 = vld [vmem:[%s4584_s6 + $0x28] sm:$0xff] }
0x1203   :  { %3195 = vmatprep.mubr.msk.f32.mxu0 %vm3456_vm0, %v3455_v1 }
0x12c2   :  { %v1217_v9 = vpop.f32.mrf.mxu0 }
0x12c3   :  { %v1224_v47 = vrot.slane %v1217_v9, 1  ;;  %v4101_v9 = vld [vmem:[%s4584_s6 + $0x20] sm:$0xff] }
0x12c4   :  { %v1219_v10 = vpop.f32.mrf.mxu0 }
0x12c5   :  { %v1225_v11 = vrot.slane %v1219_v10, 1  ;;  %v1228_v48 = vadd.f32 %v1224_v47, %v3824_v14  ;;  %v1445_v10 = vld [vmem:[%s4583_s5 + $0x70] sm:$0xff]  ;;  %v1443_v47 = vld [vmem:[%s4583_s5 + $0x60] sm:$0xff] }
0x12c7   :  { %v1229_v13 = vadd.f32 %v1225_v11, %v3816_v8  ;;  %v3087_v49 = vmul.f32 -1.442695, %v1228_v48  ;;  %v4110_v11 = vld [vmem:[%s4584_s6 + $0x18] sm:$0xff]  ;;  %v4128_v48 = vld [vmem:[%s4584_s6 + $0x8] sm:$0xff] }
0x12c9   :  { %3337 = vtanh.f32 %v1229_v13  ;;  %v3088_v61 = vmul.f32 -1.442695, %v1229_v13  ;;  %v1444_v13 = vld [vmem:[%s4583_s5 + $0x68] sm:$0xff] }
0x12ca   :  { %3339 = vpow2.f32 %v3087_v49  ;;  %v1442_v49 = vld [vmem:[%s4583_s5 + $0x58] sm:$0xff] }
0x12d6   :  { %v3338_v46 = vpop.eup %3337 }
0x12d7   :  { %1248 = vrot.lane.b32.xlu0 %v3338_v46, %s3458_s22  ;;  %v3340_v50 = vpop.eup %3339  ;;  %v4119_v46 = vld [vmem:[%s4584_s6 + $0x10] sm:$0xff] }
0x12d8   :  { %v1236_v51 = vadd.f32 1.0, %v3340_v50  ;;  %v1441_v50 = vld [vmem:[%s4583_s5 + $0x50] sm:$0xff] }
0x12da   :  { %3341 = vrcp.f32 %v1236_v51  ;;  %v1440_v51 = vld [vmem:[%s4583_s5 + $0x48] sm:$0xff] }
0x12e7   :  { %v3342_v52 = vpop.eup %3341 }
0x12e8   :  { %v1246_v56 = vmul.f32 %v3342_v52, %v1244_v55  ;;  %v1436_v55 = vld [vmem:[%s4583_s5 + $0x28] sm:$0xff] }
0x1349   :  { %v1249_v53 = vpop.permute.xlu0 %1248 }
0x134a   :  { %v1251_v54 = vmul.f32 %v3342_v52, %v1249_v53  ;;  %v1439_v52 = vld [vmem:[%s4583_s5 + $0x40] sm:$0xff]  ;;  %v1438_v53 = vld [vmem:[%s4583_s5 + $0x38] sm:$0xff] }
0x134c   :  { %1253 = vrot.lane.b32.xlu1 %v1251_v54, %s3458_s22  ;;  %v1437_v54 = vld [vmem:[%s4583_s5 + $0x30] sm:$0xff] }
0x13be   :  { %v1254_v8 = vpop.permute.xlu1 %1253 }
0x13bf   :  { %v1256_v58 = vadd.f32 %v1254_v8, %v1246_v56  ;;  %v1435_v56 = vld [vmem:[%s4583_s5 + $0x20] sm:$0xff]  ;;  %v1434_v8 = vld [vmem:[%s4583_s5 + $0x18] sm:$0xff] }
0x13c1   :  { %3343 = vtanh.f32 %v1256_v58  ;;  %v1433_v58 = vld [vmem:[%s4583_s5 + $0x10] sm:$0xff] }
0x13c2   :  { %3345 = vpow2.f32 %v3088_v61  ;;  %v1431_v61 = vld [vmem:[%s4583_s5] sm:$0xff] }
0x13ce   :  { %v3344_v59 = vpop.eup %3343 }
0x13cf   :  { %1259 = vrot.lane.b32.xlu0 %v3344_v59, %s3458_s22  ;;  %v3346_v14 = vpop.eup %3345  ;;  %v1432_v59 = vld [vmem:[%s4583_s5 + $0x8] sm:$0xff] }
0x13d0   :  { %v1237_v62 = vadd.f32 1.0, %v3346_v14  ;;  %v4172_v14 = vld [vmem:[%s4584_s6] sm:$0xff] }
0x13d2   :  { %3347 = vrcp.f32 %v1237_v62 }
0x13df   :  { %v3348_v15 = vpop.eup %3347 }
0x1441   :  { %v1260_v45 = vpop.permute.xlu0 %1259 }
0x1442   :  { %v1262_v16 = vmul.f32 %v3348_v15, %v1260_v45 }
0x1444   :  { %v1276_v17 = vsel %vm1275_vm11, %v1274_v7, %v1262_v16  ;;  %v1446_v7 = vld [vmem:[%s4583_s5 + $0x78] sm:$0xff] }
0x1445   :  { %1278 = vrot.lane.b32.xlu1 %v1276_v17, %s3459_s4 }
0x14b7   :  { %v1279_v18 = vpop.permute.xlu1 %1278 }
0x14b8   :  { %3194 = vmatpush3.msra.mxu0 %v1279_v18 }
0x14b9   :  { %3196 = vmatmul.mubr.msk.f32.vlgmr.msra.gmra.mxu0 %vm147_vm2, %v3618_v27  ;;  %1578 = vmatprep.subr.mxu0 %v4010_v35 }
0x14ba   :  { %1626 = vmatprep.mubr.f32.mxu0 %v3455_v1  ;;  %1579 = vmatpush1.msra.mxu0 %v4019_v37 }
0x14bb   :  { %1580 = vmatprep.subr.mxu0 %v4028_v39 }
0x14bc   :  { %1581 = vmatpush1.msra.mxu0 %v4033_v40 }
0x14bd   :  { %1582 = vmatprep.subr.mxu0 %v4042_v42 }
0x14be   :  { %1583 = vmatpush1.msra.mxu0 %v4051_v44 }
0x14bf   :  { %1584 = vmatprep.subr.mxu0 %v4056_v57 }
0x14c0   :  { %1585 = vmatpush1.msra.mxu0 %v4065_v63 }
0x14c1   :  { %1586 = vmatprep.subr.mxu0 %v4074_v0 }
0x14c2   :  { %1587 = vmatpush1.msra.mxu0 %v4083_v4 }
0x14c3   :  { %1588 = vmatprep.subr.mxu0 %v4092_v6 }
0x14c4   :  { %1589 = vmatpush1.msra.mxu0 %v4101_v9 }
0x14c5   :  { %1590 = vmatprep.subr.mxu0 %v4110_v11 }
0x14c6   :  { %1591 = vmatpush1.msra.mxu0 %v4119_v46 }
0x14c7   :  { %1592 = vmatprep.subr.mxu0 %v4128_v48 }
0x14c8   :  { %1593 = vmatpush1.msra.mxu0 %v4172_v14 }
0x14c9   :  { %1627 = vmatmul.mubr.f32.vlgmr.msra.gmra.mxu0 %v3455_v1  ;;  %1684 = vmatprep.subr.mxu0 %v4010_v35 }
0x14ca   :  { %1685 = vmatpush1.msra.mxu0 %v4019_v37  ;;  %1732 = vmatprep.mubr.f32.mxu0 %v3455_v1 }
0x14cb   :  { %1686 = vmatprep.subr.mxu0 %v4028_v39 }
0x14cc   :  { %1687 = vmatpush1.msra.mxu0 %v4033_v40 }
0x14cd   :  { %1688 = vmatprep.subr.mxu0 %v4042_v42 }
0x14ce   :  { %1689 = vmatpush1.msra.mxu0 %v4051_v44 }
0x14cf   :  { %1690 = vmatprep.subr.mxu0 %v4056_v57 }
0x14d0   :  { %1691 = vmatpush1.msra.mxu0 %v4065_v63 }
0x14d1   :  { %1692 = vmatprep.subr.mxu0 %v4074_v0 }
0x14d2   :  { %1693 = vmatpush1.msra.mxu0 %v4083_v4 }
0x14d3   :  { %1694 = vmatprep.subr.mxu0 %v4092_v6 }
0x14d4   :  { %1695 = vmatpush1.msra.mxu0 %v4101_v9 }
0x14d5   :  { %1696 = vmatprep.subr.mxu0 %v4110_v11 }
0x14d6   :  { %1697 = vmatpush1.msra.mxu0 %v4119_v46 }
0x14d7   :  { %1698 = vmatprep.subr.mxu0 %v4128_v48 }
0x14d8   :  { %1699 = vmatpush1.msra.mxu0 %v4172_v14 }
0x14d9   :  { %1916 = vmatprep.subr.mxu0 %v4010_v35 }
0x1579   :  { %v1347_v19 = vpop.f32.mrf.mxu0 }
0x157a   :  { %1352 = vrot.lane.b32.xlu0 %v1347_v19, %s3457_s30 }
0x157b   :  { %v3197_v20 = vpop.f32.mrf.mxu0 }
0x1589   :  { %v1628_v20 = vpop.f32.mrf.mxu0 }
0x15ec   :  { %v1353_v23 = vpop.permute.xlu0 %1352 }
0x15ed   :  { %v3977_v24 = vsel %vm225_vm3, %v1276_v17, %v1353_v23  ;;  %v1463_v17 = vld [vmem:[%s4585_s7] sm:$0x3] }
0x15ee   :  { %3199 = vmatpush3.msra.mxu1 %v3977_v24  ;;  %v1472_v18 = vrot.slane %v1463_v17, %v3810_v2 }
0x15ef   :  { %3201 = vmatmul.mubr.msk.f32.vlgmr.msra.gmra.mxu1 %vm147_vm2, %v3618_v27  ;;  %1475 = vmatprep.subr.mxu1 %v1462_v25  ;;  %v1630_v25 = vpop.f32.mrf.mxu0 }
0x15f0   :  { %1539 = vmatprep.mubr.f32.mxu1 %v3455_v1  ;;  %1476 = vmatpush1.msra.mxu1 %v1461_v26 }
0x15f1   :  { %1477 = vmatprep.subr.mxu1 %v1460_v28 }
0x15f2   :  { %1478 = vmatpush1.msra.mxu1 %v1459_v29  ;;  %v1468_v29 = vrot.slane %v1463_v17, %v3821_v12 }
0x15f3   :  { %1479 = vmatprep.subr.mxu1 %v1458_v30 }
0x15f4   :  { %1480 = vmatpush1.msra.mxu1 %v1457_v31 }
0x15f5   :  { %1481 = vmatprep.subr.mxu1 %v1456_v32 }
0x15f6   :  { %1482 = vmatpush1.msra.mxu1 %v1455_v33 }
0x15f7   :  { %1483 = vmatprep.subr.mxu1 %v1454_v36 }
0x15f8   :  { %1484 = vmatpush1.msra.mxu1 %v1453_v38 }
0x15f9   :  { %1485 = vmatprep.subr.mxu1 %v1452_v41 }
0x15fa   :  { %1486 = vmatpush1.msra.mxu1 %v1451_v43 }
0x15fb   :  { %1487 = vmatprep.subr.mxu1 %v1450_v60 }
0x15fc   :  { %1488 = vmatpush1.msra.mxu1 %v1449_v34 }
0x15fd   :  { %1489 = vmatprep.subr.mxu1 %v1448_v3 }
0x15fe   :  { %1490 = vmatpush1.msra.mxu1 %v1447_v5 }
0x15ff   :  { %1491 = vmatprep.subr.mxu1 %v1446_v7 }
0x1600   :  { %1492 = vmatpush1.msra.mxu1 %v1445_v10 }
0x1601   :  { %1493 = vmatprep.subr.mxu1 %v1444_v13 }
0x1602   :  { %1494 = vmatpush1.msra.mxu1 %v1443_v47 }
0x1603   :  { %1495 = vmatprep.subr.mxu1 %v1442_v49 }
0x1604   :  { %1496 = vmatpush1.msra.mxu1 %v1441_v50 }
0x1605   :  { %1497 = vmatprep.subr.mxu1 %v1440_v51 }
0x1606   :  { %1498 = vmatpush1.msra.mxu1 %v1439_v52 }
0x1607   :  { %1499 = vmatprep.subr.mxu1 %v1438_v53 }
0x1608   :  { %1500 = vmatpush1.msra.mxu1 %v1437_v54 }
0x1609   :  { %1501 = vmatprep.subr.mxu1 %v1436_v55 }
0x160a   :  { %1502 = vmatpush1.msra.mxu1 %v1435_v56 }
0x160b   :  { %1503 = vmatprep.subr.mxu1 %v1434_v8 }
0x160c   :  { %1504 = vmatpush1.msra.mxu1 %v1433_v58 }
0x160d   :  { %1505 = vmatprep.subr.mxu1 %v1432_v59 }
0x160e   :  { %1506 = vmatpush1.msra.mxu1 %v1431_v61 }
0x160f   :  { %1800 = vmatprep.subr.mxu1 %v4010_v35 }
0x16af   :  { %v1422_v62 = vpop.f32.mrf.mxu1 }
0x16b0   :  { %1427 = vrot.lane.b32.xlu1 %v1422_v62, %s3458_s22 }
0x16b1   :  { %v3202_v15 = vpop.f32.mrf.mxu1 }
0x1722   :  { %v1428_v45 = vpop.permute.xlu1 %1427 }
0x1723   :  { %v1430_v16 = vsel %vm255_vm4, %v3977_v24, %v1428_v45 }
0x1724   :  { %1540 = vmatmul.mubr.f32.vlgmr.msra.gmra.mxu1 %v1430_v16 }
0x1725   :  { %1801 = vmatpush1.msra.mxu1 %v4019_v37  ;;  %1848 = vmatprep.mubr.f32.mxu1 %v3455_v1 }
0x1726   :  { %1802 = vmatprep.subr.mxu1 %v4028_v39 }
0x1727   :  { %1803 = vmatpush1.msra.mxu1 %v4033_v40 }
0x1728   :  { %1804 = vmatprep.subr.mxu1 %v4042_v42 }
0x1729   :  { %1805 = vmatpush1.msra.mxu1 %v4051_v44 }
0x172a   :  { %1806 = vmatprep.subr.mxu1 %v4056_v57 }
0x172b   :  { %1807 = vmatpush1.msra.mxu1 %v4065_v63 }
0x172c   :  { %1808 = vmatprep.subr.mxu1 %v4074_v0 }
0x172d   :  { %1809 = vmatpush1.msra.mxu1 %v4083_v4 }
0x172e   :  { %1810 = vmatprep.subr.mxu1 %v4092_v6 }
0x172f   :  { %1811 = vmatpush1.msra.mxu1 %v4101_v9 }
0x1730   :  { %1812 = vmatprep.subr.mxu1 %v4110_v11 }
0x1731   :  { %1813 = vmatpush1.msra.mxu1 %v4119_v46 }
0x1732   :  { %1814 = vmatprep.subr.mxu1 %v4128_v48 }
0x1733   :  { %1815 = vmatpush1.msra.mxu1 %v4172_v14 }
0x1734   :  { %2032 = vmatprep.subr.mxu1 %v4010_v35 }
0x17e4   :  { %v1541_v19 = vpop.f32.mrf.mxu1 }
0x17e5   :  { %v4224_v30 = vadd.f32 %v1541_v19, %v1468_v29 }
0x17e6   :  { %v1543_v23 = vpop.f32.mrf.mxu1 }
0x17e7   :  { %v4219_v24 = vadd.f32 %v1543_v23, %v1472_v18  ;;  %v1633_v31 = vadd.f32 %v1628_v20, %v4224_v30 }
0x17e9   :  { %v1634_v26 = vadd.f32 %v1630_v25, %v4219_v24  ;;  %v3091_v32 = vmul.f32 -1.442695, %v1633_v31 }
0x17eb   :  { %3349 = vtanh.f32 %v1634_v26  ;;  %v3092_v7 = vmul.f32 -1.442695, %v1634_v26 }
0x17ec   :  { %3351 = vpow2.f32 %v3091_v32 }
0x17f8   :  { %v3350_v28 = vpop.eup %3349 }
0x17f9   :  { %1650 = vrot.lane.b32.xlu0 %v3350_v28, %s3458_s22  ;;  %v3352_v33 = vpop.eup %3351 }
0x17fa   :  { %v1641_v36 = vadd.f32 1.0, %v3352_v33 }
0x17fc   :  { %3353 = vrcp.f32 %v1641_v36 }
0x1809   :  { %v3354_v38 = vpop.eup %3353 }
0x180a   :  { %v1648_v60 = vmul.f32 0.0, %v3354_v38 }
0x186b   :  { %v1651_v41 = vpop.permute.xlu0 %1650 }
0x186c   :  { %v1653_v43 = vmul.f32 %v3354_v38, %v1651_v41 }
0x186e   :  { %1655 = vrot.lane.b32.xlu1 %v1653_v43, %s3458_s22 }
0x18e0   :  { %v1656_v34 = vpop.permute.xlu1 %1655 }
0x18e1   :  { %v1658_v3 = vadd.f32 %v1656_v34, %v1648_v60 }
0x18e3   :  { %3355 = vtanh.f32 %v1658_v3  ;;  %v1761_v16 = vrot.slane %v1658_v3, 7 }
0x18e4   :  { %3357 = vpow2.f32 %v3092_v7 }
0x18f0   :  { %v3356_v5 = vpop.eup %3355 }
0x18f1   :  { %1661 = vrot.lane.b32.xlu0 %v3356_v5, %s3458_s22  ;;  %v3358_v10 = vpop.eup %3357 }
0x18f2   :  { %v1642_v13 = vadd.f32 1.0, %v3358_v10 }
0x18f4   :  { %3359 = vrcp.f32 %v1642_v13 }
0x1901   :  { %v3360_v47 = vpop.eup %3359 }
0x1963   :  { %v1662_v49 = vpop.permute.xlu0 %1661 }
0x1964   :  { %v4229_v50 = vmul.f32 %v3360_v47, %v1662_v49 }
0x1966   :  { %3093 = vmatmul.mubr.msk.f32.vlgmr.msra.gmra.mxu0 %vm255_vm4, %v4229_v50 }
0x1967   :  { %1917 = vmatpush1.msra.mxu0 %v4019_v37  ;;  %1964 = vmatprep.mubr.f32.mxu0 %v3455_v1 }
0x1968   :  { %1918 = vmatprep.subr.mxu0 %v4028_v39 }
0x1969   :  { %1919 = vmatpush1.msra.mxu0 %v4033_v40 }
0x196a   :  { %1920 = vmatprep.subr.mxu0 %v4042_v42 }
0x196b   :  { %1921 = vmatpush1.msra.mxu0 %v4051_v44 }
0x196c   :  { %1922 = vmatprep.subr.mxu0 %v4056_v57 }
0x196d   :  { %1923 = vmatpush1.msra.mxu0 %v4065_v63 }
0x196e   :  { %1924 = vmatprep.subr.mxu0 %v4074_v0 }
0x196f   :  { %1925 = vmatpush1.msra.mxu0 %v4083_v4 }
0x1970   :  { %1926 = vmatprep.subr.mxu0 %v4092_v6 }
0x1971   :  { %1927 = vmatpush1.msra.mxu0 %v4101_v9 }
0x1972   :  { %1928 = vmatprep.subr.mxu0 %v4110_v11 }
0x1973   :  { %1929 = vmatpush1.msra.mxu0 %v4119_v46 }
0x1974   :  { %1930 = vmatprep.subr.mxu0 %v4128_v48 }
0x1975   :  { %1931 = vmatpush1.msra.mxu0 %v4172_v14 }
0x1976   :  { %2148 = vmatprep.subr.mxu0 %v4010_v35 }
0x1a26   :  { %v1734_v51 = vpop.f32.mrf.mxu0 }
0x1a27   :  { %v1741_v56 = vrot.slane %v1734_v51, 7 }
0x1a28   :  { %v1736_v52 = vpop.f32.mrf.mxu0 }
0x1a29   :  { %v1742_v53 = vrot.slane %v1736_v52, 7  ;;  %v1745_v8 = vadd.f32 %v1741_v56, %v4224_v30 }
0x1a2b   :  { %v1746_v54 = vadd.f32 %v1742_v53, %v4219_v24  ;;  %v3094_v58 = vmul.f32 -1.442695, %v1745_v8 }
0x1a2d   :  { %3361 = vtanh.f32 %v1746_v54  ;;  %v3095_v23 = vmul.f32 -1.442695, %v1746_v54 }
0x1a2e   :  { %3363 = vpow2.f32 %v3094_v58 }
0x1a3a   :  { %v3362_v55 = vpop.eup %3361 }
0x1a3b   :  { %1765 = vrot.lane.b32.xlu1 %v3362_v55, %s3458_s22  ;;  %v3364_v59 = vpop.eup %3363 }
0x1a3c   :  { %v1753_v61 = vadd.f32 1.0, %v3364_v59 }
0x1a3e   :  { %3365 = vrcp.f32 %v1753_v61 }
0x1a4b   :  { %v3366_v62 = vpop.eup %3365 }
0x1a4c   :  { %v1763_v17 = vmul.f32 %v3366_v62, %v1761_v16 }
0x1aad   :  { %v1766_v15 = vpop.permute.xlu1 %1765 }
0x1aae   :  { %v1768_v45 = vmul.f32 %v3366_v62, %v1766_v15 }
0x1ab0   :  { %1770 = vrot.lane.b32.xlu0 %v1768_v45, %s3458_s22 }
0x1b22   :  { %v1771_v18 = vpop.permute.xlu0 %1770 }
0x1b23   :  { %v1773_v19 = vadd.f32 %v1771_v18, %v1763_v17 }
0x1b25   :  { %3367 = vtanh.f32 %v1773_v19  ;;  %v1877_v49 = vrot.slane %v1773_v19, 7 }
0x1b26   :  { %3369 = vpow2.f32 %v3095_v23 }
0x1b32   :  { %v3368_v20 = vpop.eup %3367 }
0x1b33   :  { %1776 = vrot.lane.b32.xlu1 %v3368_v20, %s3458_s22  ;;  %v3370_v25 = vpop.eup %3369 }
0x1b34   :  { %v1754_v26 = vadd.f32 1.0, %v3370_v25 }
0x1b36   :  { %3371 = vrcp.f32 %v1754_v26 }
0x1b43   :  { %v3372_v28 = vpop.eup %3371 }
0x1ba5   :  { %v1777_v29 = vpop.permute.xlu1 %1776 }
0x1ba6   :  { %v1779_v31 = vmul.f32 %v3372_v28, %v1777_v29 }
0x1ba8   :  { %v1781_v32 = vrot.slane %v1779_v31, 1  ;;  %v2476_v62 = vsel %vm1263_vm5, %v4229_v50, %v1779_v31 }
0x1baa   :  { %3096 = vmatmul.mubr.msk.f32.vlgmr.msra.gmra.mxu1 %vm255_vm4, %v1781_v32 }
0x1bab   :  { %2033 = vmatpush1.msra.mxu1 %v4019_v37  ;;  %2080 = vmatprep.mubr.f32.mxu1 %v3455_v1 }
0x1bac   :  { %2034 = vmatprep.subr.mxu1 %v4028_v39 }
0x1bad   :  { %2035 = vmatpush1.msra.mxu1 %v4033_v40 }
0x1bae   :  { %2036 = vmatprep.subr.mxu1 %v4042_v42 }
0x1baf   :  { %2037 = vmatpush1.msra.mxu1 %v4051_v44 }
0x1bb0   :  { %2038 = vmatprep.subr.mxu1 %v4056_v57 }
0x1bb1   :  { %2039 = vmatpush1.msra.mxu1 %v4065_v63 }
0x1bb2   :  { %2040 = vmatprep.subr.mxu1 %v4074_v0 }
0x1bb3   :  { %2041 = vmatpush1.msra.mxu1 %v4083_v4 }
0x1bb4   :  { %2042 = vmatprep.subr.mxu1 %v4092_v6 }
0x1bb5   :  { %2043 = vmatpush1.msra.mxu1 %v4101_v9 }
0x1bb6   :  { %2044 = vmatprep.subr.mxu1 %v4110_v11 }
0x1bb7   :  { %2045 = vmatpush1.msra.mxu1 %v4119_v46 }
0x1bb8   :  { %2046 = vmatprep.subr.mxu1 %v4128_v48 }
0x1bb9   :  { %2047 = vmatpush1.msra.mxu1 %v4172_v14 }
0x1bba   :  { %2264 = vmatprep.subr.mxu1 %v4010_v35 }
0x1c6a   :  { %v1850_v33 = vpop.f32.mrf.mxu1 }
0x1c6b   :  { %v1857_v60 = vrot.slane %v1850_v33, 6 }
0x1c6c   :  { %v1852_v36 = vpop.f32.mrf.mxu1 }
0x1c6d   :  { %v1858_v38 = vrot.slane %v1852_v36, 6  ;;  %v1861_v34 = vadd.f32 %v1857_v60, %v4224_v30 }
0x1c6f   :  { %v1862_v41 = vadd.f32 %v1858_v38, %v4219_v24  ;;  %v3097_v3 = vmul.f32 -1.442695, %v1861_v34 }
0x1c71   :  { %3373 = vtanh.f32 %v1862_v41  ;;  %v3098_v55 = vmul.f32 -1.442695, %v1862_v41 }
0x1c72   :  { %3375 = vpow2.f32 %v3097_v3 }
0x1c7e   :  { %v3374_v43 = vpop.eup %3373 }
0x1c7f   :  { %1881 = vrot.lane.b32.xlu0 %v3374_v43, %s3458_s22  ;;  %v3376_v5 = vpop.eup %3375 }
0x1c80   :  { %v1869_v7 = vadd.f32 1.0, %v3376_v5 }
0x1c82   :  { %3377 = vrcp.f32 %v1869_v7 }
0x1c8f   :  { %v3378_v10 = vpop.eup %3377 }
0x1c90   :  { %v1879_v51 = vmul.f32 %v3378_v10, %v1877_v49 }
0x1cf1   :  { %v1882_v13 = vpop.permute.xlu0 %1881 }
0x1cf2   :  { %v1884_v47 = vmul.f32 %v3378_v10, %v1882_v13 }
0x1cf4   :  { %1886 = vrot.lane.b32.xlu1 %v1884_v47, %s3458_s22 }
0x1d66   :  { %v1887_v52 = vpop.permute.xlu1 %1886 }
0x1d67   :  { %v1889_v53 = vadd.f32 %v1887_v52, %v1879_v51 }
0x1d69   :  { %3379 = vtanh.f32 %v1889_v53  ;;  %v1993_v32 = vrot.slane %v1889_v53, 7 }
0x1d6a   :  { %3381 = vpow2.f32 %v3098_v55 }
0x1d76   :  { %v3380_v54 = vpop.eup %3379 }
0x1d77   :  { %1892 = vrot.lane.b32.xlu0 %v3380_v54, %s3458_s22  ;;  %v3382_v56 = vpop.eup %3381 }
0x1d78   :  { %v1870_v8 = vadd.f32 1.0, %v3382_v56 }
0x1d7a   :  { %3383 = vrcp.f32 %v1870_v8 }
0x1d87   :  { %v3384_v58 = vpop.eup %3383 }
0x1de9   :  { %v1893_v59 = vpop.permute.xlu0 %1892 }
0x1dea   :  { %v1895_v61 = vmul.f32 %v3384_v58, %v1893_v59 }
0x1dec   :  { %v1897_v15 = vrot.slane %v1895_v61, 2  ;;  %v2477_v45 = vsel %vm1265_vm6, %v2476_v62, %v1895_v61  ;;  %vm2872_vm6 = vcmask 31751  }
0x1dee   :  { %3099 = vmatmul.mubr.msk.f32.vlgmr.msra.gmra.mxu0 %vm255_vm4, %v1897_v15 }
0x1def   :  { %2149 = vmatpush1.msra.mxu0 %v4019_v37  ;;  %2196 = vmatprep.mubr.f32.mxu0 %v3455_v1 }
0x1df0   :  { %2150 = vmatprep.subr.mxu0 %v4028_v39 }
0x1df1   :  { %2151 = vmatpush1.msra.mxu0 %v4033_v40 }
0x1df2   :  { %2152 = vmatprep.subr.mxu0 %v4042_v42 }
0x1df3   :  { %2153 = vmatpush1.msra.mxu0 %v4051_v44 }
0x1df4   :  { %2154 = vmatprep.subr.mxu0 %v4056_v57 }
0x1df5   :  { %2155 = vmatpush1.msra.mxu0 %v4065_v63 }
0x1df6   :  { %2156 = vmatprep.subr.mxu0 %v4074_v0 }
0x1df7   :  { %2157 = vmatpush1.msra.mxu0 %v4083_v4 }
0x1df8   :  { %2158 = vmatprep.subr.mxu0 %v4092_v6 }
0x1df9   :  { %2159 = vmatpush1.msra.mxu0 %v4101_v9 }
0x1dfa   :  { %2160 = vmatprep.subr.mxu0 %v4110_v11 }
0x1dfb   :  { %2161 = vmatpush1.msra.mxu0 %v4119_v46 }
0x1dfc   :  { %2162 = vmatprep.subr.mxu0 %v4128_v48 }
0x1dfd   :  { %2163 = vmatpush1.msra.mxu0 %v4172_v14 }
0x1dfe   :  { %2380 = vmatprep.subr.mxu0 %v4010_v35 }
0x1eae   :  { %v1966_v50 = vpop.f32.mrf.mxu0 }
0x1eaf   :  { %v1973_v20 = vrot.slane %v1966_v50, 5 }
0x1eb0   :  { %v1968_v16 = vpop.f32.mrf.mxu0 }
0x1eb1   :  { %v1974_v17 = vrot.slane %v1968_v16, 5  ;;  %v1977_v23 = vadd.f32 %v1973_v20, %v4224_v30 }
0x1eb3   :  { %v1978_v18 = vadd.f32 %v1974_v17, %v4219_v24  ;;  %v3100_v25 = vmul.f32 -1.442695, %v1977_v23 }
0x1eb5   :  { %3385 = vtanh.f32 %v1978_v18  ;;  %v3101_v43 = vmul.f32 -1.442695, %v1978_v18 }
0x1eb6   :  { %3387 = vpow2.f32 %v3100_v25 }
0x1ec2   :  { %v3386_v19 = vpop.eup %3385 }
0x1ec3   :  { %1997 = vrot.lane.b32.xlu1 %v3386_v19, %s3458_s22  ;;  %v3388_v26 = vpop.eup %3387 }
0x1ec4   :  { %v1985_v28 = vadd.f32 1.0, %v3388_v26 }
0x1ec6   :  { %3389 = vrcp.f32 %v1985_v28 }
0x1ed3   :  { %v3390_v29 = vpop.eup %3389 }
0x1ed4   :  { %v1995_v33 = vmul.f32 %v3390_v29, %v1993_v32 }
0x1f35   :  { %v1998_v31 = vpop.permute.xlu1 %1997 }
0x1f36   :  { %v2000_v35 = vmul.f32 %v3390_v29, %v1998_v31 }
0x1f38   :  { %2002 = vrot.lane.b32.xlu0 %v2000_v35, %s3458_s22 }
0x1faa   :  { %v2003_v36 = vpop.permute.xlu0 %2002 }
0x1fab   :  { %v2005_v38 = vadd.f32 %v2003_v36, %v1995_v33 }
0x1fad   :  { %3391 = vtanh.f32 %v2005_v38  ;;  %v2109_v15 = vrot.slane %v2005_v38, 7 }
0x1fae   :  { %3393 = vpow2.f32 %v3101_v43 }
0x1fba   :  { %v3392_v41 = vpop.eup %3391 }
0x1fbb   :  { %2008 = vrot.lane.b32.xlu1 %v3392_v41, %s3458_s22  ;;  %v3394_v60 = vpop.eup %3393 }
0x1fbc   :  { %v1986_v34 = vadd.f32 1.0, %v3394_v60 }
0x1fbe   :  { %3395 = vrcp.f32 %v1986_v34 }
0x1fcb   :  { %v3396_v3 = vpop.eup %3395 }
0x202d   :  { %v2009_v5 = vpop.permute.xlu1 %2008 }
0x202e   :  { %v2011_v7 = vmul.f32 %v3396_v3, %v2009_v5 }
0x2030   :  { %v2013_v10 = vrot.slane %v2011_v7, 3  ;;  %v2478_v13 = vsel %vm1267_vm7, %v2477_v45, %v2011_v7 }
0x2032   :  { %3102 = vmatmul.mubr.msk.f32.vlgmr.msra.gmra.mxu1 %vm255_vm4, %v2013_v10 }
0x2033   :  { %2265 = vmatpush1.msra.mxu1 %v4019_v37  ;;  %2312 = vmatprep.mubr.f32.mxu1 %v3455_v1 }
0x2034   :  { %2266 = vmatprep.subr.mxu1 %v4028_v39 }
0x2035   :  { %2267 = vmatpush1.msra.mxu1 %v4033_v40 }
0x2036   :  { %2268 = vmatprep.subr.mxu1 %v4042_v42 }
0x2037   :  { %2269 = vmatpush1.msra.mxu1 %v4051_v44 }
0x2038   :  { %2270 = vmatprep.subr.mxu1 %v4056_v57 }
0x2039   :  { %2271 = vmatpush1.msra.mxu1 %v4065_v63 }
0x203a   :  { %2272 = vmatprep.subr.mxu1 %v4074_v0 }
0x203b   :  { %2273 = vmatpush1.msra.mxu1 %v4083_v4 }
0x203c   :  { %2274 = vmatprep.subr.mxu1 %v4092_v6 }
0x203d   :  { %2275 = vmatpush1.msra.mxu1 %v4101_v9 }
0x203e   :  { %2276 = vmatprep.subr.mxu1 %v4110_v11 }
0x203f   :  { %2277 = vmatpush1.msra.mxu1 %v4119_v46 }
0x2040   :  { %2278 = vmatprep.subr.mxu1 %v4128_v48 }
0x2041   :  { %2279 = vmatpush1.msra.mxu1 %v4172_v14 }
0x2042   :  { %3203 = vmatprep.subr.mxu1 %v3455_v1 }
0x20f2   :  { %v2082_v47 = vpop.f32.mrf.mxu1 }
0x20f3   :  { %v2089_v54 = vrot.slane %v2082_v47, 4 }
0x20f4   :  { %v2084_v49 = vpop.f32.mrf.mxu1 }
0x20f5   :  { %v2090_v51 = vrot.slane %v2084_v49, 4  ;;  %v2093_v55 = vadd.f32 %v2089_v54, %v4224_v30 }
0x20f7   :  { %v2094_v52 = vadd.f32 %v2090_v51, %v4219_v24  ;;  %v3103_v56 = vmul.f32 -1.442695, %v2093_v55 }
0x20f9   :  { %3397 = vtanh.f32 %v2094_v52  ;;  %v3104_v18 = vmul.f32 -1.442695, %v2094_v52 }
0x20fa   :  { %3399 = vpow2.f32 %v3103_v56 }
0x2106   :  { %v3398_v53 = vpop.eup %3397 }
0x2107   :  { %2113 = vrot.lane.b32.xlu0 %v3398_v53, %s3458_s22  ;;  %v3400_v8 = vpop.eup %3399 }
0x2108   :  { %v2101_v58 = vadd.f32 1.0, %v3400_v8 }
0x210a   :  { %3401 = vrcp.f32 %v2101_v58 }
0x2117   :  { %v3402_v59 = vpop.eup %3401 }
0x2118   :  { %v2111_v45 = vmul.f32 %v3402_v59, %v2109_v15 }
0x2179   :  { %v2114_v61 = vpop.permute.xlu0 %2113 }
0x217a   :  { %v2116_v62 = vmul.f32 %v3402_v59, %v2114_v61 }
0x217c   :  { %2118 = vrot.lane.b32.xlu1 %v2116_v62, %s3458_s22 }
0x21ee   :  { %v2119_v50 = vpop.permute.xlu1 %2118 }
0x21ef   :  { %v2121_v16 = vadd.f32 %v2119_v50, %v2111_v45 }
0x21f1   :  { %3403 = vtanh.f32 %v2121_v16 }
0x21f2   :  { %3405 = vpow2.f32 %v3104_v18 }
0x21fe   :  { %v3404_v17 = vpop.eup %3403 }
0x21ff   :  { %2124 = vrot.lane.b32.xlu0 %v3404_v17, %s3458_s22  ;;  %v3406_v19 = vpop.eup %3405 }
0x2200   :  { %v2102_v20 = vadd.f32 1.0, %v3406_v19 }
0x2202   :  { %3407 = vrcp.f32 %v2102_v20 }
0x220f   :  { %v3408_v23 = vpop.eup %3407 }
0x2271   :  { %v2125_v25 = vpop.permute.xlu0 %2124 }
0x2272   :  { %v2127_v26 = vmul.f32 %v3408_v23, %v2125_v25 }
0x2274   :  { %v2129_v28 = vrot.slane %v2127_v26, 4  ;;  %v2479_v29 = vsel %vm1269_vm8, %v2478_v13, %v2127_v26 }
0x2276   :  { %3105 = vmatmul.mubr.msk.f32.vlgmr.msra.gmra.mxu0 %vm255_vm4, %v2129_v28 }
0x2277   :  { %2381 = vmatpush1.msra.mxu0 %v4019_v37  ;;  %2428 = vmatprep.mubr.f32.mxu0 %v3455_v1 }
0x2278   :  { %2382 = vmatprep.subr.mxu0 %v4028_v39 }
0x2279   :  { %2383 = vmatpush1.msra.mxu0 %v4033_v40 }
0x227a   :  { %2384 = vmatprep.subr.mxu0 %v4042_v42 }
0x227b   :  { %2385 = vmatpush1.msra.mxu0 %v4051_v44 }
0x227c   :  { %2386 = vmatprep.subr.mxu0 %v4056_v57 }
0x227d   :  { %2387 = vmatpush1.msra.mxu0 %v4065_v63 }
0x227e   :  { %2388 = vmatprep.subr.mxu0 %v4074_v0 }
0x227f   :  { %2389 = vmatpush1.msra.mxu0 %v4083_v4 }
0x2280   :  { %2390 = vmatprep.subr.mxu0 %v4092_v6 }
0x2281   :  { %2391 = vmatpush1.msra.mxu0 %v4101_v9 }
0x2282   :  { %2392 = vmatprep.subr.mxu0 %v4110_v11 }
0x2283   :  { %2393 = vmatpush1.msra.mxu0 %v4119_v46 }
0x2284   :  { %2394 = vmatprep.subr.mxu0 %v4128_v48  ;;  %v2225_v48 = vrot.slane %v2121_v16, 7 }
0x2285   :  { %2395 = vmatpush1.msra.mxu0 %v4172_v14 }
0x2336   :  { %v2198_v37 = vpop.f32.mrf.mxu0 }
0x2337   :  { %v2205_v57 = vrot.slane %v2198_v37, 3 }
0x2338   :  { %v2200_v39 = vpop.f32.mrf.mxu0 }
0x2339   :  { %v2206_v40 = vrot.slane %v2200_v39, 3  ;;  %v2209_v63 = vadd.f32 %v2205_v57, %v4224_v30 }
0x233b   :  { %v2210_v42 = vadd.f32 %v2206_v40, %v4219_v24  ;;  %v3106_v0 = vmul.f32 -1.442695, %v2209_v63 }
0x233d   :  { %3409 = vtanh.f32 %v2210_v42  ;;  %v3107_v33 = vmul.f32 -1.442695, %v2210_v42 }
0x233e   :  { %3411 = vpow2.f32 %v3106_v0 }
0x234a   :  { %v3410_v44 = vpop.eup %3409 }
0x234b   :  { %2229 = vrot.lane.b32.xlu1 %v3410_v44, %s3458_s22  ;;  %v3412_v4 = vpop.eup %3411 }
0x234c   :  { %v2217_v6 = vadd.f32 1.0, %v3412_v4 }
0x234e   :  { %3413 = vrcp.f32 %v2217_v6 }
0x235b   :  { %v3414_v9 = vpop.eup %3413 }
0x235c   :  { %v2227_v14 = vmul.f32 %v3414_v9, %v2225_v48 }
0x23bd   :  { %v2230_v11 = vpop.permute.xlu1 %2229 }
0x23be   :  { %v2232_v46 = vmul.f32 %v3414_v9, %v2230_v11 }
0x23c0   :  { %2234 = vrot.lane.b32.xlu0 %v2232_v46, %s3458_s22 }
0x2432   :  { %v2235_v31 = vpop.permute.xlu0 %2234 }
0x2433   :  { %v2237_v35 = vadd.f32 %v2235_v31, %v2227_v14 }
0x2435   :  { %3415 = vtanh.f32 %v2237_v35  ;;  %v2341_v58 = vrot.slane %v2237_v35, 7 }
0x2436   :  { %3417 = vpow2.f32 %v3107_v33 }
0x2442   :  { %v3416_v32 = vpop.eup %3415 }
0x2443   :  { %2240 = vrot.lane.b32.xlu1 %v3416_v32, %s3458_s22  ;;  %v3418_v36 = vpop.eup %3417 }
0x2444   :  { %v2218_v38 = vadd.f32 1.0, %v3418_v36 }
0x2446   :  { %3419 = vrcp.f32 %v2218_v38  ;;  %v2569_v38 = vld [vmem:[%s4586_s8 + $0x38] sm:$0xff] }
0x2453   :  { %v3420_v41 = vpop.eup %3419 }
0x24b5   :  { %v2241_v43 = vpop.permute.xlu1 %2240 }
0x24b6   :  { %v2243_v60 = vmul.f32 %v3420_v41, %v2241_v43  ;;  %v2568_v41 = vld [vmem:[%s4586_s8 + $0x30] sm:$0xff]  ;;  %v2566_v43 = vld [vmem:[%s4586_s8 + $0x20] sm:$0xff] }
0x24b8   :  { %v2245_v34 = vrot.slane %v2243_v60, 5  ;;  %v2480_v3 = vsel %vm1271_vm9, %v2479_v29, %v2243_v60  ;;  %v2565_v60 = vld [vmem:[%s4586_s8 + $0x18] sm:$0xff] }
0x24ba   :  { %3108 = vmatmul.mubr.msk.f32.vlgmr.msra.gmra.mxu1 %vm255_vm4, %v2245_v34  ;;  %v2564_v34 = vld [vmem:[%s4586_s8 + $0x10] sm:$0xff] }
0x24bb   :  { %3205 = vmatprep.mubr.msk.f32.mxu1 %vm3456_vm0, %v3455_v1 }
0x257a   :  { %v2314_v5 = vpop.f32.mrf.mxu1 }
0x257b   :  { %v2321_v49 = vrot.slane %v2314_v5, 2  ;;  %v2562_v5 = vld [vmem:[%s4586_s8] sm:$0xff] }
0x257c   :  { %v2316_v7 = vpop.f32.mrf.mxu1 }
0x257d   :  { %v2322_v10 = vrot.slane %v2316_v7, 2  ;;  %v2325_v51 = vadd.f32 %v2321_v49, %v4224_v30  ;;  %v3115_v49 = vld [vmem:[%s4587_s9] ss:$0 sm:$0xff] }
0x257f   :  { %v2326_v13 = vadd.f32 %v2322_v10, %v4219_v24  ;;  %v3109_v52 = vmul.f32 -1.442695, %v2325_v51 }
0x2581   :  { %3421 = vtanh.f32 %v2326_v13  ;;  %v3110_v45 = vmul.f32 -1.442695, %v2326_v13 }
0x2582   :  { %3423 = vpow2.f32 %v3109_v52  ;;  %v2656_v52 = vld [vmem:[%s4588_s10] sm:$0x1] }
0x258e   :  { %v3422_v47 = vpop.eup %3421 }
0x258f   :  { %2345 = vrot.lane.b32.xlu0 %v3422_v47, %s3458_s22  ;;  %v3424_v53 = vpop.eup %3423 }
0x2590   :  { %v2333_v54 = vadd.f32 1.0, %v3424_v53 }
0x2592   :  { %3425 = vrcp.f32 %v2333_v54 }
0x259f   :  { %v3426_v55 = vpop.eup %3425 }
0x25a0   :  { %v2343_v59 = vmul.f32 %v3426_v55, %v2341_v58 }
0x2601   :  { %v2346_v56 = vpop.permute.xlu0 %2345 }
0x2602   :  { %v2348_v8 = vmul.f32 %v3426_v55, %v2346_v56  ;;  %v4425_v56 = vsel %vm2652_vm13, 1.0, %v3455_v1 }
0x2604   :  { %2350 = vrot.lane.b32.xlu1 %v2348_v8, %s3458_s22 }
0x2676   :  { %v2351_v61 = vpop.permute.xlu1 %2350 }
0x2677   :  { %v2353_v62 = vadd.f32 %v2351_v61, %v2343_v59  ;;  %v4433_v61 = vld [vmem:[%s4590_s12] sm:$0xf] }
0x2679   :  { %3427 = vtanh.f32 %v2353_v62  ;;  %v2457_v6 = vrot.slane %v2353_v62, 7 }
0x267a   :  { %3429 = vpow2.f32 %v3110_v45 }
0x2686   :  { %v3428_v15 = vpop.eup %3427 }
0x2687   :  { %2356 = vrot.lane.b32.xlu0 %v3428_v15, %s3458_s22  ;;  %v3430_v50 = vpop.eup %3429 }
0x2688   :  { %v2334_v16 = vadd.f32 1.0, %v3430_v50 }
0x268a   :  { %3431 = vrcp.f32 %v2334_v16 }
0x2697   :  { %v3432_v17 = vpop.eup %3431 }
0x26f9   :  { %v2357_v18 = vpop.permute.xlu0 %2356 }
0x26fa   :  { %v2359_v19 = vmul.f32 %v3432_v17, %v2357_v18 }
0x26fc   :  { %v2361_v20 = vrot.slane %v2359_v19, 6  ;;  %v2481_v23 = vsel %vm1273_vm10, %v2480_v3, %v2359_v19  ;;  %v2563_v3 = vld [vmem:[%s4586_s8 + $0x8] sm:$0xff] }
0x26fe   :  { %3111 = vmatmul.mubr.msk.f32.vlgmr.msra.gmra.mxu0 %vm255_vm4, %v2361_v20 }
0x27be   :  { %v2430_v25 = vpop.f32.mrf.mxu0 }
0x27bf   :  { %v2437_v39 = vrot.slane %v2430_v25, 1 }
0x27c0   :  { %v2432_v26 = vpop.f32.mrf.mxu0 }
0x27c1   :  { %v2438_v28 = vrot.slane %v2432_v26, 1  ;;  %v2441_v40 = vadd.f32 %v2437_v39, %v4224_v30 }
0x27c3   :  { %v2442_v29 = vadd.f32 %v2438_v28, %v4219_v24  ;;  %v3112_v42 = vmul.f32 -1.442695, %v2441_v40 }
0x27c5   :  { %3433 = vtanh.f32 %v2442_v29  ;;  %v3113_v48 = vmul.f32 -1.442695, %v2442_v29 }
0x27c6   :  { %3435 = vpow2.f32 %v3112_v42 }
0x27d2   :  { %v3434_v37 = vpop.eup %3433 }
0x27d3   :  { %2461 = vrot.lane.b32.xlu1 %v3434_v37, %s3458_s22  ;;  %v3436_v44 = vpop.eup %3435 }
0x27d4   :  { %v2449_v57 = vadd.f32 1.0, %v3436_v44 }
0x27d6   :  { %3437 = vrcp.f32 %v2449_v57 }
0x27e3   :  { %v3438_v63 = vpop.eup %3437 }
0x27e4   :  { %v2459_v9 = vmul.f32 %v3438_v63, %v2457_v6 }
0x2845   :  { %v2462_v0 = vpop.permute.xlu1 %2461 }
0x2846   :  { %v2464_v4 = vmul.f32 %v3438_v63, %v2462_v0 }
0x2848   :  { %2466 = vrot.lane.b32.xlu0 %v2464_v4, %s3458_s22 }
0x28ba   :  { %v2467_v24 = vpop.permute.xlu0 %2466 }
0x28bb   :  { %v2469_v11 = vadd.f32 %v2467_v24, %v2459_v9 }
0x28bd   :  { %3439 = vtanh.f32 %v2469_v11 }
0x28be   :  { %3441 = vpow2.f32 %v3113_v48 }
0x28ca   :  { %v3440_v46 = vpop.eup %3439 }
0x28cb   :  { %2472 = vrot.lane.b32.xlu1 %v3440_v46, %s3458_s22  ;;  %v3442_v30 = vpop.eup %3441 }
0x28cc   :  { %v2450_v14 = vadd.f32 1.0, %v3442_v30 }
0x28ce   :  { %3443 = vrcp.f32 %v2450_v14 }
0x28db   :  { %v3444_v31 = vpop.eup %3443 }
0x293d   :  { %v2473_v35 = vpop.permute.xlu1 %2472 }
0x293e   :  { %v2475_v32 = vmul.f32 %v3444_v31, %v2473_v35 }
0x2940   :  { %v2482_v33 = vsel %vm1275_vm11, %v2481_v23, %v2475_v32  ;;  %v2750_v32 = vsub.s32 3, %v3609_v21 }
0x2941   :  { %2484 = vrot.lane.b32.xlu0 %v2482_v33, %s3459_s4 }
0x29b3   :  { %v2485_v36 = vpop.permute.xlu0 %2484 }
0x29b4   :  { %3204 = vmatpush3.msra.mxu1 %v2485_v36 }
0x29b5   :  { %3206 = vmatmul.mubr.msk.f32.vlgmr.msra.gmra.mxu1 %vm147_vm2, %v3618_v27  ;;  %3208 = vmatprep.subr.mxu1 %v3455_v1  ;;  %v2567_v27 = vld [vmem:[%s4586_s8 + $0x28] sm:$0xff] }
0x29b6   :  { %3224 = vmatprep.mubr.msk.f32.mxu1 %vm3456_vm0, %v3455_v1  ;;  %3209 = vmatpush3.msra.mxu1 %v2569_v38 }
0x29b7   :  { %3210 = vmatprep.subr.mxu1 %v3455_v1 }
0x29b8   :  { %3211 = vmatpush3.msra.mxu1 %v2568_v41 }
0x29b9   :  { %3212 = vmatprep.subr.mxu1 %v3455_v1 }
0x29ba   :  { %3213 = vmatpush3.msra.mxu1 %v2567_v27 }
0x29bb   :  { %3214 = vmatprep.subr.mxu1 %v3455_v1 }
0x29bc   :  { %3215 = vmatpush3.msra.mxu1 %v2566_v43 }
0x29bd   :  { %3216 = vmatprep.subr.mxu1 %v3455_v1 }
0x29be   :  { %3217 = vmatpush3.msra.mxu1 %v2565_v60 }
0x29bf   :  { %3218 = vmatprep.subr.mxu1 %v3455_v1 }
0x29c0   :  { %3219 = vmatpush3.msra.mxu1 %v2564_v34 }
0x29c1   :  { %3220 = vmatprep.subr.mxu1 %v3455_v1 }
0x29c2   :  { %3221 = vmatpush3.msra.mxu1 %v2563_v3 }
0x29c3   :  { %3222 = vmatprep.subr.mxu1 %v3455_v1 }
0x29c4   :  { %3223 = vmatpush3.msra.mxu1 %v2562_v5 }
0x2a75   :  { %v2553_v7 = vpop.f32.mrf.mxu1 }
0x2a76   :  { %2558 = vrot.lane.b32.xlu1 %v2553_v7, %s3457_s30 }
0x2a77   :  { %v3207_v10 = vpop.f32.mrf.mxu1 }
0x2ae8   :  { %v2559_v13 = vpop.permute.xlu1 %2558 }
0x2ae9   :  { %v2561_v47 = vsel %vm225_vm3, %v2482_v33, %v2559_v13 }
0x2aea   :  { %3225 = vmatmul.mubr.msk.f32.vlgmr.msra.gmra.mxu1 %vm255_vm4, %v2561_v47  ;;  %v2779_v47 = vsub.s32 4, %v3609_v21 }
0x2baa   :  { %v2646_v51 = vpop.f32.mrf.mxu1 }
0x2bab   :  { %v4414_v53 = vadd.f32 %v3115_v49, %v2646_v51 }
0x2bac   :  { %v3226_v54 = vpop.f32.mrf.mxu1 }
0x2bad   :  { %v2657_v55 = vadd.f32 %v2656_v52, %v4414_v53  ;;  %2651 = vst.msk [vmem:[%s4591_s13] sm:$0xff] %vm2650_vm12, %v4414_v53 }
0x2baf   :  { %v2662_v8 = vrot.slane %v2657_v55, %v3821_v12 }
0x2bb1   :  { %v2664_v58 = vmul.f32 %v4425_v56, %v2662_v8 }
0x2bb3   :  { %v2666_v59 = vsel %vm2665_vm14, %v2664_v58, 0.0 }
0x2bb4   :  { %2667 = vadd.xlane.f32.xlu0 %v2666_v59 }
0x2c3d   :  { %v2668_v62 = vpop.xlane.xlu0 %2667 }
0x2c3e   :  { %v4436_v15 = vadd.f32 %v2668_v62, %v4433_v61 }
0x2c40   :  { %v2670_v1 = vsel %vm2665_vm14, %v4436_v15, -inf }
0x2c41   :  { %v2671_v45 = vrot.slane %v2670_v1, 4 }
0x2c43   :  { %v2672_v12 = vmax.f32 %v2670_v1, %v2671_v45 }
0x2c45   :  { %v2673_v50 = vrot.slane %v2672_v12, 2 }
0x2c47   :  { %v2674_v16 = vmax.f32 %v2672_v12, %v2673_v50 }
0x2c49   :  { %v2675_v17 = vrot.slane %v2674_v16, 1 }
0x2c4b   :  { %v4440_v18 = vmax.f32 %v2674_v16, %v2675_v17  ;;  %v2808_v16 = vsub.s32 5, %v3609_v21 }
0x2c4d   :  { %vm2677_vm15 = vcmp.ge.f32.partialorder %v4436_v15, %v4440_v18  ;;  %v2689_v19 = vadd.f32 %v4440_v18, %v4414_v53 }
0x2c4f   :  { %v2693_v20 = vrot.slane %v2689_v19, %v3810_v2  ;;  %v2721_v2 = vsub.s32 2, %v3609_v21 }
0x2c51   :  { %v2694_v23 = vmul.f32 %v4425_v56, %v2693_v20 }
0x2c53   :  { %v2695_v25 = vsel %vm2665_vm14, %v2694_v23, 0.0 }
0x2c54   :  { %2696 = vadd.xlane.f32.xlu1 %v2695_v25 }
0x2cdd   :  { %v2697_v26 = vpop.xlane.xlu1 %2696 }
0x2cde   :  { %v4450_v28 = vadd.f32 %v2697_v26, %v4433_v61 }
0x2ce0   :  { %v2699_v29 = vsel %vm2665_vm14, %v4450_v28, -inf }
0x2ce1   :  { %v2700_v37 = vrot.slane %v2699_v29, 4 }
0x2ce3   :  { %v2701_v39 = vmax.f32 %v2699_v29, %v2700_v37 }
0x2ce5   :  { %v2702_v40 = vrot.slane %v2701_v39, 2 }
0x2ce7   :  { %v2703_v42 = vmax.f32 %v2701_v39, %v2702_v40 }
0x2ce9   :  { %v2704_v44 = vrot.slane %v2703_v42, 1 }
0x2ceb   :  { %v4454_v57 = vmax.f32 %v2703_v42, %v2704_v44 }
0x2ced   :  { %vm2706_vm0 = vcmp.ge.f32.partialorder %v4450_v28, %v4454_v57  ;;  %v2718_v63 = vadd.f32 %v4454_v57, %v4414_v53 }
0x2cef   :  { %v2722_v0 = vrot.slane %v2718_v63, %v2721_v2  ;;  %v2837_v63 = vsub.s32 6, %v3609_v21 }
0x2cf1   :  { %v2723_v4 = vmul.f32 %v4425_v56, %v2722_v0 }
0x2cf3   :  { %v2724_v6 = vsel %vm2665_vm14, %v2723_v4, 0.0 }
0x2cf4   :  { %2725 = vadd.xlane.f32.xlu0 %v2724_v6 }
0x2d7d   :  { %v2726_v9 = vpop.xlane.xlu0 %2725 }
0x2d7e   :  { %v4464_v24 = vadd.f32 %v2726_v9, %v4433_v61 }
0x2d80   :  { %v2728_v11 = vsel %vm2665_vm14, %v4464_v24, -inf }
0x2d81   :  { %v2729_v46 = vrot.slane %v2728_v11, 4 }
0x2d83   :  { %v2730_v48 = vmax.f32 %v2728_v11, %v2729_v46 }
0x2d85   :  { %v2731_v30 = vrot.slane %v2730_v48, 2 }
0x2d87   :  { %v2732_v14 = vmax.f32 %v2730_v48, %v2731_v30 }
0x2d89   :  { %v2733_v31 = vrot.slane %v2732_v14, 1 }
0x2d8b   :  { %v4468_v35 = vmax.f32 %v2732_v14, %v2733_v31 }
0x2d8d   :  { %vm2735_vm1 = vcmp.ge.f32.partialorder %v4464_v24, %v4468_v35  ;;  %v2747_v33 = vadd.f32 %v4468_v35, %v4414_v53 }
0x2d8f   :  { %v2751_v36 = vrot.slane %v2747_v33, %v2750_v32 }
0x2d91   :  { %v2752_v38 = vmul.f32 %v4425_v56, %v2751_v36 }
0x2d93   :  { %v2753_v41 = vsel %vm2665_vm14, %v2752_v38, 0.0  ;;  %v3118_v38 = vld [vmem:[%s4589_s11] ss:$0 sm:$0xff] }
0x2d94   :  { %2754 = vadd.xlane.f32.xlu0 %v2753_v41 }
0x2e1d   :  { %v2755_v27 = vpop.xlane.xlu0 %2754 }
0x2e1e   :  { %v4478_v43 = vadd.f32 %v2755_v27, %v4433_v61 }
0x2e20   :  { %v2757_v60 = vsel %vm2665_vm14, %v4478_v43, -inf }
0x2e21   :  { %v2758_v34 = vrot.slane %v2757_v60, 4 }
0x2e23   :  { %v2759_v3 = vmax.f32 %v2757_v60, %v2758_v34 }
0x2e25   :  { %v2760_v5 = vrot.slane %v2759_v3, 2 }
0x2e27   :  { %v2761_v7 = vmax.f32 %v2759_v3, %v2760_v5 }
0x2e29   :  { %v2762_v10 = vrot.slane %v2761_v7, 1 }
0x2e2b   :  { %v4482_v13 = vmax.f32 %v2761_v7, %v2762_v10 }
0x2e2d   :  { %vm2764_vm2 = vcmp.ge.f32.partialorder %v4478_v43, %v4482_v13  ;;  %v2776_v49 = vadd.f32 %v4482_v13, %v4414_v53 }
0x2e2f   :  { %v2780_v51 = vrot.slane %v2776_v49, %v2779_v47 }
0x2e31   :  { %v2781_v52 = vmul.f32 %v4425_v56, %v2780_v51 }
0x2e33   :  { %v2782_v54 = vsel %vm2665_vm14, %v2781_v52, 0.0 }
0x2e34   :  { %2783 = vadd.xlane.f32.xlu1 %v2782_v54 }
0x2ebd   :  { %v2784_v55 = vpop.xlane.xlu1 %2783 }
0x2ebe   :  { %v4492_v8 = vadd.f32 %v2784_v55, %v4433_v61 }
0x2ec0   :  { %v2786_v58 = vsel %vm2665_vm14, %v4492_v8, -inf }
0x2ec1   :  { %v2787_v59 = vrot.slane %v2786_v58, 4 }
0x2ec3   :  { %v2788_v62 = vmax.f32 %v2786_v58, %v2787_v59 }
0x2ec5   :  { %v2789_v1 = vrot.slane %v2788_v62, 2 }
0x2ec7   :  { %v2790_v45 = vmax.f32 %v2788_v62, %v2789_v1 }
0x2ec9   :  { %v2791_v12 = vrot.slane %v2790_v45, 1 }
0x2ecb   :  { %v4496_v50 = vmax.f32 %v2790_v45, %v2791_v12 }
0x2ecd   :  { %vm2793_vm3 = vcmp.ge.f32.partialorder %v4492_v8, %v4496_v50  ;;  %v2805_v17 = vadd.f32 %v4496_v50, %v4414_v53 }
0x2ecf   :  { %v2809_v19 = vrot.slane %v2805_v17, %v2808_v16 }
0x2ed1   :  { %v2810_v20 = vmul.f32 %v4425_v56, %v2809_v19 }
0x2ed3   :  { %v2811_v23 = vsel %vm2665_vm14, %v2810_v20, 0.0 }
0x2ed4   :  { %2812 = vadd.xlane.f32.xlu0 %v2811_v23 }
0x2f5d   :  { %v2813_v25 = vpop.xlane.xlu0 %2812 }
0x2f5e   :  { %v4506_v26 = vadd.f32 %v2813_v25, %v4433_v61 }
0x2f60   :  { %v2815_v29 = vsel %vm2665_vm14, %v4506_v26, -inf }
0x2f61   :  { %v2816_v37 = vrot.slane %v2815_v29, 4 }
0x2f63   :  { %v2817_v39 = vmax.f32 %v2815_v29, %v2816_v37 }
0x2f65   :  { %v2818_v40 = vrot.slane %v2817_v39, 2 }
0x2f67   :  { %v2819_v42 = vmax.f32 %v2817_v39, %v2818_v40 }
0x2f69   :  { %v2820_v44 = vrot.slane %v2819_v42, 1 }
0x2f6b   :  { %v4510_v2 = vmax.f32 %v2819_v42, %v2820_v44 }
0x2f6d   :  { %vm2822_vm4 = vcmp.ge.f32.partialorder %v4506_v26, %v4510_v2  ;;  %v2834_v0 = vadd.f32 %v4510_v2, %v4414_v53 }
0x2f6f   :  { %v2838_v4 = vrot.slane %v2834_v0, %v2837_v63 }
0x2f71   :  { %v2839_v6 = vmul.f32 %v4425_v56, %v2838_v4 }
0x2f73   :  { %v2840_v9 = vsel %vm2665_vm14, %v2839_v6, 0.0 }
0x2f74   :  { %2841 = vadd.xlane.f32.xlu1 %v2840_v9 }
0x2ffd   :  { %v2842_v11 = vpop.xlane.xlu1 %2841 }
0x2ffe   :  { %v2843_v46 = vadd.f32 %v2842_v11, %v4433_v61 }
0x3000   :  { %v2844_v48 = vsel %vm2665_vm14, %v2843_v46, -inf }
0x3001   :  { %v2845_v30 = vrot.slane %v2844_v48, 4 }
0x3003   :  { %v2846_v14 = vmax.f32 %v2844_v48, %v2845_v30 }
0x3005   :  { %v2847_v31 = vrot.slane %v2846_v14, 2 }
0x3007   :  { %v2848_v32 = vmax.f32 %v2846_v14, %v2847_v31 }
0x3009   :  { %v2849_v33 = vrot.slane %v2848_v32, 1 }
0x300b   :  { %v2850_v36 = vmax.f32 %v2848_v32, %v2849_v33 }
0x300d   :  { %vm2851_vm5 = vcmp.ge.f32.partialorder %v2843_v46, %v2850_v36  ;;  %v2863_v56 = vadd.f32 %v2850_v36, %v4414_v53 }
0x300e   :  { %v2852_v37 = vsel %vm2851_vm5, %v3609_v21, 4 }
0x300f   :  { %v2871_v41 = vadd.f32 %v3118_v38, %v2863_v56  ;;  %v2853_v39 = vsel %vm2665_vm14, %v2852_v37, 2147483647 }
0x3010   :  { %v2854_v40 = vrot.slane %v2853_v39, 4 }
0x3011   :  { %v2873_v27 = vsel %vm2872_vm6, %v2871_v41, -inf }
0x3012   :  { %2874 = vmax.xlane.f32.xlu0 %v2873_v27  ;;  %vm2855_vm13 = vcmp.lt.s32.totalorder %v2853_v39, %v2854_v40 }
0x3013   :  { %v2856_v42 = vsel %vm2855_vm13, %v2853_v39, %v2854_v40 }
0x3014   :  { %v2857_v44 = vrot.slane %v2856_v42, 2 }
0x309b   :  { %v2875_v61 = vpop.xlane.xlu0 %2874 }
0x309c   :  { %v2876_v60 = vrot.slane %v2875_v61, 4 }
0x309e   :  { %v2877_v34 = vmax.f32 %v2875_v61, %v2876_v60 }
0x30a0   :  { %v2878_v3 = vrot.slane %v2877_v34, 2 }
0x30a2   :  { %v2879_v5 = vmax.f32 %v2877_v34, %v2878_v3 }
0x30a4   :  { %v2880_v7 = vrot.slane %v2879_v5, 1 }
0x30a6   :  { %v2881_v10 = vmax.f32 %v2879_v5, %v2880_v7 }
0x30a8   :  { %3227 = vpush %v2881_v10 }
0x30d9   :  { %s3228_s27 = spop %3227 }
0x30da   :  { %v2883_v47 = vstv %s3228_s27 }
0x30db   :  { %vm2884_vm7 = vcmp.ge.f32.partialorder %v2871_v41, %v2883_v47  ;;  %v2823_v41 = vsel %vm2822_vm4, %v3609_v21, 4 }
0x30dc   :  { %v2885_v49 = vsel %vm2884_vm7, %v3611_v22, 4  ;;  %v2824_v27 = vsel %vm2665_vm14, %v2823_v41, 2147483647 }
0x30dd   :  { %v2886_v53 = vsel %vm2872_vm6, %v2885_v49, 2147483647  ;;  %vm2858_vm6 = vcmp.lt.s32.totalorder %v2856_v42, %v2857_v44  ;;  %v2825_v61 = vrot.slane %v2824_v27, 4 }
0x30de   :  { %v2888_v51 = vshra.s32 %v2886_v53, 16  ;;  %v2887_v54 = vand.u32 65535, %v2886_v53  ;;  %v2859_v63 = vsel %vm2858_vm6, %v2856_v42, %v2857_v44 }
0x30df   :  { %v2860_v0 = vrot.slane %v2859_v63, 1  ;;  %vm2826_vm5 = vcmp.lt.s32.totalorder %v2824_v27, %v2825_v61 }
0x30e0   :  { %v2890_v52 = vcvt.s32.f32 %v2888_v51  ;;  %v2889_v58 = vcvt.s32.f32 %v2887_v54  ;;  %v2827_v60 = vsel %vm2826_vm5, %v2824_v27, %v2825_v61 }
0x30e1   :  { %vm2861_vm7 = vcmp.lt.s32.totalorder %v2859_v63, %v2860_v0  ;;  %v2828_v34 = vrot.slane %v2827_v60, 2 }
0x30e2   :  { %2891 = vmin.xlane.f32.xlu1 %v2890_v52  ;;  %v2862_v6 = vsel %vm2861_vm7, %v2859_v63, %v2860_v0 }
0x316b   :  { %v2892_v55 = vpop.xlane.xlu1 %2891 }
0x316c   :  { %vm2893_vm8 = vcmp.eq.f32.partialorder %v2890_v52, %v2892_v55  ;;  %v2898_v62 = vcvt.f32.s32 %v2892_v55 }
0x316d   :  { %v2894_v59 = vsel %vm2893_vm8, %v2889_v58, inf }
0x316e   :  { %2895 = vmin.xlane.f32.xlu0 %v2894_v59  ;;  %v2899_v45 = vshll.u32 %v2898_v62, 16 }
0x31f7   :  { %v2896_v1 = vpop.xlane.xlu0 %2895 }
0x31f8   :  { %v2897_v12 = vcvt.f32.s32 %v2896_v1  ;;  %v2794_v1 = vsel %vm2793_vm3, %v3609_v21, 4 }
0x31fa   :  { %v2900_v16 = vadd.s32 %v2899_v45, %v2897_v12  ;;  %v2795_v45 = vsel %vm2665_vm14, %v2794_v1, 2147483647 }
0x31fb   :  { %v2796_v12 = vrot.slane %v2795_v45, 4 }
0x31fc   :  { %v2901_v17 = vrot.slane %v2900_v16, 4 }
0x31fd   :  { %vm2797_vm4 = vcmp.lt.s32.totalorder %v2795_v45, %v2796_v12 }
0x31fe   :  { %vm2902_vm9 = vcmp.lt.s32.totalorder %v2900_v16, %v2901_v17 }
0x31ff   :  { %v2903_v19 = vsel %vm2902_vm9, %v2900_v16, %v2901_v17  ;;  %vm2829_vm9 = vcmp.lt.s32.totalorder %v2827_v60, %v2828_v34  ;;  %v2798_v16 = vsel %vm2797_vm4, %v2795_v45, %v2796_v12 }
0x3200   :  { %v2904_v20 = vrot.slane %v2903_v19, 2  ;;  %v2830_v3 = vsel %vm2829_vm9, %v2827_v60, %v2828_v34  ;;  %v2799_v17 = vrot.slane %v2798_v16, 2 }
0x3201   :  { %v2831_v5 = vrot.slane %v2830_v3, 1 }
0x3202   :  { %vm2905_vm10 = vcmp.lt.s32.totalorder %v2903_v19, %v2904_v20  ;;  %vm2800_vm13 = vcmp.lt.s32.totalorder %v2798_v16, %v2799_v17 }
0x3203   :  { %v2906_v23 = vsel %vm2905_vm10, %v2903_v19, %v2904_v20  ;;  %vm2832_vm10 = vcmp.lt.s32.totalorder %v2830_v3, %v2831_v5  ;;  %v2801_v19 = vsel %vm2800_vm13, %v2798_v16, %v2799_v17 }
0x3204   :  { %v2907_v25 = vrot.slane %v2906_v23, 1  ;;  %v2833_v10 = vsel %vm2832_vm10, %v2830_v3, %v2831_v5  ;;  %v2802_v20 = vrot.slane %v2801_v19, 1 }
0x3206   :  { %vm2908_vm11 = vcmp.lt.s32.totalorder %v2906_v23, %v2907_v25  ;;  %vm2803_vm6 = vcmp.lt.s32.totalorder %v2801_v19, %v2802_v20 }
0x3207   :  { %v2909_v29 = vsel %vm2908_vm11, %v2906_v23, %v2907_v25  ;;  %v2804_v25 = vsel %vm2803_vm6, %v2801_v19, %v2802_v20  ;;  %v2707_v19 = vsel %vm2706_vm0, %v3609_v21, 4 }
0x3208   :  { %3229 = vpush %v2909_v29  ;;  %v2708_v20 = vsel %vm2665_vm14, %v2707_v19, 2147483647 }
0x3239   :  { %s3230_s11 = spop %3229 }
0x323a   :  { %2912 = sst [smem:[#allocation2 + $0x7]] %s3230_s11  ;;  %v2913_v4 = vstv %s3230_s11 }
0x323b   :  { %vm2914_vm8 = vcmp.eq.s32.totalorder %v3611_v22, %v2913_v4 }
0x323c   :  { %v2915_v9 = vsel %vm2914_vm8, %v2862_v6, 0 }
0x323d   :  { %v2916_v11 = vsel %vm2650_vm12, %v2915_v9, 0  ;;  %v2765_v9 = vsel %vm2764_vm2, %v3609_v21, 4 }
0x323e   :  { %v2918_v46 = vshrl.u32 %v2916_v11, 16  ;;  %v2917_v48 = vand.u32 65535, %v2916_v11  ;;  %v2766_v11 = vsel %vm2665_vm14, %v2765_v9, 2147483647 }
0x3240   :  { %v2920_v30 = vcvt.s32.f32 %v2918_v46  ;;  %v2919_v14 = vcvt.s32.f32 %v2917_v48  ;;  %v2767_v46 = vrot.slane %v2766_v11, 4 }
0x3242   :  { %2923 = vadd.xlane.f32.xlu1 %v2920_v30  ;;  %2921 = vadd.xlane.f32.xlu0 %v2919_v14  ;;  %vm2768_vm3 = vcmp.lt.s32.totalorder %v2766_v11, %v2767_v46 }
0x3243   :  { %v2769_v48 = vsel %vm2768_vm3, %v2766_v11, %v2767_v46 }
0x3244   :  { %v2770_v30 = vrot.slane %v2769_v48, 2 }
0x3246   :  { %vm2771_vm8 = vcmp.lt.s32.totalorder %v2769_v48, %v2770_v30 }
0x3247   :  { %v2772_v14 = vsel %vm2771_vm8, %v2769_v48, %v2770_v30  ;;  %v2678_v48 = vsel %vm2677_vm15, %v3609_v21, 4 }
0x3248   :  { %v2679_v30 = vsel %vm2665_vm14, %v2678_v48, 2147483647 }
0x32cb   :  { %v2924_v31 = vpop.xlane.xlu1 %2923  ;;  %v2922_v32 = vpop.xlane.xlu0 %2921 }
0x32cc   :  { %v2926_v33 = vcvt.f32.s32 %v2924_v31  ;;  %v2925_v38 = vcvt.f32.s32 %v2922_v32  ;;  %v2773_v31 = vrot.slane %v2772_v14, 1 }
0x32ce   :  { %v2927_v36 = vshll.u32 %v2926_v33, 16  ;;  %vm2774_vm5 = vcmp.lt.s32.totalorder %v2772_v14, %v2773_v31 }
0x32cf   :  { %v2775_v33 = vsel %vm2774_vm5, %v2772_v14, %v2773_v31  ;;  %v2680_v14 = vrot.slane %v2679_v30, 4 }
0x32d0   :  { %v2928_v56 = vadd.s32 %v2927_v36, %v2925_v38 }
0x32d1   :  { %vm2681_vm0 = vcmp.lt.s32.totalorder %v2679_v30, %v2680_v14 }
0x32d2   :  { %3231 = vpush %v2928_v56  ;;  %v2682_v31 = vsel %vm2681_vm0, %v2679_v30, %v2680_v14 }
0x3303   :  { %s3232_s5 = spop %3231 }
0x3304   :  { %2931 = sst [smem:[#allocation2 + $0x6]] %s3232_s5  ;;  %v2932_v7 = vstv %s3232_s5 }
0x3305   :  { %vm2933_vm11 = vcmp.eq.s32.totalorder %v3611_v22, %v2932_v7  ;;  %v2736_v7 = vsel %vm2735_vm1, %v3609_v21, 4 }
0x3306   :  { %v2934_v47 = vsel %vm2933_vm11, %v2833_v10, 0  ;;  %v2737_v10 = vsel %vm2665_vm14, %v2736_v7, 2147483647 }
0x3307   :  { %v2935_v26 = vsel %vm2650_vm12, %v2934_v47, 0  ;;  %v2738_v47 = vrot.slane %v2737_v10, 4 }
0x3308   :  { %v2937_v2 = vshrl.u32 %v2935_v26, 16  ;;  %v2936_v49 = vand.u32 65535, %v2935_v26 }
0x3309   :  { %vm2739_vm2 = vcmp.lt.s32.totalorder %v2737_v10, %v2738_v47 }
0x330a   :  { %v2939_v53 = vcvt.s32.f32 %v2937_v2  ;;  %v2938_v51 = vcvt.s32.f32 %v2936_v49  ;;  %v2740_v26 = vsel %vm2739_vm2, %v2737_v10, %v2738_v47 }
0x330b   :  { %v2741_v2 = vrot.slane %v2740_v26, 2 }
0x330c   :  { %2942 = vadd.xlane.f32.xlu1 %v2939_v53  ;;  %2940 = vadd.xlane.f32.xlu0 %v2938_v51 }
0x330d   :  { %vm2742_vm10 = vcmp.lt.s32.totalorder %v2740_v26, %v2741_v2 }
0x330e   :  { %v2743_v49 = vsel %vm2742_vm10, %v2740_v26, %v2741_v2 }
0x330f   :  { %v2744_v53 = vrot.slane %v2743_v49, 1 }
0x3311   :  { %vm2745_vm11 = vcmp.lt.s32.totalorder %v2743_v49, %v2744_v53 }
0x3395   :  { %v2943_v52 = vpop.xlane.xlu1 %2942  ;;  %v2941_v54 = vpop.xlane.xlu0 %2940 }
0x3396   :  { %v2945_v55 = vcvt.f32.s32 %v2943_v52  ;;  %v2944_v59 = vcvt.f32.s32 %v2941_v54  ;;  %v2746_v52 = vsel %vm2745_vm11, %v2743_v49, %v2744_v53 }
0x3398   :  { %v2946_v58 = vshll.u32 %v2945_v55, 16 }
0x339a   :  { %v2947_v62 = vadd.s32 %v2946_v58, %v2944_v59 }
0x339c   :  { %3233 = vpush %v2947_v62 }
0x33cd   :  { %s3234_s6 = spop %3233 }
0x33ce   :  { %2950 = sst [smem:[#allocation2 + $0x5]] %s3234_s6  ;;  %v2951_v23 = vstv %s3234_s6 }
0x33cf   :  { %vm2952_vm7 = vcmp.eq.s32.totalorder %v3611_v22, %v2951_v23  ;;  %v2709_v23 = vrot.slane %v2708_v20, 4 }
0x33d0   :  { %v2953_v29 = vsel %vm2952_vm7, %v2804_v25, 0 }
0x33d1   :  { %v2954_v8 = vsel %vm2650_vm12, %v2953_v29, 0  ;;  %vm2710_vm1 = vcmp.lt.s32.totalorder %v2708_v20, %v2709_v23 }
0x33d2   :  { %v2956_v50 = vshrl.u32 %v2954_v8, 16  ;;  %v2955_v37 = vand.u32 65535, %v2954_v8  ;;  %v2711_v25 = vsel %vm2710_vm1, %v2708_v20, %v2709_v23 }
0x33d3   :  { %v2712_v29 = vrot.slane %v2711_v25, 2 }
0x33d4   :  { %v2958_v39 = vcvt.s32.f32 %v2956_v50  ;;  %v2957_v40 = vcvt.s32.f32 %v2955_v37 }
0x33d5   :  { %vm2713_vm13 = vcmp.lt.s32.totalorder %v2711_v25, %v2712_v29 }
0x33d6   :  { %2961 = vadd.xlane.f32.xlu1 %v2958_v39  ;;  %2959 = vadd.xlane.f32.xlu0 %v2957_v40  ;;  %v2714_v8 = vsel %vm2713_vm13, %v2711_v25, %v2712_v29 }
0x33d7   :  { %v2715_v50 = vrot.slane %v2714_v8, 1 }
0x33d9   :  { %vm2716_vm6 = vcmp.lt.s32.totalorder %v2714_v8, %v2715_v50 }
0x33da   :  { %v2717_v39 = vsel %vm2716_vm6, %v2714_v8, %v2715_v50 }
0x345f   :  { %v2962_v42 = vpop.xlane.xlu1 %2961  ;;  %v2960_v44 = vpop.xlane.xlu0 %2959 }
0x3460   :  { %v2964_v63 = vcvt.f32.s32 %v2962_v42  ;;  %v2963_v4 = vcvt.f32.s32 %v2960_v44 }
0x3462   :  { %v2965_v0 = vshll.u32 %v2964_v63, 16 }
0x3464   :  { %v2966_v6 = vadd.s32 %v2965_v0, %v2963_v4 }
0x3466   :  { %3235 = vpush %v2966_v6 }
0x3497   :  { %s3236_s7 = spop %3235 }
0x3498   :  { %2969 = sst [smem:[#allocation2 + $0x4]] %s3236_s7  ;;  %v2970_v32 = vstv %s3236_s7 }
0x3499   :  { %vm2971_vm9 = vcmp.eq.s32.totalorder %v3611_v22, %v2970_v32  ;;  %v2683_v32 = vrot.slane %v2682_v31, 2 }
0x349a   :  { %v2972_v36 = vsel %vm2971_vm9, %v2775_v33, 0 }
0x349b   :  { %v2973_v43 = vsel %vm2650_vm12, %v2972_v36, 0  ;;  %vm2684_vm3 = vcmp.lt.s32.totalorder %v2682_v31, %v2683_v32 }
0x349c   :  { %v2975_v13 = vshrl.u32 %v2973_v43, 16  ;;  %v2974_v38 = vand.u32 65535, %v2973_v43  ;;  %v2685_v33 = vsel %vm2684_vm3, %v2682_v31, %v2683_v32 }
0x349d   :  { %v2686_v36 = vrot.slane %v2685_v33, 1 }
0x349e   :  { %v2977_v56 = vcvt.s32.f32 %v2975_v13  ;;  %v2976_v41 = vcvt.s32.f32 %v2974_v38 }
0x349f   :  { %vm2687_vm8 = vcmp.lt.s32.totalorder %v2685_v33, %v2686_v36 }
0x34a0   :  { %2980 = vadd.xlane.f32.xlu1 %v2977_v56  ;;  %2978 = vadd.xlane.f32.xlu0 %v2976_v41  ;;  %v2688_v13 = vsel %vm2687_vm8, %v2685_v33, %v2686_v36 }
0x3529   :  { %v2981_v27 = vpop.xlane.xlu1 %2980  ;;  %v2979_v61 = vpop.xlane.xlu0 %2978 }
0x352a   :  { %v2983_v60 = vcvt.f32.s32 %v2981_v27  ;;  %v2982_v3 = vcvt.f32.s32 %v2979_v61 }
0x352c   :  { %v2984_v34 = vshll.u32 %v2983_v60, 16 }
0x352e   :  { %v2985_v5 = vadd.s32 %v2984_v34, %v2982_v3 }
0x3530   :  { %3237 = vpush %v2985_v5 }
0x3561   :  { %s3238_s22 = spop %3237 }
0x3562   :  { %2988 = sst [smem:[#allocation2 + $0x3]] %s3238_s22  ;;  %v2989_v51 = vstv %s3238_s22 }
0x3563   :  { %vm2990_vm4 = vcmp.eq.s32.totalorder %v3611_v22, %v2989_v51 }
0x3564   :  { %v2991_v54 = vsel %vm2990_vm4, %v2746_v52, 0 }
0x3565   :  { %v2992_v24 = vsel %vm2650_vm12, %v2991_v54, 0 }
0x3566   :  { %v2994_v35 = vshrl.u32 %v2992_v24, 16  ;;  %v2993_v55 = vand.u32 65535, %v2992_v24 }
0x3568   :  { %v2996_v58 = vcvt.s32.f32 %v2994_v35  ;;  %v2995_v59 = vcvt.s32.f32 %v2993_v55 }
0x356a   :  { %2999 = vadd.xlane.f32.xlu1 %v2996_v58  ;;  %2997 = vadd.xlane.f32.xlu0 %v2995_v59 }
0x35f3   :  { %v3000_v62 = vpop.xlane.xlu1 %2999  ;;  %v2998_v1 = vpop.xlane.xlu0 %2997 }
0x35f4   :  { %v3002_v45 = vcvt.f32.s32 %v3000_v62  ;;  %v3001_v16 = vcvt.f32.s32 %v2998_v1 }
0x35f6   :  { %v3003_v12 = vshll.u32 %v3002_v45, 16 }
0x35f8   :  { %v3004_v17 = vadd.s32 %v3003_v12, %v3001_v16 }
0x35fa   :  { %3239 = vpush %v3004_v17 }
0x362b   :  { %s3240_s28 = spop %3239 }
0x362c   :  { %3007 = sst [smem:[#allocation2 + $0x2]] %s3240_s28  ;;  %v3008_v37 = vstv %s3240_s28 }
0x362d   :  { %vm3009_vm7 = vcmp.eq.s32.totalorder %v3611_v22, %v3008_v37 }
0x362e   :  { %v3010_v40 = vsel %vm3009_vm7, %v2717_v39, 0 }
0x362f   :  { %v3011_v28 = vsel %vm2650_vm12, %v3010_v40, 0 }
0x3630   :  { %v3013_v57 = vshrl.u32 %v3011_v28, 16  ;;  %v3012_v42 = vand.u32 65535, %v3011_v28 }
0x3632   :  { %v3015_v44 = vcvt.s32.f32 %v3013_v57  ;;  %v3014_v63 = vcvt.s32.f32 %v3012_v42 }
0x3634   :  { %3018 = vadd.xlane.f32.xlu1 %v3015_v44  ;;  %3016 = vadd.xlane.f32.xlu0 %v3014_v63 }
0x36bd   :  { %v3019_v0 = vpop.xlane.xlu1 %3018  ;;  %v3017_v4 = vpop.xlane.xlu0 %3016 }
0x36be   :  { %v3021_v6 = vcvt.f32.s32 %v3019_v0  ;;  %v3020_v11 = vcvt.f32.s32 %v3017_v4 }
0x36c0   :  { %v3022_v9 = vshll.u32 %v3021_v6, 16 }
0x36c2   :  { %v3023_v46 = vadd.s32 %v3022_v9, %v3020_v11 }
0x36c4   :  { %3241 = vpush %v3023_v46 }
0x36f5   :  { %s3242_s2 = spop %3241 }
0x36f6   :  { %3026 = sst [smem:[#allocation2 + $0x1]] %s3242_s2  ;;  %v3027_v43 = vstv %s3242_s2 }
0x36f7   :  { %vm3028_vm5 = vcmp.eq.s32.totalorder %v3611_v22, %v3027_v43 }
0x36f8   :  { %v3029_v38 = vsel %vm3028_vm5, %v2688_v13, 0 }
0x36f9   :  { %v3030_v15 = vsel %vm2650_vm12, %v3029_v38, 0 }
0x36fa   :  { %v3032_v21 = vshrl.u32 %v3030_v15, 16  ;;  %v3031_v18 = vand.u32 65535, %v3030_v15 }
0x36fc   :  { %v3034_v56 = vcvt.s32.f32 %v3032_v21  ;;  %v3033_v41 = vcvt.s32.f32 %v3031_v18 }
0x36fe   :  { %3037 = vadd.xlane.f32.xlu1 %v3034_v56  ;;  %3035 = vadd.xlane.f32.xlu0 %v3033_v41 }
0x3787   :  { %v3038_v27 = vpop.xlane.xlu1 %3037  ;;  %v3036_v61 = vpop.xlane.xlu0 %3035 }
0x3788   :  { %v3040_v60 = vcvt.f32.s32 %v3038_v27  ;;  %v3039_v3 = vcvt.f32.s32 %v3036_v61 }
0x378a   :  { %v3041_v34 = vshll.u32 %v3040_v60, 16 }
0x378c   :  { %v3042_v5 = vadd.s32 %v3041_v34, %v3039_v3 }
0x378e   :  { %3243 = vpush %v3042_v5 }
0x37bf   :  { %s3244_s4 = spop %3243 }
0x37c0   :  { %3045 = sst [smem:[#allocation2]] %s3244_s4 }
0x37c1   :  { %3055 = dma.smem_to_hbm %s3460_s0, 16, %s4592_s14, [#allocation3]  }
0x37c2   :  { %3453 = dma.done.wait [#allocation3], 16  }
0x37c3   :  { %3454 = vsyncadd [#allocation3], 4294967280 }
0x37c4   :  { %3061 = sfence }
0x37c5   :  { %3062 = vsyncpa [#allocation3], 1 }

</bundles_post_ra>
